<compile_context>
chip_gen: v5e
topology: v5e:2x2
jax: 0.10.0
libtpu: 0.0.40
codegen_flags: <defaults>
</compile_context>

<pallas_src>
import functools
import math

import jax
import jax.numpy as jnp
from jax.experimental import pallas as pl
from jax.experimental.pallas import tpu as pltpu


def _mhsa_kernel(x_ref, am_ref, wqkv_ref, bqkv_ref, wout_ref, bout_ref,
                 out_ref, *, n_heads: int):
    # x_ref:    (Bb, T, C)   block of Bb sequences
    # am_ref:   (Bb, 1, T)   attention mask (1.0 = keep, 0.0 = pad)
    # wqkv_ref: (C, 3C)      QKV weights (1/sqrt(D) pre-folded into Q columns)
    # bqkv_ref: (1, 3C)
    # wout_ref: (H, D, C)    head-major output projection weights
    # bout_ref: (1, C)
    # out_ref:  (Bb, T, C)
    Bb, T, C = x_ref.shape
    H = n_heads
    D = C // H
    N = Bb * T

    # Flatten the batch block so the projection matmuls feed Bb*T rows to the
    # MXU (leading-dim merge only: no relayout).
    x = x_ref[...].reshape(N, C)

    # Fused QKV projection — one wide MXU matmul over all rows of the block.
    qkv = jnp.dot(x, wqkv_ref[...], preferred_element_type=jnp.float32)
    qkv = qkv + bqkv_ref[...]                                    # (N, 3C)

    # One combined, finite additive mask (causal + key padding), computed once
    # per block.  -1e30 (causal) + finfo.min (padding) stays finite; both
    # underflow to exactly 0 after the softmax for any realistic row max.
    row = jax.lax.broadcasted_iota(jnp.int32, (T, T), 0)
    col = jax.lax.broadcasted_iota(jnp.int32, (T, T), 1)
    causal_add = jnp.where(row >= col, jnp.float32(0.0), jnp.float32(-1e30))
    pad_add = (1.0 - am_ref[...].astype(jnp.float32)) * jnp.finfo(jnp.float32).min
    mask_add = causal_add[None, :, :] + pad_add                  # (Bb, T, T)

    # Output accumulator, initialized with the output-projection bias.
    y = jnp.broadcast_to(bout_ref[...].astype(jnp.float32), (N, C))

    # Static loop over heads.
    for h in range(H):
        # TODO(synk): for head_dim < 128 these lane-offset slices each cost a
        # small relayout; a single up-front head-major relayout of qkv would
        # remove them but the required 5-D transpose is not reliably lowerable
        # in Mosaic, and per-head weight matmuls would cost ~H x more MXU time.
        q_h = qkv[:, h * D:(h + 1) * D].reshape(Bb, T, D)
        k_h = qkv[:, C + h * D:C + (h + 1) * D].reshape(Bb, T, D)
        v_h = qkv[:, 2 * C + h * D:2 * C + (h + 1) * D].reshape(Bb, T, D)

        # Scores (scale already folded into Q), batched over the block.
        s = jnp.einsum('bqd,bkd->bqk', q_h, k_h,
                       preferred_element_type=jnp.float32)       # (Bb, T, T)
        s = s + mask_add

        # Softmax over keys.
        m = jnp.max(s, axis=-1, keepdims=True)
        p = jnp.exp(s - m)
        denom = jnp.sum(p, axis=-1, keepdims=True)
        p = p * pl.reciprocal(denom, approx=True)                # EUP slot
        # TODO(synk): attention dropout is identity (eval mode / rate 0).

        o_h = jnp.einsum('bqk,bkd->bqd', p, v_h,
                         preferred_element_type=jnp.float32)     # (Bb, T, D)

        # Accumulate the output projection per head: (N, D) @ (D, C).  The
        # head-major W_out slice is a cheap leading-axis index.
        y = y + jnp.dot(o_h.reshape(N, D), wout_ref[h],
                        preferred_element_type=jnp.float32)

    # TODO(synk): output dropout is identity (eval mode / rate 0).
    out_ref[...] = y.reshape(Bb, T, C).astype(out_ref.dtype)


def _choose_batch_block(batch, seq_len, row_target=128):
    """Pick a batch block: >= row_target rows per projection matmul for MXU
    occupancy, while keeping >= 2 grid steps when the batch allows it (v7x has
    two TensorCores sharing 'parallel' grid axes)."""
    divisors = [d for d in range(1, batch + 1) if batch % d == 0]
    block = batch
    for d in divisors:
        if d * seq_len >= row_target:
            block = d
            break
    if batch // block < 2:
        for d in reversed(divisors):
            if batch // d >= 2 and d * seq_len >= row_target:
                block = d
                break
    return block


def masked_multihead_self_attention(x, attention_mask, w_qkv, b_qkv, w_out,
                                    b_out, *, n_heads, batch_block=None):
    """x: (B, T, C) f32; attention_mask: (B, T) f32 of {0,1};
    w_qkv: (C, 3C); b_qkv: (1, 3C); w_out: (C, C); b_out: (1, C)."""
    B, T, C = x.shape
    D = C // n_heads
    if batch_block is None:
        batch_block = _choose_batch_block(B, T)
    assert B % batch_block == 0, "batch_block must divide the batch"

    # Fold 1/sqrt(D) into the Q projection (done outside the kernel, exact).
    scale = 1.0 / math.sqrt(D)
    col_scale = jnp.concatenate([jnp.full((C,), scale, w_qkv.dtype),
                                 jnp.ones((2 * C,), w_qkv.dtype)])
    w_qkv_s = w_qkv * col_scale[None, :]
    b_qkv_s = b_qkv * col_scale[None, :]

    # Head-major output projection: (H, D, C) so the kernel slices it on the
    # leading axis instead of scattering into lane-offset columns.
    w_out_h = w_out.reshape(n_heads, D, C)

    # (B, 1, T) so the mask block's minor dims always equal the full dims.
    am3 = attention_mask.reshape(B, 1, T).astype(x.dtype)

    # TODO(synk): for non-toy T/C, add a query-tile grid axis with flash-style
    # online softmax and bf16 weights so blocks fit v7x's 64 MiB VMEM.
    kernel = functools.partial(_mhsa_kernel, n_heads=n_heads)
    return pl.pallas_call(
        kernel,
        out_shape=jax.ShapeDtypeStruct((B, T, C), x.dtype),
        grid_spec=pltpu.PrefetchScalarGridSpec(
            num_scalar_prefetch=0,
            grid=(B // batch_block,),
            in_specs=[
                pl.BlockSpec((batch_block, T, C), lambda b: (b, 0, 0)),   # x
                pl.BlockSpec((batch_block, 1, T), lambda b: (b, 0, 0)),   # mask
                pl.BlockSpec((C, 3 * C), lambda b: (0, 0)),               # W_qkv
                pl.BlockSpec((1, 3 * C), lambda b: (0, 0)),               # b_qkv
                pl.BlockSpec((n_heads, D, C), lambda b: (0, 0, 0)),       # W_out
                pl.BlockSpec((1, C), lambda b: (0, 0)),                   # b_out
            ],
            out_specs=pl.BlockSpec((batch_block, T, C), lambda b: (b, 0, 0)),
        ),
        compiler_params=pltpu.CompilerParams(
            dimension_semantics=("parallel",)),
    )(x, am3, w_qkv_s, b_qkv_s, w_out_h, b_out)


def _reference(x, attention_mask, w_qkv, b_qkv, w_out, b_out, n_heads):
    """Plain-JAX reference mirroring the PyTorch forward."""
    B, T, C = x.shape
    D = C // n_heads
    qkv = x @ w_qkv + b_qkv[0]
    q, k, v = jnp.split(qkv, 3, axis=-1)

    def heads(t):
        return jnp.transpose(t.reshape(B, T, n_heads, D), (0, 2, 1, 3))

    q, k, v = heads(q), heads(k), heads(v)
    att = jnp.einsum("bhtd,bhsd->bhts", q, k) / math.sqrt(D)
    causal = jnp.tril(jnp.ones((T, T)))[None, None]
    att = jnp.where(causal == 0, float("-inf"), att)
    add_mask = (1.0 - attention_mask)[:, None, None, :] * jnp.finfo(jnp.float32).min
    att = att + add_mask
    att = jax.nn.softmax(att, axis=-1)
    wv = jnp.einsum("bhts,bhsd->bhtd", att, v)
    wv = jnp.transpose(wv, (0, 2, 1, 3)).reshape(B, T, C)
    return wv @ w_out + b_out[0]


if __name__ == "__main__":
    # Config: embedding_dim=32, n_heads=4, block_size>=T, use_bias=True,
    # dropout_rate=0.0, lora_rank=0.  B chosen so the batch-blocked grid has
    # 2 parallel steps of 128 rows each.
    B, T, C, H = 32, 8, 32, 4

    key = jax.random.PRNGKey(0)
    kx, k1, k2, k3, k4 = jax.random.split(key, 5)

    x = jax.random.normal(kx, (B, T, C), dtype=jnp.float32)
    attention_mask = jnp.ones((B, T), dtype=jnp.float32)

    # Deterministic parameter init (nn.Linear-style uniform bounds).
    bound = 1.0 / math.sqrt(C)
    w_qkv = jax.random.uniform(k1, (C, 3 * C), minval=-bound, maxval=bound,
                               dtype=jnp.float32)
    b_qkv = jax.random.uniform(k2, (1, 3 * C), minval=-bound, maxval=bound,
                               dtype=jnp.float32)
    w_out = jax.random.uniform(k3, (C, C), minval=-bound, maxval=bound,
                               dtype=jnp.float32)
    b_out = jax.random.uniform(k4, (1, C), minval=-bound, maxval=bound,
                               dtype=jnp.float32)

    y = masked_multihead_self_attention(
        x, attention_mask, w_qkv, b_qkv, w_out, b_out, n_heads=H)
    y = jax.block_until_ready(y)

    y_ref = _reference(x, attention_mask, w_qkv, b_qkv, w_out, b_out, H)
    assert jnp.allclose(y, y_ref, atol=1e-2, rtol=1e-2), "mismatch vs reference"

    print("KERNEL_OK")
</pallas_src>

<mosaic_0001>
module attributes {stable_mosaic.version = 11 : i64} {
  func.func @_mhsa_kernel(%arg0: i32, %arg1: memref<16x8x32xf32, #tpu.memory_space<vmem>>, %arg2: memref<16x1x8xf32, #tpu.memory_space<vmem>>, %arg3: memref<32x96xf32, #tpu.memory_space<vmem>>, %arg4: memref<1x96xf32, #tpu.memory_space<vmem>>, %arg5: memref<4x8x32xf32, #tpu.memory_space<vmem>>, %arg6: memref<1x32xf32, #tpu.memory_space<vmem>>, %arg7: memref<16x8x32xf32, #tpu.memory_space<vmem>>) attributes {dimension_semantics = [#tpu.dimension_semantics<parallel>], iteration_bounds = array<i64: 2>, scalar_prefetch = 0 : i64, scratch_operands = 0 : i64, tpu.core_type = #tpu.core_type<tc>, window_params = [{transform_indices = @transform_0, window_bounds = array<i64: 16, 8, 32>}, {transform_indices = @transform_1, window_bounds = array<i64: 16, 1, 8>}, {pipeline_mode = #tpu.pipeline_mode<synchronous>, transform_indices = @transform_2, window_bounds = array<i64: 32, 96>}, {pipeline_mode = #tpu.pipeline_mode<synchronous>, transform_indices = @transform_3, window_bounds = array<i64: 1, 96>}, {pipeline_mode = #tpu.pipeline_mode<synchronous>, transform_indices = @transform_4, window_bounds = array<i64: 4, 8, 32>}, {pipeline_mode = #tpu.pipeline_mode<synchronous>, transform_indices = @transform_5, window_bounds = array<i64: 1, 32>}, {transform_indices = @transform_6, window_bounds = array<i64: 16, 8, 32>}]} {
    %c0 = arith.constant 0 : index
    %c0_0 = arith.constant 0 : index
    %c0_1 = arith.constant 0 : index
    %0 = vector.load %arg1[%c0, %c0_0, %c0_1] : memref<16x8x32xf32, #tpu.memory_space<vmem>>, vector<16x8x32xf32>
    %1 = vector.shape_cast %0 : vector<16x8x32xf32> to vector<128x32xf32>
    %c0_2 = arith.constant 0 : index
    %c0_3 = arith.constant 0 : index
    %2 = vector.load %arg3[%c0_2, %c0_3] : memref<32x96xf32, #tpu.memory_space<vmem>>, vector<32x96xf32>
    %cst = arith.constant dense<0.000000e+00> : vector<128x96xf32>
    %3 = tpu.matmul %1, %2, %cst {dimension_numbers = #tpu.dot_dimension_numbers<[1], [0], [0], [1], [0, 0, 1, 1], [], []>} : vector<128x32xf32>, vector<32x96xf32>, vector<128x96xf32> -> vector<128x96xf32>
    %c0_4 = arith.constant 0 : index
    %c0_5 = arith.constant 0 : index
    %4 = vector.load %arg4[%c0_4, %c0_5] : memref<1x96xf32, #tpu.memory_space<vmem>>, vector<1x96xf32>
    %5 = vector.broadcast %4 : vector<1x96xf32> to vector<128x96xf32>
    %6 = arith.addf %3, %5 : vector<128x96xf32>
    %7 = tpu.iota {dimensions = array<i32: 0>} : vector<8x8xi32>
    %8 = tpu.iota {dimensions = array<i32: 1>} : vector<8x8xi32>
    %9 = arith.cmpi sge, %7, %8 : vector<8x8xi32>
    %cst_6 = arith.constant 0.000000e+00 : f32
    %cst_7 = arith.constant -1.000000e+30 : f32
    %10 = vector.broadcast %cst_6 : f32 to vector<8x8xf32>
    %11 = vector.broadcast %cst_7 : f32 to vector<8x8xf32>
    %12 = arith.select %9, %10, %11 : vector<8x8xi1>, vector<8x8xf32>
    %c0_8 = arith.constant 0 : index
    %c0_9 = arith.constant 0 : index
    %c0_10 = arith.constant 0 : index
    %13 = vector.load %arg2[%c0_8, %c0_9, %c0_10] : memref<16x1x8xf32, #tpu.memory_space<vmem>>, vector<16x1x8xf32>
    %cst_11 = arith.constant 1.000000e+00 : f32
    %14 = vector.broadcast %cst_11 : f32 to vector<16x1x8xf32>
    %15 = arith.subf %14, %13 : vector<16x1x8xf32>
    %cst_12 = arith.constant -3.40282347E+38 : f32
    %16 = vector.broadcast %cst_12 : f32 to vector<16x1x8xf32>
    %17 = arith.mulf %15, %16 : vector<16x1x8xf32>
    %18 = vector.shape_cast %12 : vector<8x8xf32> to vector<1x8x8xf32>
    %19 = vector.broadcast %18 : vector<1x8x8xf32> to vector<16x8x8xf32>
    %20 = vector.broadcast %17 : vector<16x1x8xf32> to vector<16x8x8xf32>
    %21 = arith.addf %19, %20 : vector<16x8x8xf32>
    %c0_13 = arith.constant 0 : index
    %c0_14 = arith.constant 0 : index
    %22 = vector.load %arg6[%c0_13, %c0_14] : memref<1x32xf32, #tpu.memory_space<vmem>>, vector<1x32xf32>
    %23 = vector.shape_cast %22 : vector<1x32xf32> to vector<1x32xf32>
    %24 = vector.broadcast %23 : vector<1x32xf32> to vector<128x32xf32>
    %25 = vector.extract_strided_slice %6 {offsets = [0, 0], sizes = [128, 8], strides = [1, 1]} : vector<128x96xf32> to vector<128x8xf32>
    %26 = vector.shape_cast %25 : vector<128x8xf32> to vector<16x8x8xf32>
    %27 = vector.extract_strided_slice %6 {offsets = [0, 32], sizes = [128, 8], strides = [1, 1]} : vector<128x96xf32> to vector<128x8xf32>
    %28 = vector.shape_cast %27 : vector<128x8xf32> to vector<16x8x8xf32>
    %29 = vector.extract_strided_slice %6 {offsets = [0, 64], sizes = [128, 8], strides = [1, 1]} : vector<128x96xf32> to vector<128x8xf32>
    %30 = vector.shape_cast %29 : vector<128x8xf32> to vector<16x8x8xf32>
    "tpu.trace_start"() <{level = 10 : i32, message = "bqd,bkd->bqk"}> : () -> ()
    %cst_15 = arith.constant dense<0.000000e+00> : vector<16x8x8xf32>
    %31 = tpu.matmul %26, %28, %cst_15 {dimension_numbers = #tpu.dot_dimension_numbers<[2], [2], [1], [1], [0, 0, 0, 1, 1, 1], [0], [0]>} : vector<16x8x8xf32>, vector<16x8x8xf32>, vector<16x8x8xf32> -> vector<16x8x8xf32>
    "tpu.trace_stop"() : () -> ()
    %32 = arith.addf %31, %21 : vector<16x8x8xf32>
    %cst_16 = arith.constant dense<0xFF800000> : vector<16x8xf32>
    %33 = vector.multi_reduction <maximumf>, %32, %cst_16 [2] : vector<16x8x8xf32> to vector<16x8xf32>
    %34 = vector.shape_cast %33 : vector<16x8xf32> to vector<16x8x1xf32>
    %35 = vector.broadcast %34 : vector<16x8x1xf32> to vector<16x8x8xf32>
    %36 = arith.subf %32, %35 : vector<16x8x8xf32>
    %37 = math.exp %36 : vector<16x8x8xf32>
    %cst_17 = arith.constant dense<0.000000e+00> : vector<16x8xf32>
    %38 = vector.multi_reduction <add>, %37, %cst_17 [2] : vector<16x8x8xf32> to vector<16x8xf32>
    %39 = vector.shape_cast %38 : vector<16x8xf32> to vector<16x8x1xf32>
    %40 = tpu.reciprocal %39 {approx = true} : vector<16x8x1xf32> -> vector<16x8x1xf32>
    %41 = vector.broadcast %40 : vector<16x8x1xf32> to vector<16x8x8xf32>
    %42 = arith.mulf %37, %41 : vector<16x8x8xf32>
    "tpu.trace_start"() <{level = 10 : i32, message = "bqk,bkd->bqd"}> : () -> ()
    %cst_18 = arith.constant dense<0.000000e+00> : vector<16x8x8xf32>
    %43 = tpu.matmul %42, %30, %cst_18 {dimension_numbers = #tpu.dot_dimension_numbers<[2], [1], [1], [2], [0, 0, 0, 1, 1, 2], [0], [0]>} : vector<16x8x8xf32>, vector<16x8x8xf32>, vector<16x8x8xf32> -> vector<16x8x8xf32>
    "tpu.trace_stop"() : () -> ()
    %44 = vector.shape_cast %43 : vector<16x8x8xf32> to vector<128x8xf32>
    %c0_19 = arith.constant 0 : index
    %c0_20 = arith.constant 0 : index
    %c0_21 = arith.constant 0 : index
    %45 = vector.load %arg5[%c0_19, %c0_20, %c0_21] : memref<4x8x32xf32, #tpu.memory_space<vmem>>, vector<1x8x32xf32>
    %46 = vector.shape_cast %45 : vector<1x8x32xf32> to vector<8x32xf32>
    %cst_22 = arith.constant dense<0.000000e+00> : vector<128x32xf32>
    %47 = tpu.matmul %44, %46, %cst_22 {dimension_numbers = #tpu.dot_dimension_numbers<[1], [0], [0], [1], [0, 0, 1, 1], [], []>} : vector<128x8xf32>, vector<8x32xf32>, vector<128x32xf32> -> vector<128x32xf32>
    %48 = arith.addf %24, %47 : vector<128x32xf32>
    %49 = vector.extract_strided_slice %6 {offsets = [0, 8], sizes = [128, 8], strides = [1, 1]} : vector<128x96xf32> to vector<128x8xf32>
    %50 = vector.shape_cast %49 : vector<128x8xf32> to vector<16x8x8xf32>
    %51 = vector.extract_strided_slice %6 {offsets = [0, 40], sizes = [128, 8], strides = [1, 1]} : vector<128x96xf32> to vector<128x8xf32>
    %52 = vector.shape_cast %51 : vector<128x8xf32> to vector<16x8x8xf32>
    %53 = vector.extract_strided_slice %6 {offsets = [0, 72], sizes = [128, 8], strides = [1, 1]} : vector<128x96xf32> to vector<128x8xf32>
    %54 = vector.shape_cast %53 : vector<128x8xf32> to vector<16x8x8xf32>
    "tpu.trace_start"() <{level = 10 : i32, message = "bqd,bkd->bqk"}> : () -> ()
    %cst_23 = arith.constant dense<0.000000e+00> : vector<16x8x8xf32>
    %55 = tpu.matmul %50, %52, %cst_23 {dimension_numbers = #tpu.dot_dimension_numbers<[2], [2], [1], [1], [0, 0, 0, 1, 1, 1], [0], [0]>} : vector<16x8x8xf32>, vector<16x8x8xf32>, vector<16x8x8xf32> -> vector<16x8x8xf32>
    "tpu.trace_stop"() : () -> ()
    %56 = arith.addf %55, %21 : vector<16x8x8xf32>
    %cst_24 = arith.constant dense<0xFF800000> : vector<16x8xf32>
    %57 = vector.multi_reduction <maximumf>, %56, %cst_24 [2] : vector<16x8x8xf32> to vector<16x8xf32>
    %58 = vector.shape_cast %57 : vector<16x8xf32> to vector<16x8x1xf32>
    %59 = vector.broadcast %58 : vector<16x8x1xf32> to vector<16x8x8xf32>
    %60 = arith.subf %56, %59 : vector<16x8x8xf32>
    %61 = math.exp %60 : vector<16x8x8xf32>
    %cst_25 = arith.constant dense<0.000000e+00> : vector<16x8xf32>
    %62 = vector.multi_reduction <add>, %61, %cst_25 [2] : vector<16x8x8xf32> to vector<16x8xf32>
    %63 = vector.shape_cast %62 : vector<16x8xf32> to vector<16x8x1xf32>
    %64 = tpu.reciprocal %63 {approx = true} : vector<16x8x1xf32> -> vector<16x8x1xf32>
    %65 = vector.broadcast %64 : vector<16x8x1xf32> to vector<16x8x8xf32>
    %66 = arith.mulf %61, %65 : vector<16x8x8xf32>
    "tpu.trace_start"() <{level = 10 : i32, message = "bqk,bkd->bqd"}> : () -> ()
    %cst_26 = arith.constant dense<0.000000e+00> : vector<16x8x8xf32>
    %67 = tpu.matmul %66, %54, %cst_26 {dimension_numbers = #tpu.dot_dimension_numbers<[2], [1], [1], [2], [0, 0, 0, 1, 1, 2], [0], [0]>} : vector<16x8x8xf32>, vector<16x8x8xf32>, vector<16x8x8xf32> -> vector<16x8x8xf32>
    "tpu.trace_stop"() : () -> ()
    %68 = vector.shape_cast %67 : vector<16x8x8xf32> to vector<128x8xf32>
    %c1 = arith.constant 1 : index
    %c0_27 = arith.constant 0 : index
    %c0_28 = arith.constant 0 : index
    %69 = vector.load %arg5[%c1, %c0_27, %c0_28] : memref<4x8x32xf32, #tpu.memory_space<vmem>>, vector<1x8x32xf32>
    %70 = vector.shape_cast %69 : vector<1x8x32xf32> to vector<8x32xf32>
    %cst_29 = arith.constant dense<0.000000e+00> : vector<128x32xf32>
    %71 = tpu.matmul %68, %70, %cst_29 {dimension_numbers = #tpu.dot_dimension_numbers<[1], [0], [0], [1], [0, 0, 1, 1], [], []>} : vector<128x8xf32>, vector<8x32xf32>, vector<128x32xf32> -> vector<128x32xf32>
    %72 = arith.addf %48, %71 : vector<128x32xf32>
    %73 = vector.extract_strided_slice %6 {offsets = [0, 16], sizes = [128, 8], strides = [1, 1]} : vector<128x96xf32> to vector<128x8xf32>
    %74 = vector.shape_cast %73 : vector<128x8xf32> to vector<16x8x8xf32>
    %75 = vector.extract_strided_slice %6 {offsets = [0, 48], sizes = [128, 8], strides = [1, 1]} : vector<128x96xf32> to vector<128x8xf32>
    %76 = vector.shape_cast %75 : vector<128x8xf32> to vector<16x8x8xf32>
    %77 = vector.extract_strided_slice %6 {offsets = [0, 80], sizes = [128, 8], strides = [1, 1]} : vector<128x96xf32> to vector<128x8xf32>
    %78 = vector.shape_cast %77 : vector<128x8xf32> to vector<16x8x8xf32>
    "tpu.trace_start"() <{level = 10 : i32, message = "bqd,bkd->bqk"}> : () -> ()
    %cst_30 = arith.constant dense<0.000000e+00> : vector<16x8x8xf32>
    %79 = tpu.matmul %74, %76, %cst_30 {dimension_numbers = #tpu.dot_dimension_numbers<[2], [2], [1], [1], [0, 0, 0, 1, 1, 1], [0], [0]>} : vector<16x8x8xf32>, vector<16x8x8xf32>, vector<16x8x8xf32> -> vector<16x8x8xf32>
    "tpu.trace_stop"() : () -> ()
    %80 = arith.addf %79, %21 : vector<16x8x8xf32>
    %cst_31 = arith.constant dense<0xFF800000> : vector<16x8xf32>
    %81 = vector.multi_reduction <maximumf>, %80, %cst_31 [2] : vector<16x8x8xf32> to vector<16x8xf32>
    %82 = vector.shape_cast %81 : vector<16x8xf32> to vector<16x8x1xf32>
    %83 = vector.broadcast %82 : vector<16x8x1xf32> to vector<16x8x8xf32>
    %84 = arith.subf %80, %83 : vector<16x8x8xf32>
    %85 = math.exp %84 : vector<16x8x8xf32>
    %cst_32 = arith.constant dense<0.000000e+00> : vector<16x8xf32>
    %86 = vector.multi_reduction <add>, %85, %cst_32 [2] : vector<16x8x8xf32> to vector<16x8xf32>
    %87 = vector.shape_cast %86 : vector<16x8xf32> to vector<16x8x1xf32>
    %88 = tpu.reciprocal %87 {approx = true} : vector<16x8x1xf32> -> vector<16x8x1xf32>
    %89 = vector.broadcast %88 : vector<16x8x1xf32> to vector<16x8x8xf32>
    %90 = arith.mulf %85, %89 : vector<16x8x8xf32>
    "tpu.trace_start"() <{level = 10 : i32, message = "bqk,bkd->bqd"}> : () -> ()
    %cst_33 = arith.constant dense<0.000000e+00> : vector<16x8x8xf32>
    %91 = tpu.matmul %90, %78, %cst_33 {dimension_numbers = #tpu.dot_dimension_numbers<[2], [1], [1], [2], [0, 0, 0, 1, 1, 2], [0], [0]>} : vector<16x8x8xf32>, vector<16x8x8xf32>, vector<16x8x8xf32> -> vector<16x8x8xf32>
    "tpu.trace_stop"() : () -> ()
    %92 = vector.shape_cast %91 : vector<16x8x8xf32> to vector<128x8xf32>
    %c2 = arith.constant 2 : index
    %c0_34 = arith.constant 0 : index
    %c0_35 = arith.constant 0 : index
    %93 = vector.load %arg5[%c2, %c0_34, %c0_35] : memref<4x8x32xf32, #tpu.memory_space<vmem>>, vector<1x8x32xf32>
    %94 = vector.shape_cast %93 : vector<1x8x32xf32> to vector<8x32xf32>
    %cst_36 = arith.constant dense<0.000000e+00> : vector<128x32xf32>
    %95 = tpu.matmul %92, %94, %cst_36 {dimension_numbers = #tpu.dot_dimension_numbers<[1], [0], [0], [1], [0, 0, 1, 1], [], []>} : vector<128x8xf32>, vector<8x32xf32>, vector<128x32xf32> -> vector<128x32xf32>
    %96 = arith.addf %72, %95 : vector<128x32xf32>
    %97 = vector.extract_strided_slice %6 {offsets = [0, 24], sizes = [128, 8], strides = [1, 1]} : vector<128x96xf32> to vector<128x8xf32>
    %98 = vector.shape_cast %97 : vector<128x8xf32> to vector<16x8x8xf32>
    %99 = vector.extract_strided_slice %6 {offsets = [0, 56], sizes = [128, 8], strides = [1, 1]} : vector<128x96xf32> to vector<128x8xf32>
    %100 = vector.shape_cast %99 : vector<128x8xf32> to vector<16x8x8xf32>
    %101 = vector.extract_strided_slice %6 {offsets = [0, 88], sizes = [128, 8], strides = [1, 1]} : vector<128x96xf32> to vector<128x8xf32>
    %102 = vector.shape_cast %101 : vector<128x8xf32> to vector<16x8x8xf32>
    "tpu.trace_start"() <{level = 10 : i32, message = "bqd,bkd->bqk"}> : () -> ()
    %cst_37 = arith.constant dense<0.000000e+00> : vector<16x8x8xf32>
    %103 = tpu.matmul %98, %100, %cst_37 {dimension_numbers = #tpu.dot_dimension_numbers<[2], [2], [1], [1], [0, 0, 0, 1, 1, 1], [0], [0]>} : vector<16x8x8xf32>, vector<16x8x8xf32>, vector<16x8x8xf32> -> vector<16x8x8xf32>
    "tpu.trace_stop"() : () -> ()
    %104 = arith.addf %103, %21 : vector<16x8x8xf32>
    %cst_38 = arith.constant dense<0xFF800000> : vector<16x8xf32>
    %105 = vector.multi_reduction <maximumf>, %104, %cst_38 [2] : vector<16x8x8xf32> to vector<16x8xf32>
    %106 = vector.shape_cast %105 : vector<16x8xf32> to vector<16x8x1xf32>
    %107 = vector.broadcast %106 : vector<16x8x1xf32> to vector<16x8x8xf32>
    %108 = arith.subf %104, %107 : vector<16x8x8xf32>
    %109 = math.exp %108 : vector<16x8x8xf32>
    %cst_39 = arith.constant dense<0.000000e+00> : vector<16x8xf32>
    %110 = vector.multi_reduction <add>, %109, %cst_39 [2] : vector<16x8x8xf32> to vector<16x8xf32>
    %111 = vector.shape_cast %110 : vector<16x8xf32> to vector<16x8x1xf32>
    %112 = tpu.reciprocal %111 {approx = true} : vector<16x8x1xf32> -> vector<16x8x1xf32>
    %113 = vector.broadcast %112 : vector<16x8x1xf32> to vector<16x8x8xf32>
    %114 = arith.mulf %109, %113 : vector<16x8x8xf32>
    "tpu.trace_start"() <{level = 10 : i32, message = "bqk,bkd->bqd"}> : () -> ()
    %cst_40 = arith.constant dense<0.000000e+00> : vector<16x8x8xf32>
    %115 = tpu.matmul %114, %102, %cst_40 {dimension_numbers = #tpu.dot_dimension_numbers<[2], [1], [1], [2], [0, 0, 0, 1, 1, 2], [0], [0]>} : vector<16x8x8xf32>, vector<16x8x8xf32>, vector<16x8x8xf32> -> vector<16x8x8xf32>
    "tpu.trace_stop"() : () -> ()
    %116 = vector.shape_cast %115 : vector<16x8x8xf32> to vector<128x8xf32>
    %c3 = arith.constant 3 : index
    %c0_41 = arith.constant 0 : index
    %c0_42 = arith.constant 0 : index
    %117 = vector.load %arg5[%c3, %c0_41, %c0_42] : memref<4x8x32xf32, #tpu.memory_space<vmem>>, vector<1x8x32xf32>
    %118 = vector.shape_cast %117 : vector<1x8x32xf32> to vector<8x32xf32>
    %cst_43 = arith.constant dense<0.000000e+00> : vector<128x32xf32>
    %119 = tpu.matmul %116, %118, %cst_43 {dimension_numbers = #tpu.dot_dimension_numbers<[1], [0], [0], [1], [0, 0, 1, 1], [], []>} : vector<128x8xf32>, vector<8x32xf32>, vector<128x32xf32> -> vector<128x32xf32>
    %120 = arith.addf %96, %119 : vector<128x32xf32>
    %121 = vector.shape_cast %120 : vector<128x32xf32> to vector<16x8x32xf32>
    %c0_44 = arith.constant 0 : index
    %c0_45 = arith.constant 0 : index
    %c0_46 = arith.constant 0 : index
    %122 = vector.load %arg7[%c0_44, %c0_45, %c0_46] : memref<16x8x32xf32, #tpu.memory_space<vmem>>, vector<16x8x32xf32>
    tpu.vector_store %arg7[%c0_44, %c0_45, %c0_46], %121 {strides = array<i32>} : memref<16x8x32xf32, #tpu.memory_space<vmem>>, vector<16x8x32xf32>,
    return
  }
  func.func @transform_0(%arg0: i32) -> (i32, i32, i32) {
    %c0_i32 = arith.constant 0 : i32
    %c0_i32_0 = arith.constant 0 : i32
    %c0_i32_1 = arith.constant 0 : i32
    return %arg0, %c0_i32, %c0_i32_0 : i32, i32, i32
  }
  func.func @transform_1(%arg0: i32) -> (i32, i32, i32) {
    %c0_i32 = arith.constant 0 : i32
    %c0_i32_0 = arith.constant 0 : i32
    %c0_i32_1 = arith.constant 0 : i32
    return %arg0, %c0_i32, %c0_i32_0 : i32, i32, i32
  }
  func.func @transform_2(%arg0: i32) -> (i32, i32) {
    %c0_i32 = arith.constant 0 : i32
    %c0_i32_0 = arith.constant 0 : i32
    %c0_i32_1 = arith.constant 0 : i32
    return %c0_i32, %c0_i32_0 : i32, i32
  }
  func.func @transform_3(%arg0: i32) -> (i32, i32) {
    %c0_i32 = arith.constant 0 : i32
    %c0_i32_0 = arith.constant 0 : i32
    %c0_i32_1 = arith.constant 0 : i32
    return %c0_i32, %c0_i32_0 : i32, i32
  }
  func.func @transform_4(%arg0: i32) -> (i32, i32, i32) {
    %c0_i32 = arith.constant 0 : i32
    %c0_i32_0 = arith.constant 0 : i32
    %c0_i32_1 = arith.constant 0 : i32
    %c0_i32_2 = arith.constant 0 : i32
    return %c0_i32, %c0_i32_0, %c0_i32_1 : i32, i32, i32
  }
  func.func @transform_5(%arg0: i32) -> (i32, i32) {
    %c0_i32 = arith.constant 0 : i32
    %c0_i32_0 = arith.constant 0 : i32
    %c0_i32_1 = arith.constant 0 : i32
    return %c0_i32, %c0_i32_0 : i32, i32
  }
  func.func @transform_6(%arg0: i32) -> (i32, i32, i32) {
    %c0_i32 = arith.constant 0 : i32
    %c0_i32_0 = arith.constant 0 : i32
    %c0_i32_1 = arith.constant 0 : i32
    return %arg0, %c0_i32, %c0_i32_0 : i32, i32, i32
  }
}

</mosaic_0001>

<bundles_post_ra>
// kernel: tpu_custom_call.1
= control target key start
LH: loop header
LB: loop body
LE: loop exit
PB: predicated region body
PF: predicated region fallthrough
CT: control target
= control target key end

     0   :  { %11 = vsyncpa [#allocation3], 0  ;;  %s8277_s0 = inlined_call_operand.hbm [shape: f32[32,8,32], index: 0, kind: input, shape index: {}]   ;;  %s8278_s1 = inlined_call_operand.vmem [shape: f32[32,1,8], index: 1, kind: input, shape index: {}]   ;;  %s8279_s2 = inlined_call_operand.vmem [shape: f32[32,96], index: 2, kind: input, shape index: {}]   ;;  %s8280_s3 = inlined_call_operand.vmem [shape: f32[1,96], index: 3, kind: input, shape index: {}]   ;;  %s8281_s4 = inlined_call_operand.hbm [shape: f32[4,8,32], index: 4, kind: input, shape index: {}]   ;;  %s8282_s5 = inlined_call_operand.vmem [shape: f32[1,32], index: 5, kind: input, shape index: {}]   ;;  %s8283_s6 = inlined_call_operand.hbm [shape: f32[32,8,32], index: 6, kind: output, shape index: {}]  }
   0x1   :  { %13 = vsyncpa [#allocation3 + $0x1], 0 }
   0x2   :  { %14 = vsyncpa [#allocation6], 0 }
   0x3   :  { %15 = vsyncpa [#allocation4], 0 }
   0x4   :  { %17 = vsyncpa [#allocation4 + $0x1], 0  ;;  %s6320_s21 = smov 0   ;;  %s6322_s22 = smov 0  }
   0x5   :  { %s6324_s23 = smov 0   ;;  %s6326_s24 = smov 0  }
   0x6 LB: > { %s6341_s25 = sadd.s32 4294967295, %s6266_s24   ;;  %s5362_s26 = sadd.s32 4294967294, %s6266_s24   ;;  %s6266_s24 = sphi %s6326_s24, %s8388_s24   ;;  %s6262_s23 = sphi %s6324_s23, %s8387_s23   ;;  %s6258_s22 = sphi %s6322_s22, %s8386_s22   ;;  %s6254_s21 = sphi %s6320_s21, %s8385_s21  }
   0x7   : > { %p43_p0 = scmp.ne.s32.totalorder %s6258_s22, %s6254_s21  ;;  %p44_p1 = scmp.eq.s32.totalorder %s6341_s25, 0 }
   0x8   : > { %p177_p2 = scmp.eq.s32.totalorder %s6341_s25, 1  ;;  %p183_p3 = scmp.eq.s32.totalorder %s5362_s26, 1 }
   0x9   : > { %p6350_p4 = por %p44_p1, %p43_p0  ;;  %p5363_p5 = scmp.ge.s32.totalorder %s6266_s24, 1 }
   0xa   : > { %p6355_p6 = por %p183_p3, %p43_p0  ;;  %p190_p7 = scmp.lt.s32.totalorder %s6266_s24, 3 }
   0xb   : > { %s207_s7 = sshll.u32 %s8281_s4, 4  ;;  %s6268_s9 = smov [#allocation5]   ;;  %s208_s7 = int_to_ptr.hbm [resolvable:$true] %s207_s7 }
   0xc   : > { %p6363_p8 = pnand %p5363_p5, %p190_p7  ;;  %s209_s10 = sshll.u32 %s6268_s9, 4  ;;  %s210_s10 = int_to_ptr.vmem [resolvable:$true] %s209_s10 }
   0xd   : > { %s6373_s11 = sadd.s32 1, %s6266_s24   ;;  %s8284_s12 = smov 128  }
   0xe   : > { %p5663_p9 = pneg %p6363_p8  ;;  %s8285_s13 = smov 8  }
   0xf   : > { %s27_s14 = ssub.s32 %s6266_s24, %s6373_s11  ;;  %s30_s15 = sadd.s32 1, %s6262_s23 }
  0x10   : > { %p5664_p10 = pnand %p5663_p9, %p44_p1  ;;  %p28_p12 = scmp.eq.s32.totalorder %s27_s14, 0 }
  0x11   : > { %p37_p13 = scmp.ne.s32.totalorder %s6262_s23, %s6258_s22  ;;  %p38_p0 = scmp.eq.s32.totalorder %s6266_s24, 0 }
  0x12   : > { %5666 = dma.hbm_to_vmem [thread:$0]  (!%p5664_p10), %s208_s7, 512, %s210_s10, [#allocation6], %s8284_s12, %s8284_s12, %s8285_s13  }
  0x13   : > { %s6385_s16 = scalar_select %p28_p12, %s6262_s23, %s30_s15  }
  0x14   : > { %p6389_p3 = por %p177_p2, %p37_p13  ;;  %p5676_p5 = scmp.lt.s32.totalorder %s6266_s24, 2 }
  0x15   : > { %s226_s18 = sand.u32 1, %s6262_s23   ;;  %s5651_s19 = sshll.u32 %s6266_s24, 7 }
  0x16   : > { %p39_p7 = por %p38_p0, %p37_p13  ;;  %s5366_s20 = sshll.u32 %s226_s18, 7 }
  0x17   : > { %s235_s30 = scalar_lea.hbm %s8277_s0, %s5651_s19  ;;  %s230_s9 = scalar_lea.vmem [#allocation2], %s5366_s20 }
  0x18   : > { %s236_s7 = sshll.u32 %s235_s30, 4  ;;  %s238_s10 = sshll.u32 %s230_s9, 4  ;;  %s237_s7 = int_to_ptr.hbm [resolvable:$true] %s236_s7  ;;  %s239_s10 = int_to_ptr.vmem [resolvable:$true] %s238_s10 }
  0x19   : > { %p6399_p9 = pnand %p5676_p5, %p39_p7  ;;  %s227_s15 = scalar_lea.sflag [#allocation3], %s226_s18 }
  0x1a   : > { %s6166_s12 = sshra.s32 %s237_s7, 4  ;;  %s6173_s20 = scalar_lea.hbm %s8277_s0, 256  ;;  %s6167_s12 = int_to_ptr.hbm [resolvable:$true] %s6166_s12 }
  0x1b   : > { %s6168_s13 = scalar_lea.hbm %s6167_s12, 128  ;;  %p6170_p10 = pneg %p6399_p9 }
  0x1c   : > { %p6169_p2 = scmp.ne.s32.totalorder %s6167_s12, %s6168_s13  ;;  %p6174_p0 = scmp.lt.s32.totalorder %s6167_s12, %s8277_s0 }
  0x1d   : > { %p6175_p5 = scmp.lt.s32.totalorder %s6173_s20, %s6168_s13 }
  0x1e   : > { %p6171_p12 = pnand %p6170_p10, %p6169_p2 }
  0x1f   : > { %p6176_p7 = por %p6175_p5, %p6174_p0 }
  0x20   : > { %p6172_p13 = pneg %p6171_p12 }
  0x22   : > { %p6177_p11 = pnand %p6176_p7, %p6172_p13 }
  0x24   : > { %6180 = shalt.err (!%p6177_p11)
}
  0x25   : > { %s8314_s18 = smov 8   ;;  %s8315_s9 = smov 128  }
  0x26   : > { %5670 = dma.hbm_to_vmem [thread:$0]  (!%p6399_p9), %s237_s7, 2048, %s239_s10, %s227_s15, %s8315_s9, %s8315_s9, %s8314_s18  }
  0x27   : > { %258 = sbr.rel (%p6363_p8) target bundleno = 3079 (0xc07), region = 44 }
  0x2c   : > { %s6419_s19 = sand.u32 1, %s6258_s22  }
  0x2d   : > { %s5370_s12 = sshll.u32 %s6419_s19, 7  ;;  %s261_s13 = scalar_lea.sflag [#allocation3], %s6419_s19 }
  0x2e   : > { %s6425_s26 = scalar_lea.vmem [#allocation2], %s5370_s12 }
  0x2f   : > { %6241 = dma.done.wait (%p6350_p4), %s261_s13, 2048  }
  0x30   : > { %6243 = vsyncadd (%p6350_p4), %s261_s13, 4294965248 }
  0x31   : > { %6245 = dma.done.wait (%p44_p1), [#allocation6], 512  }
  0x32   : > { %6247 = vsyncadd (%p44_p1), [#allocation6], 4294966784  ;;  %v329_v0 = vld [vmem:[%s8279_s2 + $0x18] sm:$0xff]  ;;  %v328_v1 = vld [vmem:[%s8279_s2 + $0x10] sm:$0xff]  ;;  %vm334_vm0 = vcmask 261120   ;;  %s6271_s9 = smov 96  }
  0x33   : > { %395 = vmatpush.msra.mxu0 %v329_v0  ;;  %v327_v2 = vld [vmem:[%s8279_s2 + $0x8] sm:$0xff]  ;;  %v326_v3 = vld [vmem:[%s8279_s2] sm:$0xff]  ;;  %v312_v6 = vld [vmem:[%s6425_s26 + $0x10] sm:$0xff]  ;;  %s6272_s13 = smov 64   ;;  %vm573_vm1 = vcmask 64512   ;;  %s6274_s8 = smov 120  }
  0x34   : > { %v310_v4 = vld [vmem:[%s6425_s26] sm:$0xff]  ;;  %v311_v5 = vld [vmem:[%s6425_s26 + $0x8] sm:$0xff]  ;;  %v313_v7 = vld [vmem:[%s6425_s26 + $0x18] sm:$0xff]  ;;  %s5373_s7 = sshll.u32 %s6341_s25, 4  ;;  %s6276_s15 = smov 56  }
  0x35   : > { %396 = vmatpush.msra.mxu0 %v328_v1  ;;  %v314_v8 = vld [vmem:[%s6425_s26 + $0x20] sm:$0xff]  ;;  %v315_v9 = vld [vmem:[%s6425_s26 + $0x28] sm:$0xff]  ;;  %v316_v10 = vld [vmem:[%s6425_s26 + $0x30] sm:$0xff]  ;;  %p305_p1 = scmp.lt.s32.totalorder %s5373_s7, 31  ;;  %s6277_s20 = smov 112  }
  0x36   : > { %v317_v11 = vld [vmem:[%s6425_s26 + $0x38] sm:$0xff]  ;;  %v318_v12 = vld [vmem:[%s6425_s26 + $0x40] sm:$0xff]  ;;  %v319_v13 = vld [vmem:[%s6425_s26 + $0x48] sm:$0xff]  ;;  %s6278_s29 = smov 80   ;;  %s6279_s30 = smov 48  }
  0x37   : > { %397 = vmatpush.msra.mxu0 %v327_v2  ;;  %v320_v14 = vld [vmem:[%s6425_s26 + $0x50] sm:$0xff]  ;;  %v321_v15 = vld [vmem:[%s6425_s26 + $0x58] sm:$0xff]  ;;  %v322_v16 = vld [vmem:[%s6425_s26 + $0x60] sm:$0xff]  ;;  %s8390_s7 = smov (!%p305_p1, %s5373_s7), 31  ;;  %s6280_s18 = smov 104  }
  0x38   : > { %v323_v17 = vld [vmem:[%s6425_s26 + $0x68] sm:$0xff]  ;;  %v324_v18 = vld [vmem:[%s6425_s26 + $0x70] sm:$0xff]  ;;  %v325_v19 = vld [vmem:[%s6425_s26 + $0x78] sm:$0xff]  ;;  %s6273_s26 = smov 88   ;;  %s6623_s27 = scalar_lea.vmem %s8278_s1, %s8390_s7 }
  0x39   : > { %398 = vmatpush.msra.mxu0 %v326_v3  ;;  %v5878_v20 = vld [vmem:[%s8280_s3] ss:$0 sm:$0xff]  ;;  %s8165_s7 = scalar_lea.vmem [#allocation7], %s5370_s12  ;;  %s5652_s12 = sshll.u32 %s6341_s25, 7 }
  0x3a   : > { %5374 = vmatmul.msk.f32.vlgmr.msra.gmra.mxu0 %vm334_vm0, %v310_v4  ;;  %s5255_s25 = scalar_lea.sflag [#allocation4], %s6419_s19 }
  0x42   : > { %5375 = vmatmul.msk.f32.gmra.mxu0 %vm334_vm0, %v311_v5 }
  0x4a   : > { %5376 = vmatmul.msk.f32.gmra.mxu0 %vm334_vm0, %v312_v6 }
  0x52   : > { %5377 = vmatmul.msk.f32.gmra.mxu0 %vm334_vm0, %v313_v7 }
  0x5a   : > { %5378 = vmatmul.msk.f32.gmra.mxu0 %vm334_vm0, %v314_v8 }
  0x62   : > { %5379 = vmatmul.msk.f32.gmra.mxu0 %vm334_vm0, %v315_v9 }
  0x6a   : > { %5380 = vmatmul.msk.f32.gmra.mxu0 %vm334_vm0, %v316_v10 }
  0x72   : > { %5381 = vmatmul.msk.f32.gmra.mxu0 %vm334_vm0, %v317_v11  ;;  %v454_v11 = vld [vmem:[%s6623_s27] sm:$0x1] }
  0x7a   : > { %5382 = vmatmul.msk.f32.gmra.mxu0 %vm334_vm0, %v318_v12 }
  0x82   : > { %5383 = vmatmul.msk.f32.gmra.mxu0 %vm334_vm0, %v319_v13  ;;  %v448_v13 = vlaneseq }
  0x8a   : > { %5384 = vmatmul.msk.f32.gmra.mxu0 %vm334_vm0, %v320_v14 }
  0x92   : > { %5385 = vmatmul.msk.f32.gmra.mxu0 %vm334_vm0, %v321_v15  ;;  %v470_v15 = vsub.f32 1.0, %v454_v11 }
  0x9a   : > { %5386 = vmatmul.msk.f32.gmra.mxu0 %vm334_vm0, %v322_v16  ;;  %v449_v16 = vshrl.u32 %v448_v13, 7 }
  0xa2   : > { %5387 = vmatmul.msk.f32.gmra.mxu0 %vm334_vm0, %v323_v17  ;;  %v451_v17 = vand.u32 127, %v448_v13 }
  0xa4   : > { %vm452_vm2 = vcmp.ge.s32.totalorder %v449_v16, %v451_v17 }
  0xaa   : > { %5388 = vmatmul.msk.f32.gmra.mxu0 %vm334_vm0, %v324_v18  ;;  %v486_v18 = vmul.f32 -3.4028235e+38, %v470_v15 }
  0xb2   : > { %5389 = vmatmul.msk.f32.gmra.mxu0 %vm334_vm0, %v325_v19  ;;  %v455_v19 = vld [vmem:[%s6623_s27 + $0x1] sm:$0x1] }
  0xb7   : > { %v400_v21 = vpop.f32.mrf.mxu0 }
  0xb8   : > { %v6482_v22 = vadd.f32 %v5878_v20, %v400_v21 }
  0xba   : > { %8316 = vst [vmem:[#allocation11_spill] sm:$0xff] %v6482_v22  ;;  %571 = vrot.lane.b32.xlu0 %v6482_v22, %s6271_s9 }
  0xbf   : > { %v403_v23 = vpop.f32.mrf.mxu0 }
  0xc0   : > { %v6486_v24 = vadd.f32 %v5878_v20, %v403_v23 }
  0xc2   : > { %8317 = vst [vmem:[#allocation12_spill] sm:$0xff] %v6486_v24  ;;  %599 = vrot.lane.b32.xlu0 %v6486_v24, %s6271_s9  ;;  %v6555_v55 = vpack.i.bf16 %v6486_v24, %v6482_v22 }
  0xc7   : > { %v406_v25 = vpop.f32.mrf.mxu0 }
  0xc8   : > { %v6490_v26 = vadd.f32 %v5878_v20, %v406_v25  ;;  %v518_v25 = vperm.slane %v486_v18, 0 }
  0xca   : > { %626 = vrot.lane.b32.xlu1 %v6490_v26, %s6271_s9 }
  0xcf   : > { %v409_v27 = vpop.f32.mrf.mxu0 }
  0xd0   : > { %v6494_v28 = vadd.f32 %v5878_v20, %v409_v27  ;;  %v471_v27 = vsub.f32 1.0, %v455_v19 }
  0xd2   : > { %653 = vrot.lane.b32.xlu1 %v6494_v28, %s6271_s9  ;;  %v6530_v47 = vpack.i.bf16 %v6494_v28, %v6490_v26 }
  0xd4   : > { %8323 = vst [vmem:[#allocation18_spill] sm:$0xff] %v6530_v47 }
  0xd7   : > { %v412_v29 = vpop.f32.mrf.mxu0 }
  0xd8   : > { %v6526_v46 = vadd.f32 %v5878_v20, %v412_v29  ;;  %v6275_v29 = vmov -1e+30  }
  0xdf   : > { %v415_v30 = vpop.f32.mrf.mxu0 }
  0xe0   : > { %v6498_v31 = vadd.f32 %v5878_v20, %v415_v30  ;;  %v6634_v30 = vsel %vm452_vm2, 0.0, %v6275_v29  ;;  %v463_v29 = vld [vmem:[%s6623_s27 + $0x9] sm:$0x1] }
  0xe2   : > { %8318 = vst [vmem:[#allocation13_spill] sm:$0xff] %v6498_v31  ;;  %707 = vrot.lane.b32.xlu2 %v6498_v31, %s6271_s9 }
  0xe7   : > { %v418_v32 = vpop.f32.mrf.mxu0 }
  0xe8   : > { %v6502_v33 = vadd.f32 %v5878_v20, %v418_v32  ;;  %v6640_v32 = vadd.f32 %v518_v25, %v6634_v30  ;;  %v462_v25 = vld [vmem:[%s6623_s27 + $0x8] sm:$0x1] }
  0xea   : > { %734 = vrot.lane.b32.xlu2 %v6502_v33, %s6271_s9  ;;  %v5738_v57 = vpack.i.bf16 %v6498_v31, %v6502_v33 }
  0xef   : > { %v421_v34 = vpop.f32.mrf.mxu0 }
  0xf0   : > { %v6547_v53 = vadd.f32 %v5878_v20, %v421_v34  ;;  %v487_v34 = vmul.f32 -3.4028235e+38, %v471_v27 }
  0xf7   : > { %v424_v35 = vpop.f32.mrf.mxu0 }
  0xf8   : > { %v6506_v36 = vadd.f32 %v5878_v20, %v424_v35  ;;  %v456_v35 = vld [vmem:[%s6623_s27 + $0x2] sm:$0x1] }
  0xfa   : > { %8319 = vst [vmem:[#allocation14_spill] sm:$0xff] %v6506_v36  ;;  %788 = vrot.lane.b32.xlu0 %v6506_v36, %s6271_s9 }
  0xff   : > { %v427_v37 = vpop.f32.mrf.mxu0 }
 0x100   : > { %v6510_v38 = vadd.f32 %v5878_v20, %v427_v37 }
 0x102   : > { %8320 = vst [vmem:[#allocation15_spill] sm:$0xff] %v6510_v38  ;;  %815 = vrot.lane.b32.xlu1 %v6510_v38, %s6271_s9  ;;  %v5743_v58 = vpack.i.bf16 %v6506_v36, %v6510_v38 }
 0x107   : > { %v430_v39 = vpop.f32.mrf.mxu0 }
 0x108   : > { %v6518_v42 = vadd.f32 %v5878_v20, %v430_v39 }
 0x10f   : > { %v433_v40 = vpop.f32.mrf.mxu0 }
 0x110   : > { %v6514_v41 = vadd.f32 %v5878_v20, %v433_v40 }
 0x112   : > { %8321 = vst [vmem:[#allocation16_spill] sm:$0xff] %v6514_v41  ;;  %869 = vrot.lane.b32.xlu2 %v6514_v41, %s6271_s9 }
 0x117   : > { %v436_v43 = vpop.f32.mrf.mxu0 }
 0x118   : > { %v6520_v44 = vadd.f32 %v5878_v20, %v436_v43 }
 0x11a   : > { %8322 = vst [vmem:[#allocation17_spill] sm:$0xff] %v6520_v44  ;;  %842 = vrot.lane.b32.xlu2 %v6518_v42, %s6271_s9  ;;  %896 = vrot.lane.b32.xlu0 %v6520_v44, %s6271_s9  ;;  %v5748_v61 = vpack.i.bf16 %v6514_v41, %v6520_v44 }
 0x11f   : > { %v439_v45 = vpop.f32.mrf.mxu0 }
 0x120   : > { %v6536_v48 = vadd.f32 %v5878_v20, %v439_v45  ;;  %v519_v45 = vperm.slane %v487_v34, 0  ;;  %v478_v34 = vsub.f32 1.0, %v462_v25 }
 0x122   : > { %5734 = vrot.lane.b32.xlu2 %v6530_v47, %s6272_s13  ;;  %680 = vrot.lane.b32.xlu0 %v6526_v46, %s6271_s9 }
 0x127   : > { %v442_v49 = vpop.f32.mrf.mxu0 }
 0x128   : > { %v6538_v50 = vadd.f32 %v5878_v20, %v442_v49  ;;  %v472_v49 = vsub.f32 1.0, %v456_v35 }
 0x12a   : > { %8324 = vst [vmem:[#allocation19_spill] sm:$0xff] %v6538_v50  ;;  %950 = vrot.lane.b32.xlu1 %v6538_v50, %s6271_s9  ;;  %1755 = vrot.lane.b32.xlu2 %v6486_v24, %s6273_s26 }
 0x12b   : > { %923 = vrot.lane.b32.xlu0 %v6536_v48, %s6271_s9 }
 0x12c   : > { %v572_v51 = vpop.permute.xlu0 %571 }
 0x12d   : > { %5390 = vmatpush.xpose.msk.msra.mxu1 %vm573_vm1, %v572_v51 }
 0x12f   : > { %v445_v52 = vpop.f32.mrf.mxu0 }
 0x130   : > { %v6549_v54 = vadd.f32 %v5878_v20, %v445_v52  ;;  %5391 = vmatmul.msk.f32.vlgmr.msra.gmra.mxu1 %vm573_vm1, %v6482_v22 }
 0x132   : > { %8325 = vst [vmem:[#allocation20_spill] sm:$0xff] %v6549_v54  ;;  %761 = vrot.lane.b32.xlu1 %v6547_v53, %s6271_s9  ;;  %977 = vrot.lane.b32.xlu2 %v6549_v54, %s6271_s9  ;;  %v5753_v0 = vpack.i.bf16 %v6538_v50, %v6549_v54  ;;  %s6281_s9 = smov 72  }
 0x133   : > { %5729 = vrot.lane.b32.xlu0 %v6555_v55, %s6272_s13 }
 0x134   : > { %v600_v56 = vpop.permute.xlu0 %599 }
 0x135   : > { %5392 = vmatpush.xpose.msk.msrb.mxu1 %vm573_vm1, %v600_v56  ;;  %v6654_v56 = vadd.f32 %v519_v45, %v6634_v30  ;;  %v494_v45 = vmul.f32 -3.4028235e+38, %v478_v34 }
 0x138   : > { %5393 = vmatmul.msk.f32.vlgmr.msrb.gmra.mxu1 %vm573_vm1, %v6486_v24 }
 0x13a   : > { %5739 = vrot.lane.b32.xlu1 %v5738_v57, %s6272_s13  ;;  %1809 = vrot.lane.b32.xlu2 %v6494_v28, %s6274_s8  ;;  %v488_v57 = vmul.f32 -3.4028235e+38, %v472_v49  ;;  %v465_v49 = vld [vmem:[%s6623_s27 + $0xb] sm:$0x1] }
 0x13b   : > { %5744 = vrot.lane.b32.xlu0 %v5743_v58, %s6272_s13  ;;  %v457_v58 = vld [vmem:[%s6623_s27 + $0x3] sm:$0x1] }
 0x13c   : > { %v708_v59 = vpop.permute.xlu2 %707  ;;  %v627_v60 = vpop.permute.xlu1 %626 }
 0x13d   : > { %5394 = vmatpush.xpose.msk.msrb.mxu0 %vm573_vm1, %v627_v60  ;;  %5400 = vmatpush.xpose.msk.msra.mxu3 %vm573_vm1, %v708_v59 }
 0x140   : > { %5395 = vmatmul.msk.f32.vlgmr.msrb.gmra.mxu0 %vm573_vm1, %v6490_v26  ;;  %5401 = vmatmul.msk.f32.vlgmr.msra.gmra.mxu3 %vm573_vm1, %v6498_v31 }
 0x142   : > { %1727 = vrot.lane.b32.xlu1 %v6482_v22, %s6273_s26 }
 0x143   : > { %5749 = vrot.lane.b32.xlu0 %v5748_v61, %s6272_s13  ;;  %v520_v61 = vperm.slane %v488_v57, 0  ;;  %v526_v57 = vperm.slane %v494_v45, 0 }
 0x144   : > { %v654_v62 = vpop.permute.xlu1 %653  ;;  %v735_v63 = vpop.permute.xlu2 %734 }
 0x145   : > { %5396 = vmatpush.xpose.msk.msra.mxu1 %vm573_vm1, %v654_v62  ;;  %v473_v62 = vsub.f32 1.0, %v457_v58  ;;  %v481_v58 = vsub.f32 1.0, %v465_v49  ;;  %v468_v49 = vld [vmem:[%s6623_s27 + $0xe] sm:$0x1] }
 0x148   : > { %5397 = vmatmul.msk.f32.vlgmr.msra.gmra.mxu1 %vm573_vm1, %v6494_v28 }
 0x149   : > { %5402 = vmatpush.xpose.msk.msrb.mxu1 %vm573_vm1, %v735_v63 }
 0x14b   : > { %1753 = vrot.lane.b32.xlu0 %v6486_v24, %s6274_s8 }
 0x150   : > { %5403 = vmatmul.msk.f32.vlgmr.msrb.gmra.mxu1 %vm573_vm1, %v6502_v33 }
 0x153   : > { %1725 = vrot.lane.b32.xlu0 %v6482_v22, %s6274_s8 }
 0x15b   : > { %5754 = vrot.lane.b32.xlu0 %v5753_v0, %s6272_s13 }
 0x16c   : > { %v870_v1 = vpop.permute.xlu2 %869  ;;  %v789_v2 = vpop.permute.xlu0 %788 }
 0x16d   : > { %5406 = vmatpush.xpose.msk.msrb.mxu3 %vm573_vm1, %v789_v2  ;;  %v6667_v2 = vadd.f32 %v520_v61, %v6634_v30 }
 0x170   : > { %5407 = vmatmul.msk.f32.vlgmr.msrb.gmra.mxu3 %vm573_vm1, %v6506_v36 }
 0x171   : > { %5412 = vmatpush.xpose.msk.msra.mxu3 %vm573_vm1, %v870_v1  ;;  %v459_v1 = vld [vmem:[%s6623_s27 + $0x5] sm:$0x1] }
 0x174   : > { %v843_v3 = vpop.permute.xlu2 %842  ;;  %v816_v4 = vpop.permute.xlu1 %815 }
 0x175   : > { %5408 = vmatpush.xpose.msk.msra.mxu1 %vm573_vm1, %v816_v4  ;;  %v475_v4 = vsub.f32 1.0, %v459_v1 }
 0x178   : > { %5409 = vmatmul.msk.f32.vlgmr.msra.gmra.mxu1 %vm573_vm1, %v6510_v38  ;;  %5413 = vmatmul.msk.f32.vlgmr.msra.gmra.mxu3 %vm573_vm1, %v6514_v41 }
 0x17c   : > { %v6607_v5 = vpop.permute.xlu2 %5734 }
 0x17d   : > { %v5736_v9 = vunpack.i.l.bf16 %v6607_v5  ;;  %v5737_v63 = vunpack.i.h.bf16 %v6607_v5 }
 0x184   : > { %v6609_v6 = vpop.permute.xlu2 %1755 }
 0x18c   : > { %v897_v7 = vpop.permute.xlu0 %896  ;;  %v978_v8 = vpop.permute.xlu2 %977 }
 0x18d   : > { %5414 = vmatpush.xpose.msk.msrb.mxu1 %vm573_vm1, %v897_v7 }
 0x190   : > { %5415 = vmatmul.msk.f32.vlgmr.msrb.gmra.mxu1 %vm573_vm1, %v6520_v44 }
 0x191   : > { %5420 = vmatpush.xpose.msk.msra.mxu1 %vm573_vm1, %v978_v8 }
 0x194   : > { %v681_v10 = vpop.permute.xlu0 %680 }
 0x195   : > { %1252 = vmatpush.msrb.mxu1 %v5736_v9  ;;  %5398 = vmatpush.xpose.msk.msra.mxu2 %vm573_vm1, %v681_v10  ;;  %v491_v10 = vmul.f32 -3.4028235e+38, %v475_v4 }
 0x198   : > { %5399 = vmatmul.msk.f32.vlgmr.msra.gmra.mxu2 %vm573_vm1, %v6526_v46  ;;  %5421 = vmatmul.msk.f32.vlgmr.msra.gmra.mxu1 %vm573_vm1, %v6549_v54 }
 0x19c   : > { %v951_v12 = vpop.permute.xlu1 %950 }
 0x19d   : > { %v924_v14 = vpop.permute.xlu0 %923  ;;  %5418 = vmatpush.xpose.msk.msrb.mxu3 %vm573_vm1, %v951_v12  ;;  %v523_v12 = vperm.slane %v491_v10, 0 }
 0x19f   : > { %v6683_v15 = vadd.f32 %v523_v12, %v6634_v30 }
 0x1a0   : > { %5419 = vmatmul.msk.f32.vlgmr.msrb.gmra.mxu3 %vm573_vm1, %v6538_v50 }
 0x1a4   : > { %v762_v20 = vpop.permute.xlu1 %761 }
 0x1a5   : > { %v5730_v21 = vpop.permute.xlu0 %5729  ;;  %5404 = vmatpush.xpose.msk.msrb.mxu2 %vm573_vm1, %v762_v20  ;;  %v460_v20 = vld [vmem:[%s6623_s27 + $0x6] sm:$0x1] }
 0x1a6   : > { %v5732_v23 = vunpack.i.h.bf16 %v5730_v21  ;;  %v5731_v51 = vunpack.i.l.bf16 %v5730_v21  ;;  %v476_v21 = vsub.f32 1.0, %v460_v20 }
 0x1a8   : > { %1226 = vmatpush.msra.mxu3 %v5732_v23  ;;  %5405 = vmatmul.msk.f32.vlgmr.msrb.gmra.mxu2 %vm573_vm1, %v6547_v53  ;;  %v492_v23 = vmul.f32 -3.4028235e+38, %v476_v21 }
 0x1a9   : > { %5410 = vmatpush.xpose.msk.msra.mxu2 %vm573_vm1, %v843_v3  ;;  %v489_v3 = vmul.f32 -3.4028235e+38, %v473_v62  ;;  %v6705_v62 = vadd.f32 %v526_v57, %v6634_v30  ;;  %v484_v57 = vsub.f32 1.0, %v468_v49 }
 0x1aa   : > { %v524_v27 = vperm.slane %v492_v23, 0 }
 0x1ab   : > { %v521_v9 = vperm.slane %v489_v3, 0 }
 0x1ac   : > { %v6643_v37 = vpop.permute.xlu1 %5739  ;;  %v6696_v35 = vadd.f32 %v524_v27, %v6634_v30 }
 0x1ad   : > { %5416 = vmatpush.xpose.msk.msrb.mxu2 %vm573_vm1, %v924_v14  ;;  %v5742_v39 = vunpack.i.h.bf16 %v6643_v37  ;;  %v595_v40 = vpop.f32.mrf.mxu1  ;;  %v6675_v11 = vadd.f32 %v521_v9, %v6634_v30  ;;  %v6713_v9 = vpop.permute.xlu0 %5744 }
 0x1ae   : > { %v6647_v43 = vadd.f32 %v595_v40, %v6640_v32 }
 0x1af   : > { %1330 = vmatpush.msra.mxu1 %v5742_v39  ;;  %v479_v39 = vsub.f32 1.0, %v463_v29 }
 0x1b0   : > { %5411 = vmatmul.msk.f32.vlgmr.msra.gmra.mxu2 %vm573_vm1, %v6518_v42  ;;  %v1003_v52 = vsel %vm573_vm1, %v6647_v43, -inf }
 0x1b1   : > { %1200 = vmatpush.msra.mxu2 %v5731_v51  ;;  %1004 = vmax.xlane.f32.xlu0 %v1003_v52  ;;  %v495_v52 = vmul.f32 -3.4028235e+38, %v479_v39 }
 0x1b3   : > { %v527_v61 = vperm.slane %v495_v52, 0 }
 0x1b5   : > { %v622_v59 = vpop.f32.mrf.mxu1  ;;  %v6729_v21 = vpop.permute.xlu0 %5749 }
 0x1b6   : > { %v6658_v60 = vadd.f32 %v622_v59, %v6654_v56 }
 0x1b8   : > { %5417 = vmatmul.msk.f32.vlgmr.msrb.gmra.mxu2 %vm573_vm1, %v6536_v48  ;;  %v1006_v0 = vsel %vm573_vm1, %v6658_v60, -inf }
 0x1b9   : > { %1278 = vmatpush.msrb.mxu2 %v5737_v63  ;;  %1007 = vmax.xlane.f32.xlu1 %v1006_v0  ;;  %v497_v63 = vmul.f32 -3.4028235e+38, %v481_v58  ;;  %v6708_v0 = vadd.f32 %v527_v61, %v6634_v30  ;;  %v469_v58 = vld [vmem:[%s6623_s27 + $0xf] sm:$0x1] }
 0x1ba   : > { %v485_v61 = vsub.f32 1.0, %v469_v58 }
 0x1bb   : > { %v529_v4 = vperm.slane %v497_v63, 0 }
 0x1bd   : > { %v649_v7 = vpop.f32.mrf.mxu0  ;;  %v6733_v29 = vpop.permute.xlu0 %1753 }
 0x1be   : > { %v6670_v8 = vadd.f32 %v649_v7, %v6667_v2 }
 0x1c0   : > { %v1009_v5 = vsel %vm573_vm1, %v6670_v8, -inf }
 0x1c1   : > { %1010 = vmax.xlane.f32.xlu2 %v1009_v5 }
 0x1c3   : > { %v730_v17 = vpop.f32.mrf.mxu3 }
 0x1c4   : > { %v6688_v18 = vadd.f32 %v730_v17, %v6683_v15  ;;  %v466_v17 = vld [vmem:[%s6623_s27 + $0xc] sm:$0x1] }
 0x1c5   : > { %1811 = vrot.lane.b32.xlu0 %v6494_v28, %s6273_s26  ;;  %v676_v13 = vpop.f32.mrf.mxu1  ;;  %v482_v20 = vsub.f32 1.0, %v466_v17  ;;  %v6744_v52 = vpop.permute.xlu0 %1725 }
 0x1c6   : > { %v6680_v14 = vadd.f32 %v676_v13, %v6675_v11  ;;  %v1018_v19 = vsel %vm573_vm1, %v6688_v18, -inf  ;;  %v6723_v13 = vadd.f32 %v529_v4, %v6634_v30  ;;  %v501_v4 = vmul.f32 -3.4028235e+38, %v485_v61 }
 0x1c7   : > { %v498_v25 = vmul.f32 -3.4028235e+38, %v482_v20 }
 0x1c8   : > { %v1012_v16 = vsel %vm573_vm1, %v6680_v14, -inf }
 0x1c9   : > { %1013 = vmax.xlane.f32.xlu2 %v1012_v16  ;;  %v530_v27 = vperm.slane %v498_v25, 0 }
 0x1cb   : > { %v6736_v34 = vadd.f32 %v530_v27, %v6634_v30 }
 0x1cd   : > { %v757_v40 = vpop.f32.mrf.mxu1  ;;  %v6747_v63 = vpop.permute.xlu0 %5754 }
 0x1ce   : > { %v6700_v51 = vadd.f32 %v757_v40, %v6696_v35 }
 0x1d0   : > { %v1021_v59 = vsel %vm573_vm1, %v6700_v51, -inf }
 0x1d1   : > { %1019 = vmax.xlane.f32.xlu2 %v1018_v19 }
 0x1ef   : > { %1022 = vmax.xlane.f32.xlu0 %v1021_v59  ;;  %v500_v59 = vmul.f32 -3.4028235e+38, %v484_v57  ;;  %v6768_v57 = vpop.permute.xlu2 %1809 }
 0x1f3   : > { %v811_v1 = vpop.f32.mrf.mxu3 }
 0x1f4   : > { %v6711_v3 = vadd.f32 %v811_v1, %v6705_v62  ;;  %v532_v1 = vperm.slane %v500_v59, 0 }
 0x1f5   : > { %v838_v7 = vpop.f32.mrf.mxu1 }
 0x1f6   : > { %v6716_v5 = vadd.f32 %v838_v7, %v6708_v0  ;;  %v1027_v10 = vsel %vm573_vm1, %v6711_v3, -inf  ;;  %v6750_v7 = vadd.f32 %v532_v1, %v6634_v30 }
 0x1f7   : > { %1028 = vmax.xlane.f32.xlu1 %v1027_v10  ;;  %v533_v10 = vperm.slane %v501_v4, 0 }
 0x1f8   : > { %v1030_v12 = vsel %vm573_vm1, %v6716_v5, -inf  ;;  %8326 = vst [vmem:[#allocation21_spill] sm:$0xff] %v6750_v7 }
 0x1f9   : > { %1031 = vmax.xlane.f32.xlu2 %v1030_v12  ;;  %v6761_v27 = vadd.f32 %v533_v10, %v6634_v30 }
 0x1fb   : > { %v892_v16 = vpop.f32.mrf.mxu3 }
 0x1fc   : > { %v6727_v19 = vadd.f32 %v892_v16, %v6723_v13  ;;  %v6752_v16 = vpop.permute.xlu1 %1727 }
 0x1fe   : > { %v1036_v23 = vsel %vm573_vm1, %v6727_v19, -inf }
 0x201   : > { %1037 = vmax.xlane.f32.xlu2 %v1036_v23 }
 0x20d   : > { %v919_v39 = vpop.f32.mrf.mxu1 }
 0x20e   : > { %v6739_v40 = vadd.f32 %v919_v39, %v6736_v34 }
 0x210   : > { %v1039_v45 = vsel %vm573_vm1, %v6739_v40, -inf }
 0x211   : > { %1040 = vmax.xlane.f32.xlu2 %v1039_v45 }
 0x215   : > { %v1000_v39 = vpop.f32.mrf.mxu1 }
 0x216   : > { %v6766_v49 = vadd.f32 %v1000_v39, %v6761_v27 }
 0x218   : > { %v1048_v59 = vsel %vm573_vm1, %v6766_v49, -inf }
 0x223   : > { %v973_v12 = vpop.f32.mrf.mxu3 }
 0x224   : > { %v6755_v17 = vadd.f32 %v973_v12, %v6750_v7  ;;  %v1005_v20 = vpop.xlane.xlu0 %1004 }
 0x225   : > { %v1051_v23 = vsub.f32 %v6647_v43, %v1005_v20 }
 0x226   : > { %v1045_v25 = vsel %vm573_vm1, %v6755_v17, -inf }
 0x227   : > { %1046 = vmax.xlane.f32.xlu1 %v1045_v25  ;;  %v1067_v45 = vmul.f32 1.442695, %v1051_v23 }
 0x229   : > { %1781 = vrot.lane.b32.xlu2 %v6490_v26, %s6274_s8  ;;  %5880 = vpow2.f32 %v1067_v45 }
 0x22c   : > { %v1008_v58 = vpop.xlane.xlu1 %1007 }
 0x22d   : > { %v1052_v43 = vsub.f32 %v6658_v60, %v1008_v58 }
 0x22f   : > { %1049 = vmax.xlane.f32.xlu1 %v1048_v59  ;;  %v1069_v61 = vmul.f32 1.442695, %v1052_v43  ;;  %v6773_v1 = vpop.eup %5880 }
 0x230   : > { %v1099_v12 = vsel %vm573_vm1, %v6773_v1, 0.0 }
 0x231   : > { %5882 = vpow2.f32 %v1069_v61 }
 0x234   : > { %v1011_v4 = vpop.xlane.xlu2 %1010 }
 0x235   : > { %v1053_v10 = vsub.f32 %v6670_v8, %v1011_v4 }
 0x237   : > { %1100 = vadd.xlane.f32.xlu1 %v1099_v12  ;;  %v1071_v20 = vmul.f32 1.442695, %v1053_v10  ;;  %v6778_v23 = vpop.eup %5882 }
 0x238   : > { %v1102_v39 = vsel %vm573_vm1, %v6778_v23, 0.0 }
 0x239   : > { %5884 = vpow2.f32 %v1071_v20  ;;  %v6796_v20 = vpop.permute.xlu0 %1811 }
 0x23c   : > { %v1014_v25 = vpop.xlane.xlu2 %1013 }
 0x23d   : > { %v1054_v60 = vsub.f32 %v6680_v14, %v1014_v25 }
 0x23f   : > { %v1073_v45 = vmul.f32 1.442695, %v1054_v60  ;;  %1103 = vadd.xlane.f32.xlu1 %v1102_v39  ;;  %v6783_v58 = vpop.eup %5884 }
 0x240   : > { %v1105_v8 = vsel %vm573_vm1, %v6783_v58, 0.0 }
 0x241   : > { %5886 = vpow2.f32 %v1073_v45 }
 0x244   : > { %v1020_v14 = vpop.xlane.xlu2 %1019 }
 0x245   : > { %v1056_v39 = vsub.f32 %v6688_v18, %v1020_v14 }
 0x247   : > { %v6787_v43 = vpop.eup %5886  ;;  %1106 = vadd.xlane.f32.xlu1 %v1105_v8 }
 0x248   : > { %v1108_v59 = vsel %vm573_vm1, %v6787_v43, 0.0 }
 0x249   : > { %1109 = vadd.xlane.f32.xlu0 %v1108_v59  ;;  %v1077_v59 = vmul.f32 1.442695, %v1056_v39 }
 0x25d   : > { %1783 = vrot.lane.b32.xlu0 %v6490_v26, %s6273_s26 }
 0x260   : > { %1867 = vrot.lane.b32.xlu1 %v6498_v31, %s6273_s26 }
 0x262   : > { %v1023_v24 = vpop.xlane.xlu0 %1022 }
 0x26a   : > { %v1029_v12 = vpop.xlane.xlu1 %1028 }
 0x26b   : > { %v1059_v25 = vsub.f32 %v6711_v3, %v1029_v12 }
 0x26c   : > { %v1032_v61 = vpop.xlane.xlu2 %1031 }
 0x26d   : > { %v1060_v4 = vsub.f32 %v6716_v5, %v1032_v61  ;;  %v1083_v8 = vmul.f32 1.442695, %v1059_v25  ;;  %v1057_v5 = vsub.f32 %v6700_v51, %v1023_v24 }
 0x26f   : > { %v1085_v10 = vmul.f32 1.442695, %v1060_v4  ;;  %v1079_v4 = vmul.f32 1.442695, %v1057_v5 }
 0x271   : > { %5888 = vpow2.f32 %v1085_v10 }
 0x272   : > { %5890 = vpow2.f32 %v1083_v8 }
 0x273   : > { %5892 = vpow2.f32 %v1077_v59 }
 0x274   : > { %v1038_v47 = vpop.xlane.xlu2 %1037  ;;  %5894 = vpow2.f32 %v1079_v4 }
 0x275   : > { %v1062_v25 = vsub.f32 %v6727_v19, %v1038_v47 }
 0x277   : > { %v6799_v60 = vpop.eup %5888  ;;  %v1089_v51 = vmul.f32 1.442695, %v1062_v25 }
 0x278   : > { %v1126_v45 = vsel %vm573_vm1, %v6799_v60, 0.0  ;;  %v6805_v61 = vpop.eup %5890 }
 0x279   : > { %1127 = vadd.xlane.f32.xlu2 %v1126_v45  ;;  %v6808_v12 = vpop.eup %5892  ;;  %v1123_v18 = vsel %vm573_vm1, %v6805_v61, 0.0 }
 0x27a   : > { %v1114_v24 = vsel %vm573_vm1, %v6808_v12, 0.0  ;;  %v6815_v39 = vpop.eup %5894 }
 0x27b   : > { %v1117_v47 = vsel %vm573_vm1, %v6815_v39, 0.0 }
 0x284   : > { %v1041_v3 = vpop.xlane.xlu2 %1040 }
 0x285   : > { %v1063_v10 = vsub.f32 %v6739_v40, %v1041_v3 }
 0x287   : > { %v1091_v14 = vmul.f32 1.442695, %v1063_v10  ;;  %1124 = vadd.xlane.f32.xlu0 %v1123_v18 }
 0x289   : > { %5896 = vpow2.f32 %v1091_v14  ;;  %v5741_v14 = vunpack.i.l.bf16 %v6643_v37 }
 0x28a   : > { %1115 = vadd.xlane.f32.xlu1 %v1114_v24  ;;  %5898 = vpow2.f32 %v1089_v51 }
 0x28f   : > { %v6817_v45 = vpop.eup %5896 }
 0x290   : > { %v1135_v40 = vsel %vm573_vm1, %v6817_v45, 0.0  ;;  %v6825_v19 = vpop.eup %5898 }
 0x291   : > { %1839 = vrot.lane.b32.xlu2 %v6526_v46, %s6273_s26  ;;  %1136 = vadd.xlane.f32.xlu0 %v1135_v40  ;;  %v1132_v8 = vsel %vm573_vm1, %v6825_v19, 0.0 }
 0x292   : > { %1118 = vadd.xlane.f32.xlu1 %v1117_v47 }
 0x299   : > { %1921 = vrot.lane.b32.xlu2 %v6547_v53, %s6274_s8 }
 0x29a   : > { %v1047_v59 = vpop.xlane.xlu1 %1046  ;;  %1133 = vadd.xlane.f32.xlu1 %v1132_v8 }
 0x2a1   : > { %1951 = vrot.lane.b32.xlu2 %v6506_v36, %s6273_s26 }
 0x2a2   : > { %v1050_v5 = vpop.xlane.xlu1 %1049 }
 0x2a5   : > { %1865 = vrot.lane.b32.xlu0 %v6498_v31, %s6274_s8 }
 0x2a9   : > { %1977 = vrot.lane.b32.xlu2 %v6510_v38, %s6274_s8 }
 0x2aa   : > { %v1101_v4 = vpop.xlane.xlu1 %1100 }
 0x2ab   : > { %5900 = vrcp.f32 %v1101_v4  ;;  %v5746_v4 = vunpack.i.l.bf16 %v6713_v9 }
 0x2ad   : > { %1923 = vrot.lane.b32.xlu0 %v6547_v53, %s6273_s26 }
 0x2b1   : > { %v5901_v3 = vpop.eup %5900  ;;  %2035 = vrot.lane.b32.xlu2 %v6514_v41, %s6273_s26 }
 0x2b2   : > { %v1163_v10 = vmul.f32 %v5901_v3, %v6773_v1  ;;  %v1104_v18 = vpop.xlane.xlu1 %1103 }
 0x2b3   : > { %5902 = vrcp.f32 %v1104_v18  ;;  %1837 = vrot.lane.b32.xlu1 %v6526_v46, %s6274_s8  ;;  %v458_v18 = vld [vmem:[%s6623_s27 + $0x4] sm:$0x1] }
 0x2b4   : > { %5422 = vmatmul.msk.f32.vlgmr.msra.gmra.mxu2 %vm573_vm1, %v1163_v10 }
 0x2b5   : > { %1356 = vmatpush.msra.mxu2 %v5741_v14  ;;  %1893 = vrot.lane.b32.xlu0 %v6502_v33, %s6274_s8 }
 0x2b9   : > { %v5903_v25 = vpop.eup %5902  ;;  %2091 = vrot.lane.b32.xlu2 %v6536_v48, %s6273_s26 }
 0x2ba   : > { %v1164_v24 = vmul.f32 %v5903_v25, %v6778_v23  ;;  %v1107_v1 = vpop.xlane.xlu1 %1106  ;;  %v5747_v23 = vunpack.i.h.bf16 %v6713_v9  ;;  %v1065_v9 = vsub.f32 %v6755_v17, %v1047_v59  ;;  %v474_v17 = vsub.f32 1.0, %v458_v18 }
 0x2bb   : > { %5904 = vrcp.f32 %v1107_v1  ;;  %1895 = vrot.lane.b32.xlu1 %v6502_v33, %s6273_s26 }
 0x2bc   : > { %v1110_v37 = vpop.xlane.xlu0 %1109  ;;  %5423 = vmatmul.msk.f32.vlgmr.msra.gmra.mxu3 %vm573_vm1, %v1164_v24 }
 0x2bd   : > { %5906 = vrcp.f32 %v1110_v37  ;;  %1949 = vrot.lane.b32.xlu0 %v6506_v36, %s6274_s8  ;;  %v703_v37 = vpop.f32.mrf.mxu2 }
 0x2c1   : > { %v5905_v51 = vpop.eup %5904  ;;  %2119 = vrot.lane.b32.xlu2 %v6538_v50, %s6273_s26 }
 0x2c2   : > { %v1165_v40 = vmul.f32 %v5905_v51, %v6783_v58  ;;  %v1095_v58 = vmul.f32 1.442695, %v1065_v9  ;;  %v6906_v9 = vpop.permute.xlu2 %1781 }
 0x2c3   : > { %v5907_v47 = vpop.eup %5906  ;;  %1979 = vrot.lane.b32.xlu1 %v6510_v38, %s6273_s26 }
 0x2c4   : > { %v1166_v8 = vmul.f32 %v5907_v47, %v6787_v43  ;;  %5424 = vmatmul.msk.f32.vlgmr.msrb.gmra.mxu1 %vm573_vm1, %v1165_v40  ;;  %5908 = vpow2.f32 %v1095_v58  ;;  %v1066_v43 = vsub.f32 %v6766_v49, %v1050_v5  ;;  %v490_v49 = vmul.f32 -3.4028235e+38, %v474_v17  ;;  %v464_v47 = vld [vmem:[%s6623_s27 + $0xa] sm:$0x1] }
 0x2c5   : > { %1408 = vmatpush.msrb.mxu1 %v5747_v23  ;;  %2005 = vrot.lane.b32.xlu0 %v6518_v42, %s6274_s8 }
 0x2c6   : > { %5425 = vmatmul.msk.f32.vlgmr.msrb.gmra.mxu2 %vm573_vm1, %v1166_v8  ;;  %v1097_v3 = vmul.f32 1.442695, %v1066_v43  ;;  %v522_v25 = vperm.slane %v490_v49, 0  ;;  %v6908_v43 = vpop.f32.mrf.mxu2  ;;  %v5752_v49 = vunpack.i.h.bf16 %v6729_v21 }
 0x2c7   : > { %1434 = vmatpush.msrb.mxu2 %v5746_v4  ;;  %v480_v4 = vsub.f32 1.0, %v464_v47 }
 0x2c8   : > { %5910 = vpow2.f32 %v1097_v3  ;;  %v6896_v1 = vadd.f32 %v522_v25, %v6634_v30 }
 0x2c9   : > { %v496_v18 = vmul.f32 -3.4028235e+38, %v480_v4 }
 0x2ca   : > { %v6882_v10 = vpop.eup %5908  ;;  %v6901_v40 = vadd.f32 %v703_v37, %v6896_v1 }
 0x2cb   : > { %2007 = vrot.lane.b32.xlu1 %v6518_v42, %s6273_s26  ;;  %v1141_v14 = vsel %vm573_vm1, %v6882_v10, 0.0 }
 0x2cc   : > { %v1015_v8 = vsel %vm573_vm1, %v6901_v40, -inf }
 0x2cd   : > { %2063 = vrot.lane.b32.xlu0 %v6520_v44, %s6273_s26 }
 0x2ce   : > { %v6889_v59 = vpop.eup %5910 }
 0x2cf   : > { %v1144_v5 = vsel %vm573_vm1, %v6889_v59, 0.0  ;;  %v6898_v51 = vpop.permute.xlu0 %1783 }
 0x2d2   : > { %v6893_v24 = vpop.permute.xlu1 %1867 }
 0x2d3   : > { %2033 = vrot.lane.b32.xlu1 %v6514_v41, %s6274_s8 }
 0x2d5   : > { %2089 = vrot.lane.b32.xlu0 %v6536_v48, %s6274_s8 }
 0x2db   : > { %2061 = vrot.lane.b32.xlu1 %v6520_v44, %s6274_s8 }
 0x2e3   : > { %2117 = vrot.lane.b32.xlu1 %v6538_v50, %s6274_s8 }
 0x2ea   : > { %1142 = vadd.xlane.f32.xlu2 %v1141_v14 }
 0x2eb   : > { %2145 = vrot.lane.b32.xlu1 %v6549_v54, %s6274_s8 }
 0x2ec   : > { %v1128_v25 = vpop.xlane.xlu2 %1127 }
 0x2f2   : > { %1145 = vadd.xlane.f32.xlu2 %v1144_v5  ;;  %v528_v5 = vperm.slane %v496_v18, 0  ;;  %v5757_v18 = vunpack.i.h.bf16 %v6747_v63 }
 0x2fa   : > { %v1125_v58 = vpop.xlane.xlu0 %1124 }
 0x2fd   : > { %v1116_v23 = vpop.xlane.xlu1 %1115 }
 0x2fe   : > { %5912 = vrcp.f32 %v1116_v23  ;;  %v6916_v23 = vadd.f32 %v528_v5, %v6634_v30 }
 0x2ff   : > { %1016 = vmax.xlane.f32.xlu0 %v1015_v8  ;;  %5914 = vrcp.f32 %v1125_v58  ;;  %v865_v8 = vpop.f32.mrf.mxu2 }
 0x304   : > { %v5913_v3 = vpop.eup %5912 }
 0x305   : > { %v1168_v14 = vmul.f32 %v5913_v3, %v6808_v12  ;;  %v1119_v17 = vpop.xlane.xlu1 %1118  ;;  %v5915_v37 = vpop.eup %5914  ;;  %v5751_v3 = vunpack.i.l.bf16 %v6729_v21 }
 0x306   : > { %5916 = vrcp.f32 %v1119_v17  ;;  %v1171_v12 = vmul.f32 %v5915_v37, %v6805_v61  ;;  %v6925_v17 = vadd.f32 %v865_v8, %v6916_v23  ;;  %v5756_v37 = vunpack.i.l.bf16 %v6747_v63  ;;  %v6939_v8 = vpop.permute.xlu2 %1839 }
 0x307   : > { %5427 = vmatmul.msk.f32.vlgmr.msra.gmra.mxu1 %vm573_vm1, %v1168_v14  ;;  %5918 = vrcp.f32 %v1128_v25  ;;  %v1137_v14 = vpop.xlane.xlu0 %1136  ;;  %v6931_v25 = vld [vmem:[#allocation5] sm:$0xff] }
 0x308   : > { %1486 = vmatpush.msra.mxu1 %v5752_v49  ;;  %v1033_v21 = vsel %vm573_vm1, %v6925_v17, -inf  ;;  %1659 = vmatpush.msra.mxu0 %v6931_v25 }
 0x30a   : > { %2147 = vrot.lane.b32.xlu2 %v6549_v54, %s6273_s26 }
 0x30c   : > { %v5917_v47 = vpop.eup %5916 }
 0x30d   : > { %v1169_v4 = vmul.f32 %v5917_v47, %v6815_v39  ;;  %v1134_v58 = vpop.xlane.xlu1 %1133  ;;  %v5919_v49 = vpop.eup %5918 }
 0x30e   : > { %5920 = vrcp.f32 %v1134_v58  ;;  %v1172_v39 = vmul.f32 %v5919_v49, %v6799_v60 }
 0x30f   : > { %5428 = vmatmul.msk.f32.vlgmr.msra.gmra.mxu2 %vm573_vm1, %v1169_v4  ;;  %5430 = vmatmul.msk.f32.vlgmr.msrb.gmra.mxu1 %vm573_vm1, %v1171_v12  ;;  %5922 = vrcp.f32 %v1137_v14 }
 0x310   : > { %1512 = vmatpush.msra.mxu2 %v5751_v3  ;;  %1564 = vmatpush.msrb.mxu1 %v5757_v18  ;;  %v6950_v3 = vpop.permute.xlu2 %1921  ;;  %v467_v18 = vld [vmem:[%s6623_s27 + $0xd] sm:$0x1] }
 0x314   : > { %v5921_v61 = vpop.eup %5920 }
 0x315   : > { %v1174_v5 = vmul.f32 %v5921_v61, %v6825_v19  ;;  %1034 = vmax.xlane.f32.xlu1 %v1033_v21  ;;  %v5923_v60 = vpop.eup %5922  ;;  %v461_v19 = vld [vmem:[%s6623_s27 + $0x7] sm:$0x1]  ;;  %s5266_s27 = scalar_lea.hbm %s8283_s6, %s5652_s12 }
 0x316   : > { %v1175_v12 = vmul.f32 %v5923_v60, %v6817_v45  ;;  %v477_v63 = vsub.f32 1.0, %v461_v19 }
 0x317   : > { %v6935_v47 = vpop.permute.xlu0 %1865  ;;  %5431 = vmatmul.msk.f32.vlgmr.msrb.gmra.mxu2 %vm573_vm1, %v1172_v39  ;;  %5433 = vmatmul.msk.f32.vlgmr.msra.gmra.mxu1 %vm573_vm1, %v1174_v5 }
 0x318   : > { %1590 = vmatpush.msrb.mxu2 %v5756_v37  ;;  %5454 = vmatpush.xpose.msk.msra.mxu1 %vm573_vm1, %v6752_v16  ;;  %v493_v58 = vmul.f32 -3.4028235e+38, %v477_v63  ;;  %v483_v16 = vsub.f32 1.0, %v467_v18  ;;  %v6960_v39 = vpop.permute.xlu2 %1951  ;;  %v946_v37 = vpop.f32.mrf.mxu2 }
 0x31a   : > { %v525_v49 = vperm.slane %v493_v58, 0  ;;  %v499_v21 = vmul.f32 -3.4028235e+38, %v483_v16 }
 0x31c   : > { %v6958_v45 = vadd.f32 %v525_v49, %v6634_v30 }
 0x31e   : > { %v6964_v5 = vadd.f32 %v6908_v43, %v6958_v45 }
 0x31f   : > { %v6945_v4 = vpop.permute.xlu0 %1923  ;;  %5434 = vmatmul.msk.f32.vlgmr.msra.gmra.mxu2 %vm573_vm1, %v1175_v12 }
 0x320   : > { %5456 = vmatpush.xpose.msk.msra.mxu2 %vm573_vm1, %v6609_v6  ;;  %v531_v6 = vperm.slane %v499_v21, 0  ;;  %v1024_v63 = vsel %vm573_vm1, %v6964_v5, -inf  ;;  %v6976_v18 = vpop.permute.xlu2 %1977 }
 0x322   : > { %v6969_v12 = vadd.f32 %v531_v6, %v6634_v30 }
 0x324   : > { %8327 = vst [vmem:[#allocation22_spill] sm:$0xff] %v6969_v12  ;;  %v6974_v58 = vadd.f32 %v946_v37, %v6969_v12 }
 0x325   : > { %v6953_v14 = vpop.permute.xlu1 %1837 }
 0x326   : > { %v1042_v21 = vsel %vm573_vm1, %v6974_v58, -inf }
 0x327   : > { %v6955_v61 = vpop.permute.xlu0 %1893 }
 0x32d   : > { %v1896_v60 = vpop.permute.xlu1 %1895 }
 0x32f   : > { %v6966_v19 = vpop.permute.xlu0 %1949 }
 0x333   : > { %1025 = vmax.xlane.f32.xlu2 %v1024_v63  ;;  %v2036_v63 = vpop.permute.xlu2 %2035 }
 0x335   : > { %v1980_v16 = vpop.permute.xlu1 %1979 }
 0x337   : > { %v6978_v49 = vpop.permute.xlu0 %2005  ;;  %v1202_v43 = vpop.f32.mrf.mxu2 }
 0x338   : > { %5438 = vmatmul.msk.f32.vlgmr.msra.gmra.mxu0 %vm573_vm1, %v1202_v43 }
 0x33b   : > { %1043 = vmax.xlane.f32.xlu2 %v1042_v21  ;;  %v2092_v54 = vpop.permute.xlu2 %2091 }
 0x33d   : > { %v2008_v37 = vpop.permute.xlu1 %2007 }
 0x33f   : > { %v2064_v30 = vpop.permute.xlu0 %2063  ;;  %v1228_v6 = vpop.f32.mrf.mxu3 }
 0x340   : > { %5439 = vmatmul.msk.f32.gmra.mxu0 %vm573_vm1, %v1228_v6 }
 0x341   : > { %5478 = vmatpush.xpose.msk.msrb.mxu0 %vm573_vm1, %v2064_v30  ;;  %v1254_v50 = vpop.f32.mrf.mxu1 }
 0x343   : > { %v2120_v43 = vpop.permute.xlu2 %2119 }
 0x345   : > { %v2034_v44 = vpop.permute.xlu1 %2033 }
 0x348   : > { %5440 = vmatmul.msk.f32.gmra.mxu0 %vm573_vm1, %v1254_v50  ;;  %v2090_v50 = vpop.permute.xlu0 %2089 }
 0x349   : > { %v1280_v22 = vpop.f32.mrf.mxu2 }
 0x34d   : > { %v2062_v31 = vpop.permute.xlu1 %2061 }
 0x350   : > { %5441 = vmatmul.msk.f32.gmra.mxu0 %vm573_vm1, %v1280_v22 }
 0x355   : > { %v2118_v30 = vpop.permute.xlu1 %2117 }
 0x358   : > { %5479 = vmatmul.msk.f32.vlgmr.msrb.gmra.mxu0 %vm573_vm1, %v2062_v31 }
 0x35d   : > { %v1143_v21 = vpop.xlane.xlu2 %1142  ;;  %v2146_v31 = vpop.permute.xlu1 %2145 }
 0x35e   : > { %5924 = vrcp.f32 %v1143_v21 }
 0x364   : > { %v5925_v41 = vpop.eup %5924 }
 0x365   : > { %v1177_v6 = vmul.f32 %v5925_v41, %v6882_v10  ;;  %v1146_v38 = vpop.xlane.xlu2 %1145 }
 0x366   : > { %5926 = vrcp.f32 %v1146_v38 }
 0x367   : > { %5436 = vmatmul.msk.f32.vlgmr.msrb.gmra.mxu1 %vm573_vm1, %v1177_v6 }
 0x368   : > { %5458 = vmatpush.xpose.msk.msrb.mxu1 %vm573_vm1, %v6898_v51 }
 0x36c   : > { %v5927_v36 = vpop.eup %5926 }
 0x36d   : > { %v1178_v22 = vmul.f32 %v5927_v36, %v6889_v59  ;;  %v2148_v7 = vpop.permute.xlu2 %2147 }
 0x36e   : > { %5484 = vmatpush.xpose.msk.msra.mxu0 %vm573_vm1, %v2148_v7 }
 0x36f   : > { %5437 = vmatmul.msk.f32.vlgmr.msrb.gmra.mxu2 %vm573_vm1, %v1178_v22  ;;  %5455 = vmatmul.msk.f32.vlgmr.msra.gmra.mxu1 %vm573_vm1, %v6744_v52 }
 0x370   : > { %5460 = vmatpush.xpose.msk.msrb.mxu2 %vm573_vm1, %v6796_v20  ;;  %5462 = vmatpush.xpose.msk.msra.mxu1 %vm573_vm1, %v6939_v8 }
 0x371   : > { %5485 = vmatmul.msk.f32.vlgmr.msra.gmra.mxu0 %vm573_vm1, %v2146_v31 }
 0x372   : > { %v1017_v38 = vpop.xlane.xlu0 %1016 }
 0x373   : > { %v1055_v36 = vsub.f32 %v6901_v40, %v1017_v38 }
 0x375   : > { %v1075_v41 = vmul.f32 1.442695, %v1055_v36 }
 0x377   : > { %5928 = vpow2.f32 %v1075_v41  ;;  %5457 = vmatmul.msk.f32.vlgmr.msra.gmra.mxu2 %vm573_vm1, %v6733_v29  ;;  %5459 = vmatmul.msk.f32.vlgmr.msrb.gmra.mxu1 %vm573_vm1, %v6906_v9  ;;  %v7036_v29 = vpack.i.bf16 %v6547_v53, %v6526_v46 }
 0x378   : > { %5464 = vmatpush.xpose.msk.msra.mxu2 %vm573_vm1, %v6893_v24  ;;  %5466 = vmatpush.xpose.msk.msrb.mxu1 %vm573_vm1, %v1896_v60  ;;  %v5763_v60 = vpack.i.bf16 %v6536_v48, %v6518_v42 }
 0x37d   : > { %v7010_v52 = vpop.eup %5928 }
 0x37e   : > { %v1111_v7 = vsel %vm573_vm1, %v7010_v52, 0.0 }
 0x37f   : > { %1112 = vadd.xlane.f32.xlu0 %v1111_v7  ;;  %5461 = vmatmul.msk.f32.vlgmr.msrb.gmra.mxu2 %vm573_vm1, %v6768_v57  ;;  %v5773_v57 = vpack.i.bf16 %v6526_v46, %v6494_v28 }
 0x380   : > { %5463 = vmatmul.msk.f32.vlgmr.msra.gmra.mxu1 %vm573_vm1, %v6953_v14  ;;  %5468 = vmatpush.xpose.msk.msrb.mxu2 %vm573_vm1, %v6945_v4 }
 0x381   : > { %5470 = vmatpush.xpose.msk.msra.mxu1 %vm573_vm1, %v6960_v39 }
 0x384   : > { %v7069_v39 = vpop.f32.mrf.mxu1 }
 0x387   : > { %5465 = vmatmul.msk.f32.vlgmr.msra.gmra.mxu2 %vm573_vm1, %v6935_v47 }
 0x388   : > { %5467 = vmatmul.msk.f32.vlgmr.msrb.gmra.mxu1 %vm573_vm1, %v6955_v61  ;;  %5472 = vmatpush.xpose.msk.msra.mxu2 %vm573_vm1, %v1980_v16  ;;  %v1035_v20 = vpop.xlane.xlu1 %1034 }
 0x389   : > { %5474 = vmatpush.xpose.msk.msrb.mxu1 %vm573_vm1, %v2008_v37  ;;  %v1061_v24 = vsub.f32 %v6925_v17, %v1035_v20 }
 0x38b   : > { %v1087_v40 = vmul.f32 1.442695, %v1061_v24 }
 0x38f   : > { %5469 = vmatmul.msk.f32.vlgmr.msrb.gmra.mxu2 %vm573_vm1, %v6950_v3 }
 0x390   : > { %5471 = vmatmul.msk.f32.vlgmr.msra.gmra.mxu1 %vm573_vm1, %v6966_v19  ;;  %5476 = vmatpush.xpose.msk.msrb.mxu2 %vm573_vm1, %v2036_v63 }
 0x391   : > { %5480 = vmatpush.xpose.msk.msra.mxu1 %vm573_vm1, %v2092_v54  ;;  %v5778_v54 = vpack.i.bf16 %v6502_v33, %v6490_v26 }
 0x392   : > { %v7078_v19 = vpop.f32.mrf.mxu2 }
 0x393   : > { %5759 = vrot.lane.b32.xlu0 %v7036_v29, %s6272_s13 }
 0x397   : > { %5473 = vmatmul.msk.f32.vlgmr.msra.gmra.mxu2 %vm573_vm1, %v6976_v18 }
 0x398   : > { %5475 = vmatmul.msk.f32.vlgmr.msrb.gmra.mxu1 %vm573_vm1, %v6978_v49  ;;  %5482 = vmatpush.xpose.msk.msra.mxu2 %vm573_vm1, %v2120_v43 }
 0x39a   : > { %v7084_v49 = vpop.f32.mrf.mxu2 }
 0x39b   : > { %5774 = vrot.lane.b32.xlu0 %v5773_v57, %s6276_s15 }
 0x39f   : > { %5477 = vmatmul.msk.f32.vlgmr.msrb.gmra.mxu2 %vm573_vm1, %v2034_v44 }
 0x3a0   : > { %5481 = vmatmul.msk.f32.vlgmr.msra.gmra.mxu1 %vm573_vm1, %v2090_v50 }
 0x3a2   : > { %v7090_v37 = vpop.f32.mrf.mxu2 }
 0x3a3   : > { %5779 = vrot.lane.b32.xlu0 %v5778_v54, %s6276_s15 }
 0x3a6   : > { %v1026_v10 = vpop.xlane.xlu2 %1025 }
 0x3a7   : > { %v1058_v59 = vsub.f32 %v6964_v5, %v1026_v10  ;;  %5483 = vmatmul.msk.f32.vlgmr.msra.gmra.mxu2 %vm573_vm1, %v2118_v30  ;;  %v7071_v5 = vpop.f32.mrf.mxu1 }
 0x3a9   : > { %v1081_v51 = vmul.f32 1.442695, %v1058_v59 }
 0x3ab   : > { %5930 = vpow2.f32 %v1081_v51 }
 0x3ac   : > { %5932 = vpow2.f32 %v1087_v40 }
 0x3ae   : > { %v1044_v9 = vpop.xlane.xlu2 %1043 }
 0x3af   : > { %v1064_v44 = vsub.f32 %v6974_v58, %v1044_v9  ;;  %v7082_v18 = vpop.f32.mrf.mxu1 }
 0x3b1   : > { %v7057_v47 = vpop.eup %5930  ;;  %v1093_v8 = vmul.f32 1.442695, %v1064_v44 }
 0x3b2   : > { %v1120_v4 = vsel %vm573_vm1, %v7057_v47, 0.0  ;;  %v7061_v3 = vpop.eup %5932 }
 0x3b3   : > { %5934 = vpow2.f32 %v1093_v8  ;;  %1121 = vadd.xlane.f32.xlu1 %v1120_v4  ;;  %v1129_v61 = vsel %vm573_vm1, %v7061_v3, 0.0 }
 0x3b5   : > { %v7080_v58 = vpop.f32.mrf.mxu0 }
 0x3b6   : > { %8328 = vst [vmem:[#allocation23_spill] sm:$0xff] %v7080_v58 }
 0x3b9   : > { %v7063_v14 = vpop.eup %5934 }
 0x3ba   : > { %v1138_v17 = vsel %vm573_vm1, %v7063_v14, 0.0 }
 0x3bb   : > { %1139 = vadd.xlane.f32.xlu2 %v1138_v17  ;;  %1130 = vadd.xlane.f32.xlu1 %v1129_v61 }
 0x3bd   : > { %v7086_v16 = vpop.f32.mrf.mxu0 }
 0x3be   : > { %8329 = vst [vmem:[#allocation24_spill] sm:$0xff] %v7086_v16 }
 0x3c5   : > { %v7092_v21 = vpop.f32.mrf.mxu0 }
 0x3c6   : > { %8330 = vst [vmem:[#allocation25_spill] sm:$0xff] %v7092_v21 }
 0x3cd   : > { %v7096_v50 = vpop.f32.mrf.mxu0 }
 0x3ce   : > { %8331 = vst [vmem:[#allocation26_spill] sm:$0xff] %v7096_v50 }
 0x3d3   : > { %5769 = vrot.lane.b32.xlu2 %v6555_v55, %s6276_s15 }
 0x3d4   : > { %5764 = vrot.lane.b32.xlu1 %v5763_v60, %s6272_s13  ;;  %s6282_s13 = smov 40  }
 0x3d5   : > { %v2086_v59 = vpop.f32.mrf.mxu0 }
 0x3d6   : > { %v7119_v40 = vadd.f32 %v2086_v59, %v6736_v34 }
 0x3e4   : > { %v7088_v63 = vpop.f32.mrf.mxu1 }
 0x3ec   : > { %v1750_v43 = vpop.f32.mrf.mxu1 }
 0x3ed   : > { %v7099_v22 = vadd.f32 %v1750_v43, %v6640_v32 }
 0x3ef   : > { %v2173_v36 = vsel %vm573_vm1, %v7099_v22, -inf }
 0x3f2   : > { %v7094_v6 = vpop.f32.mrf.mxu2  ;;  %v1113_v41 = vpop.xlane.xlu0 %1112 }
 0x3f3   : > { %5936 = vrcp.f32 %v1113_v41 }
 0x3f4   : > { %v1806_v30 = vpop.f32.mrf.mxu1 }
 0x3f5   : > { %v7112_v20 = vadd.f32 %v1806_v30, %v6667_v2  ;;  %v2209_v30 = vsel %vm573_vm1, %v7119_v40, -inf }
 0x3f7   : > { %v2179_v51 = vsel %vm573_vm1, %v7112_v20, -inf }
 0x3f9   : > { %v5937_v9 = vpop.eup %5936 }
 0x3fa   : > { %v1778_v31 = vpop.f32.mrf.mxu2  ;;  %v1167_v43 = vmul.f32 %v5937_v9, %v7010_v52 }
 0x3fb   : > { %v7102_v38 = vadd.f32 %v1778_v31, %v6654_v56 }
 0x3fc   : > { %2174 = vmax.xlane.f32.xlu2 %v2173_v36 }
 0x3fd   : > { %v1862_v7 = vpop.f32.mrf.mxu1  ;;  %v2176_v57 = vsel %vm573_vm1, %v7102_v38, -inf }
 0x3fe   : > { %v7109_v54 = vadd.f32 %v1862_v7, %v6896_v1  ;;  %2177 = vmax.xlane.f32.xlu1 %v2176_v57 }
 0x400   : > { %v2185_v10 = vsel %vm573_vm1, %v7109_v54, -inf }
 0x401   : > { %2186 = vmax.xlane.f32.xlu0 %v2185_v10 }
 0x402   : > { %v1834_v24 = vpop.f32.mrf.mxu2 }
 0x403   : > { %v7125_v61 = vadd.f32 %v1834_v24, %v6675_v11 }
 0x404   : > { %2180 = vmax.xlane.f32.xlu2 %v2179_v51 }
 0x405   : > { %v1918_v44 = vpop.f32.mrf.mxu1  ;;  %v5760_v8 = vpop.permute.xlu0 %5759  ;;  %v2182_v41 = vsel %vm573_vm1, %v7125_v61, -inf }
 0x406   : > { %v7122_v4 = vadd.f32 %v1918_v44, %v6696_v35  ;;  %v5761_v17 = vunpack.i.l.bf16 %v5760_v8  ;;  %v5762_v60 = vunpack.i.h.bf16 %v5760_v8 }
 0x408   : > { %1304 = vmatpush.msrb.mxu3 %v5761_v17  ;;  %v2191_v31 = vsel %vm573_vm1, %v7122_v4, -inf }
 0x409   : > { %2210 = vmax.xlane.f32.xlu0 %v2209_v30  ;;  %2192 = vmax.xlane.f32.xlu1 %v2191_v31 }
 0x40a   : > { %5426 = vmatmul.msk.f32.vlgmr.msrb.gmra.mxu3 %vm573_vm1, %v1167_v43  ;;  %v1890_v36 = vpop.f32.mrf.mxu2 }
 0x40b   : > { %1382 = vmatpush.msra.mxu3 %v5762_v60  ;;  %v7136_v52 = vadd.f32 %v1890_v36, %v6683_v15 }
 0x40c   : > { %2183 = vmax.xlane.f32.xlu2 %v2182_v41 }
 0x40d   : > { %v1974_v7 = vpop.f32.mrf.mxu1  ;;  %v5775_v57 = vpop.permute.xlu0 %5774  ;;  %v2188_v59 = vsel %vm573_vm1, %v7136_v52, -inf }
 0x40e   : > { %v7159_v41 = vadd.f32 %v1974_v7, %v6705_v62  ;;  %v5777_v16 = vunpack.i.h.bf16 %v5775_v57  ;;  %v5776_v58 = vunpack.i.l.bf16 %v5775_v57 }
 0x412   : > { %v1946_v10 = vpop.f32.mrf.mxu2 }
 0x413   : > { %v7147_v8 = vadd.f32 %v1946_v10, %v6958_v45 }
 0x414   : > { %2189 = vmax.xlane.f32.xlu2 %v2188_v59  ;;  %v2197_v59 = vsel %vm573_vm1, %v7159_v41, -inf }
 0x415   : > { %v2030_v24 = vpop.f32.mrf.mxu1  ;;  %v7140_v51 = vpop.permute.xlu0 %5779  ;;  %v2194_v30 = vsel %vm573_vm1, %v7147_v8, -inf }
 0x416   : > { %v7143_v9 = vadd.f32 %v2030_v24, %v6916_v23  ;;  %v5781_v44 = vunpack.i.l.bf16 %v7140_v51 }
 0x418   : > { %2422 = vmatpush.msrb.mxu0 %v5781_v44  ;;  %v2203_v17 = vsel %vm573_vm1, %v7143_v9, -inf }
 0x419   : > { %2204 = vmax.xlane.f32.xlu1 %v2203_v17 }
 0x41a   : > { %v2002_v60 = vpop.f32.mrf.mxu2 }
 0x41b   : > { %v7152_v43 = vadd.f32 %v2002_v60, %v6708_v0 }
 0x41c   : > { %2195 = vmax.xlane.f32.xlu2 %v2194_v30 }
 0x41d   : > { %v2200_v31 = vsel %vm573_vm1, %v7152_v43, -inf  ;;  %v2114_v36 = vpop.f32.mrf.mxu1 }
 0x41e   : > { %2201 = vmax.xlane.f32.xlu0 %v2200_v31  ;;  %v7162_v10 = vadd.f32 %v2114_v36, %v6969_v12 }
 0x420   : > { %v2212_v44 = vsel %vm573_vm1, %v7162_v10, -inf }
 0x422   : > { %v2058_v24 = vpop.f32.mrf.mxu2 }
 0x423   : > { %v7169_v60 = vadd.f32 %v2058_v24, %v6723_v13 }
 0x424   : > { %2198 = vmax.xlane.f32.xlu2 %v2197_v59 }
 0x425   : > { %v2206_v7 = vsel %vm573_vm1, %v7169_v60, -inf }
 0x426   : > { %v1122_v17 = vpop.xlane.xlu1 %1121  ;;  %2213 = vmax.xlane.f32.xlu0 %v2212_v44 }
 0x427   : > { %5938 = vrcp.f32 %v1122_v17 }
 0x42c   : > { %2207 = vmax.xlane.f32.xlu2 %v2206_v7 }
 0x42d   : > { %v5939_v30 = vpop.eup %5938 }
 0x42e   : > { %v1170_v31 = vmul.f32 %v5939_v30, %v7057_v47  ;;  %v1140_v36 = vpop.xlane.xlu2 %1139  ;;  %v1131_v24 = vpop.xlane.xlu1 %1130 }
 0x42f   : > { %5940 = vrcp.f32 %v1131_v24 }
 0x430   : > { %5429 = vmatmul.msk.f32.vlgmr.msra.gmra.mxu3 %vm573_vm1, %v1170_v31  ;;  %5942 = vrcp.f32 %v1140_v36 }
 0x435   : > { %v5941_v44 = vpop.eup %5940 }
 0x436   : > { %v5770_v59 = vpop.permute.xlu2 %5769  ;;  %v1173_v47 = vmul.f32 %v5941_v44, %v7061_v3  ;;  %v5943_v57 = vpop.eup %5942 }
 0x437   : > { %v5772_v50 = vunpack.i.h.bf16 %v5770_v59  ;;  %v5771_v21 = vunpack.i.l.bf16 %v5770_v59 }
 0x439   : > { %2370 = vmatpush.msrb.mxu1 %v5771_v21  ;;  %2396 = vmatpush.msrb.mxu2 %v5772_v50  ;;  %v1176_v21 = vmul.f32 %v5943_v57, %v7063_v14 }
 0x43b   : > { %2448 = vmatpush.msra.mxu1 %v5776_v58  ;;  %2474 = vmatpush.msra.mxu2 %v5777_v16 }
 0x446   : > { %v5765_v17 = vpop.permute.xlu1 %5764 }
 0x447   : > { %v5767_v7 = vunpack.i.h.bf16 %v5765_v17  ;;  %v5766_v12 = vunpack.i.l.bf16 %v5765_v17 }
 0x449   : > { %1460 = vmatpush.msrb.mxu3 %v5766_v12 }
 0x44a   : > { %5432 = vmatmul.msk.f32.vlgmr.msrb.gmra.mxu3 %vm573_vm1, %v1173_v47 }
 0x44b   : > { %1538 = vmatpush.msra.mxu3 %v5767_v7 }
 0x44d   : > { %5653 = vmatpush.msrb.mxu3 %v6931_v25 }
 0x452   : > { %5435 = vmatmul.msk.f32.vlgmr.msra.gmra.mxu3 %vm573_vm1, %v1176_v21 }
 0x46f   : > { %v2175_v58 = vpop.xlane.xlu2 %2174 }
 0x470   : > { %v2221_v16 = vsub.f32 %v7099_v22, %v2175_v58 }
 0x471   : > { %v2178_v50 = vpop.xlane.xlu1 %2177 }
 0x472   : > { %v2237_v30 = vmul.f32 1.442695, %v2221_v16  ;;  %v2222_v31 = vsub.f32 %v7102_v38, %v2178_v50  ;;  %v2170_v50 = vpop.f32.mrf.mxu0 }
 0x474   : > { %5944 = vpow2.f32 %v2237_v30  ;;  %v2239_v3 = vmul.f32 1.442695, %v2222_v31  ;;  %v2187_v17 = vpop.xlane.xlu0 %2186  ;;  %v7199_v30 = vadd.f32 %v2170_v50, %v6761_v27 }
 0x475   : > { %v2225_v21 = vsub.f32 %v7109_v54, %v2187_v17 }
 0x476   : > { %5946 = vpow2.f32 %v2239_v3 }
 0x477   : > { %v2181_v12 = vpop.xlane.xlu2 %2180 }
 0x478   : > { %v2223_v36 = vsub.f32 %v7112_v20, %v2181_v12 }
 0x47a   : > { %v7183_v59 = vpop.eup %5944  ;;  %v2241_v25 = vmul.f32 1.442695, %v2223_v36 }
 0x47b   : > { %v2269_v14 = vsel %vm573_vm1, %v7183_v59, 0.0 }
 0x47c   : > { %v7187_v24 = vpop.eup %5946  ;;  %5948 = vpow2.f32 %v2241_v25  ;;  %v2193_v22 = vpop.xlane.xlu1 %2192  ;;  %2270 = vadd.xlane.f32.xlu2 %v2269_v14  ;;  %v2218_v25 = vsel %vm573_vm1, %v7199_v30, -inf }
 0x47d   : > { %v2227_v44 = vsub.f32 %v7122_v4, %v2193_v22  ;;  %v2272_v38 = vsel %vm573_vm1, %v7187_v24, 0.0  ;;  %v2245_v4 = vmul.f32 1.442695, %v2225_v21 }
 0x47e   : > { %2273 = vadd.xlane.f32.xlu0 %v2272_v38 }
 0x47f   : > { %v2249_v7 = vmul.f32 1.442695, %v2227_v44  ;;  %v2184_v20 = vpop.xlane.xlu2 %2183 }
 0x480   : > { %v2224_v47 = vsub.f32 %v7125_v61, %v2184_v20 }
 0x481   : > { %5950 = vpow2.f32 %v2249_v7 }
 0x482   : > { %v7193_v57 = vpop.eup %5948  ;;  %v2243_v58 = vmul.f32 1.442695, %v2224_v47 }
 0x483   : > { %v2275_v16 = vsel %vm573_vm1, %v7193_v57, 0.0 }
 0x484   : > { %5952 = vpow2.f32 %v2243_v58  ;;  %2276 = vadd.xlane.f32.xlu2 %v2275_v16  ;;  %v2142_v16 = vpop.f32.mrf.mxu2 }
 0x485   : > { %5954 = vpow2.f32 %v2245_v4 }
 0x487   : > { %v2190_v31 = vpop.xlane.xlu2 %2189  ;;  %v7201_v3 = vpop.eup %5950 }
 0x488   : > { %v2226_v61 = vsub.f32 %v7136_v52, %v2190_v31  ;;  %v2287_v54 = vsel %vm573_vm1, %v7201_v3, 0.0 }
 0x489   : > { %2288 = vadd.xlane.f32.xlu1 %v2287_v54 }
 0x48a   : > { %v7206_v12 = vpop.eup %5952  ;;  %v2247_v36 = vmul.f32 1.442695, %v2226_v61 }
 0x48b   : > { %v2278_v14 = vsel %vm573_vm1, %v7206_v12, 0.0  ;;  %v7213_v38 = vpop.eup %5954 }
 0x48c   : > { %5956 = vpow2.f32 %v2247_v36  ;;  %2219 = vmax.xlane.f32.xlu2 %v2218_v25  ;;  %2279 = vadd.xlane.f32.xlu0 %v2278_v14  ;;  %v2205_v52 = vpop.xlane.xlu1 %2204  ;;  %v2281_v21 = vsel %vm573_vm1, %v7213_v38, 0.0  ;;  %v8334_v36 = vld [vmem:[#allocation15_spill] sm:$0xff] }
 0x48d   : > { %v1306_v22 = vpop.f32.mrf.mxu3  ;;  %v2231_v20 = vsub.f32 %v7143_v9, %v2205_v52 }
 0x48e   : > { %5442 = vmatmul.msk.f32.vlgmr.msrb.gmra.mxu3 %vm573_vm1, %v1306_v22  ;;  %v8335_v22 = vld [vmem:[#allocation16_spill] sm:$0xff] }
 0x48f   : > { %v2196_v44 = vpop.xlane.xlu2 %2195  ;;  %v2257_v50 = vmul.f32 1.442695, %v2231_v20  ;;  %v7248_v52 = vpack.i.bf16 %v8335_v22, %v6518_v42 }
 0x490   : > { %v2228_v17 = vsub.f32 %v7147_v8, %v2196_v44  ;;  %v8332_v8 = vld [vmem:[#allocation21_spill] sm:$0xff] }
 0x491   : > { %v7226_v4 = vadd.f32 %v2142_v16, %v8332_v8  ;;  %v8336_v44 = vld [vmem:[#allocation13_spill] sm:$0xff] }
 0x492   : > { %v7216_v7 = vpop.eup %5956  ;;  %v2251_v47 = vmul.f32 1.442695, %v2228_v17  ;;  %v5783_v17 = vpack.i.bf16 %v8336_v44, %v6547_v53 }
 0x493   : > { %v2284_v58 = vsel %vm573_vm1, %v7216_v7, 0.0  ;;  %v2215_v9 = vsel %vm573_vm1, %v7226_v4, -inf }
 0x494   : > { %5958 = vpow2.f32 %v2251_v47  ;;  %2282 = vadd.xlane.f32.xlu0 %v2281_v21  ;;  %2285 = vadd.xlane.f32.xlu1 %v2284_v58  ;;  %v2211_v47 = vpop.xlane.xlu0 %2210 }
 0x495   : > { %5960 = vpow2.f32 %v2257_v50  ;;  %v2233_v50 = vsub.f32 %v7119_v40, %v2211_v47 }
 0x496   : > { %5443 = vmatmul.msk.f32.gmra.mxu3 %vm573_vm1, %v7069_v39  ;;  %v8333_v39 = vld [vmem:[#allocation14_spill] sm:$0xff] }
 0x497   : > { %v7240_v25 = vpack.i.bf16 %v8334_v36, %v8333_v39  ;;  %v2199_v20 = vpop.xlane.xlu2 %2198 }
 0x498   : > { %v2229_v21 = vsub.f32 %v7159_v41, %v2199_v20 }
 0x49a   : > { %v7228_v31 = vpop.eup %5958  ;;  %v2253_v58 = vmul.f32 1.442695, %v2229_v21 }
 0x49b   : > { %v2290_v61 = vsel %vm573_vm1, %v7228_v31, 0.0  ;;  %v7236_v54 = vpop.eup %5960 }
 0x49c   : > { %2216 = vmax.xlane.f32.xlu0 %v2215_v9  ;;  %2291 = vadd.xlane.f32.xlu1 %v2290_v61  ;;  %v2299_v14 = vsel %vm573_vm1, %v7236_v54, 0.0  ;;  %v2202_v16 = vpop.xlane.xlu0 %2201  ;;  %5962 = vpow2.f32 %v2253_v58 }
 0x49d   : > { %v2230_v9 = vsub.f32 %v7152_v43, %v2202_v16  ;;  %v8337_v16 = vld [vmem:[#allocation11_spill] sm:$0xff] }
 0x49e   : > { %5444 = vmatmul.msk.f32.gmra.mxu3 %vm573_vm1, %v7078_v19 }
 0x49f   : > { %v2208_v47 = vpop.xlane.xlu2 %2207 }
 0x4a4   : > { %5789 = vrot.lane.b32.xlu2 %v7240_v25, %s6276_s15  ;;  %2300 = vadd.xlane.f32.xlu0 %v2299_v14  ;;  %v2261_v14 = vmul.f32 1.442695, %v2233_v50  ;;  %v8338_v50 = vld [vmem:[#allocation17_spill] sm:$0xff] }
 0x4a6   : > { %5964 = vpow2.f32 %v2261_v14 }
 0x4ac   : > { %5794 = vrot.lane.b32.xlu2 %v7248_v52, %s6276_s15 }
 0x4b3   : > { %v1384_v19 = vpop.f32.mrf.mxu3 }
 0x4b4   : > { %5445 = vmatmul.msk.f32.gmra.mxu3 %vm573_vm1, %v1384_v19  ;;  %v7264_v19 = vpop.eup %5962 }
 0x4b5   : > { %5784 = vrot.lane.b32.xlu1 %v5783_v17, %s6276_s15  ;;  %v2293_v41 = vsel %vm573_vm1, %v7264_v19, 0.0 }
 0x4bc   : > { %5446 = vmatmul.msk.f32.gmra.mxu3 %vm573_vm1, %v7071_v5  ;;  %v2255_v5 = vmul.f32 1.442695, %v2230_v9  ;;  %v7289_v9 = vpack.i.bf16 %v6536_v48, %v8338_v50 }
 0x4be   : > { %5966 = vpow2.f32 %v2255_v5  ;;  %v5782_v5 = vunpack.i.h.bf16 %v7140_v51 }
 0x4c4   : > { %5447 = vmatmul.msk.f32.gmra.mxu3 %vm573_vm1, %v7084_v49  ;;  %v7270_v49 = vpop.eup %5964 }
 0x4c5   : > { %v7272_v40 = vpop.eup %5966  ;;  %v2305_v43 = vsel %vm573_vm1, %v7270_v49, 0.0 }
 0x4c6   : > { %v2296_v17 = vsel %vm573_vm1, %v7272_v40, 0.0 }
 0x4cd   : > { %v1462_v61 = vpop.f32.mrf.mxu3 }
 0x4ce   : > { %5448 = vmatmul.msk.f32.gmra.mxu3 %vm573_vm1, %v1462_v61 }
 0x4d5   : > { %2294 = vadd.xlane.f32.xlu2 %v2293_v41  ;;  %v1540_v20 = vpop.f32.mrf.mxu3 }
 0x4d6   : > { %5449 = vmatmul.msk.f32.gmra.mxu3 %vm573_vm1, %v7082_v18  ;;  %v2214_v18 = vpop.xlane.xlu0 %2213 }
 0x4dd   : > { %2306 = vadd.xlane.f32.xlu2 %v2305_v43 }
 0x4de   : > { %5450 = vmatmul.msk.f32.gmra.mxu3 %vm573_vm1, %v7090_v37 }
 0x4df   : > { %2297 = vadd.xlane.f32.xlu1 %v2296_v17 }
 0x4e6   : > { %5451 = vmatmul.msk.f32.gmra.mxu3 %vm573_vm1, %v1540_v20 }
 0x4ee   : > { %5452 = vmatmul.msk.f32.gmra.mxu3 %vm573_vm1, %v7088_v63 }
 0x4ef   : > { %v2271_v21 = vpop.xlane.xlu2 %2270 }
 0x4f0   : > { %5968 = vrcp.f32 %v2271_v21 }
 0x4f1   : > { %v2274_v58 = vpop.xlane.xlu0 %2273 }
 0x4f2   : > { %5970 = vrcp.f32 %v2274_v58 }
 0x4f5   : > { %2896 = vrot.lane.b32.xlu2 %v8337_v16, %s6277_s20 }
 0x4f6   : > { %v5969_v37 = vpop.eup %5968  ;;  %5453 = vmatmul.msk.f32.gmra.mxu3 %vm573_vm1, %v7094_v6 }
 0x4f7   : > { %v2333_v61 = vmul.f32 %v5969_v37, %v7183_v59  ;;  %v2277_v14 = vpop.xlane.xlu2 %2276 }
 0x4f8   : > { %v5971_v63 = vpop.eup %5970  ;;  %5972 = vrcp.f32 %v2277_v14  ;;  %5799 = vrot.lane.b32.xlu1 %v7289_v9, %s6276_s15 }
 0x4f9   : > { %v2334_v41 = vmul.f32 %v5971_v63, %v7187_v24  ;;  %5486 = vmatmul.msk.f32.vlgmr.msrb.gmra.mxu1 %vm573_vm1, %v2333_v61  ;;  %v2232_v24 = vsub.f32 %v7169_v60, %v2208_v47  ;;  %v8339_v63 = vld [vmem:[#allocation12_spill] sm:$0xff]  ;;  %v2234_v47 = vsub.f32 %v7162_v10, %v2214_v18 }
 0x4fa   : > { %2526 = vmatpush.msrb.mxu1 %v5782_v5 }
 0x4fb   : > { %5487 = vmatmul.msk.f32.vlgmr.msrb.gmra.mxu2 %vm573_vm1, %v2334_v41 }
 0x4fc   : > { %v2289_v21 = vpop.xlane.xlu1 %2288 }
 0x4fd   : > { %3066 = vrot.lane.b32.xlu2 %v6502_v33, %s6278_s29 }
 0x4fe   : > { %v5973_v6 = vpop.eup %5972 }
 0x4ff   : > { %v2335_v59 = vmul.f32 %v5973_v6, %v7193_v57  ;;  %v2220_v43 = vpop.xlane.xlu2 %2219  ;;  %v2280_v51 = vpop.xlane.xlu0 %2279  ;;  %v2259_v57 = vmul.f32 1.442695, %v2232_v24  ;;  %v2263_v6 = vmul.f32 1.442695, %v2234_v47 }
 0x500   : > { %v2236_v17 = vsub.f32 %v7199_v30, %v2220_v43  ;;  %5974 = vrcp.f32 %v2280_v51  ;;  %2898 = vrot.lane.b32.xlu1 %v8337_v16, %s6278_s29 }
 0x501   : > { %5488 = vmatmul.msk.f32.vlgmr.msrb.gmra.mxu0 %vm573_vm1, %v2335_v59 }
 0x502   : > { %v2267_v20 = vmul.f32 1.442695, %v2236_v17 }
 0x504   : > { %5976 = vpow2.f32 %v2267_v20 }
 0x505   : > { %3122 = vrot.lane.b32.xlu2 %v8333_v39, %s6278_s29  ;;  %5978 = vrcp.f32 %v2289_v21  ;;  %v8340_v21 = vld [vmem:[#allocation20_spill] sm:$0xff] }
 0x506   : > { %v5975_v58 = vpop.eup %5974 }
 0x507   : > { %v2336_v37 = vmul.f32 %v5975_v58, %v7206_v12  ;;  %v5790_v30 = vpop.permute.xlu2 %5789  ;;  %v2283_v61 = vpop.xlane.xlu0 %2282 }
 0x508   : > { %v5792_v14 = vunpack.i.h.bf16 %v5790_v30  ;;  %5980 = vrcp.f32 %v2283_v61  ;;  %2926 = vrot.lane.b32.xlu1 %v8339_v63, %s6278_s29  ;;  %v2286_v18 = vpop.xlane.xlu1 %2285 }
 0x509   : > { %5489 = vmatmul.msk.f32.vlgmr.msra.gmra.mxu1 %vm573_vm1, %v2336_v37  ;;  %5982 = vpow2.f32 %v2259_v57 }
 0x50a   : > { %v7312_v60 = vpop.eup %5976  ;;  %2604 = vmatpush.msra.mxu1 %v5792_v14  ;;  %5984 = vpow2.f32 %v2263_v6 }
 0x50b   : > { %v2314_v5 = vsel %vm573_vm1, %v7312_v60, 0.0  ;;  %v5979_v41 = vpop.eup %5978 }
 0x50c   : > { %2315 = vadd.xlane.f32.xlu0 %v2314_v5  ;;  %v2339_v59 = vmul.f32 %v5979_v41, %v7201_v3 }
 0x50d   : > { %3148 = vrot.lane.b32.xlu2 %v8334_v36, %s6277_s20 }
 0x50e   : > { %v5981_v12 = vpop.eup %5980 }
 0x50f   : > { %v2337_v43 = vmul.f32 %v5981_v12, %v7213_v38  ;;  %v2217_v51 = vpop.xlane.xlu0 %2216  ;;  %v7321_v17 = vpop.eup %5982 }
 0x510   : > { %2924 = vrot.lane.b32.xlu1 %v8339_v63, %s6277_s20  ;;  %v2235_v10 = vsub.f32 %v7226_v4, %v2217_v51  ;;  %v2302_v24 = vsel %vm573_vm1, %v7321_v17, 0.0  ;;  %v7332_v38 = vpop.eup %5984  ;;  %v2292_v4 = vpop.xlane.xlu1 %2291 }
 0x511   : > { %5490 = vmatmul.msk.f32.vlgmr.msra.gmra.mxu2 %vm573_vm1, %v2337_v43  ;;  %5492 = vmatmul.msk.f32.vlgmr.msrb.gmra.mxu1 %vm573_vm1, %v2339_v59  ;;  %v2308_v20 = vsel %vm573_vm1, %v7332_v38, 0.0  ;;  %v5795_v47 = vpop.permute.xlu2 %5794  ;;  %v5791_v43 = vunpack.i.l.bf16 %v5790_v30 }
 0x512   : > { %v2265_v3 = vmul.f32 1.442695, %v2235_v10  ;;  %v5796_v51 = vunpack.i.l.bf16 %v5795_v47  ;;  %v5797_v10 = vunpack.i.h.bf16 %v5795_v47 }
 0x514   : > { %2303 = vadd.xlane.f32.xlu0 %v2302_v24  ;;  %5986 = vpow2.f32 %v2265_v3  ;;  %v2766_v24 = vld [vmem:[#allocation5 + $0x8] sm:$0xff] }
 0x515   : > { %3204 = vrot.lane.b32.xlu2 %v8335_v22, %s6277_s20  ;;  %5988 = vrcp.f32 %v2286_v18  ;;  %5654 = vmatpush.msra.mxu3 %v2766_v24 }
 0x516   : > { %5990 = vrcp.f32 %v2292_v4 }
 0x517   : > { %v2301_v61 = vpop.xlane.xlu0 %2300 }
 0x518   : > { %2982 = vrot.lane.b32.xlu1 %v6494_v28, %s6278_s29  ;;  %5992 = vrcp.f32 %v2301_v61 }
 0x51a   : > { %v7340_v58 = vpop.eup %5986 }
 0x51b   : > { %v2311_v57 = vsel %vm573_vm1, %v7340_v58, 0.0  ;;  %v5989_v37 = vpop.eup %5988 }
 0x51c   : > { %2309 = vadd.xlane.f32.xlu0 %v2308_v20  ;;  %v5991_v14 = vpop.eup %5990  ;;  %v2338_v6 = vmul.f32 %v5989_v37, %v7216_v7  ;;  %v5813_v37 = vpack.i.bf16 %v8336_v44, %v6494_v28 }
 0x51d   : > { %3318 = vrot.lane.b32.xlu2 %v8340_v21, %s6278_s29  ;;  %v2340_v59 = vmul.f32 %v5991_v14, %v7228_v31  ;;  %v8341_v31 = vld [vmem:[#allocation19_spill] sm:$0xff] }
 0x51e   : > { %v5993_v18 = vpop.eup %5992  ;;  %v5803_v30 = vpack.i.bf16 %v8340_v21, %v8341_v31 }
 0x51f   : > { %v2343_v7 = vmul.f32 %v5993_v18, %v7236_v54 }
 0x520   : > { %2980 = vrot.lane.b32.xlu1 %v6494_v28, %s6277_s20 }
 0x524   : > { %2312 = vadd.xlane.f32.xlu0 %v2311_v57 }
 0x525   : > { %3008 = vrot.lane.b32.xlu2 %v6526_v46, %s6277_s20 }
 0x527   : > { %v5785_v5 = vpop.permute.xlu1 %5784 }
 0x528   : > { %v5787_v41 = vunpack.i.h.bf16 %v5785_v5  ;;  %v5786_v12 = vunpack.i.l.bf16 %v5785_v5  ;;  %3036 = vrot.lane.b32.xlu1 %v8336_v44, %s6277_s20 }
 0x52a   : > { %2500 = vmatpush.msra.mxu0 %v5787_v41  ;;  %2552 = vmatpush.msrb.mxu2 %v5786_v12 }
 0x52b   : > { %5491 = vmatmul.msk.f32.vlgmr.msra.gmra.mxu0 %vm573_vm1, %v2338_v6  ;;  %5493 = vmatmul.msk.f32.vlgmr.msrb.gmra.mxu2 %vm573_vm1, %v2340_v59 }
 0x52c   : > { %2578 = vmatpush.msrb.mxu0 %v5791_v43  ;;  %2630 = vmatpush.msra.mxu2 %v5796_v51 }
 0x52d   : > { %3260 = vrot.lane.b32.xlu2 %v6536_v48, %s6277_s20 }
 0x52e   : > { %2656 = vmatpush.msra.mxu0 %v5797_v10 }
 0x530   : > { %3150 = vrot.lane.b32.xlu1 %v8334_v36, %s6278_s29 }
 0x533   : > { %5496 = vmatmul.msk.f32.vlgmr.msra.gmra.mxu2 %vm573_vm1, %v2343_v7 }
 0x538   : > { %3206 = vrot.lane.b32.xlu1 %v8335_v22, %s6278_s29  ;;  %5804 = vrot.lane.b32.xlu0 %v5803_v30, %s6276_s15  ;;  %s5267_s15 = sshll.u32 %s8165_s7, 4  ;;  %s5268_s15 = int_to_ptr.vmem [resolvable:$true] %s5267_s15 }
 0x540   : > { %3232 = vrot.lane.b32.xlu1 %v8338_v50, %s6277_s20  ;;  %2954 = vrot.lane.b32.xlu0 %v6490_v26, %s6278_s29 }
 0x548   : > { %v2295_v3 = vpop.xlane.xlu2 %2294  ;;  %3288 = vrot.lane.b32.xlu1 %v8341_v31, %s6277_s20  ;;  %2952 = vrot.lane.b32.xlu0 %v6490_v26, %s6277_s20 }
 0x549   : > { %5994 = vrcp.f32 %v2295_v3 }
 0x54f   : > { %v5995_v54 = vpop.eup %5994 }
 0x550   : > { %v2341_v20 = vmul.f32 %v5995_v54, %v7264_v19  ;;  %v2307_v4 = vpop.xlane.xlu2 %2306  ;;  %3092 = vrot.lane.b32.xlu1 %v6547_v53, %s6277_s20  ;;  %3038 = vrot.lane.b32.xlu0 %v8336_v44, %s6278_s29 }
 0x552   : > { %v2298_v57 = vpop.xlane.xlu1 %2297  ;;  %5494 = vmatmul.msk.f32.vlgmr.msrb.gmra.mxu0 %vm573_vm1, %v2341_v20 }
 0x553   : > { %5996 = vrcp.f32 %v2298_v57 }
 0x554   : > { %5998 = vrcp.f32 %v2307_v4 }
 0x558   : > { %v7381_v61 = vpop.permute.xlu2 %2896  ;;  %5814 = vrot.lane.b32.xlu1 %v5813_v37, %s6279_s30  ;;  %3064 = vrot.lane.b32.xlu0 %v6502_v33, %s6277_s20 }
 0x559   : > { %v5997_v19 = vpop.eup %5996 }
 0x55a   : > { %v2342_v14 = vmul.f32 %v5997_v19, %v7272_v40  ;;  %v5999_v5 = vpop.eup %5998 }
 0x55b   : > { %v2345_v59 = vmul.f32 %v5999_v5, %v7270_v49 }
 0x55c   : > { %5495 = vmatmul.msk.f32.vlgmr.msra.gmra.mxu1 %vm573_vm1, %v2342_v14 }
 0x560   : > { %v3067_v47 = vpop.permute.xlu2 %3066  ;;  %3120 = vrot.lane.b32.xlu0 %v8333_v39, %s6277_s20 }
 0x561   : > { %5530 = vmatpush.xpose.msk.msrb.mxu3 %vm573_vm1, %v3067_v47 }
 0x568   : > { %3234 = vrot.lane.b32.xlu0 %v8338_v50, %s6278_s29 }
 0x56a   : > { %v5800_v41 = vpop.permute.xlu1 %5799 }
 0x56b   : > { %v5802_v12 = vunpack.i.h.bf16 %v5800_v41  ;;  %v5801_v6 = vunpack.i.l.bf16 %v5800_v41 }
 0x56d   : > { %2682 = vmatpush.msrb.mxu1 %v5801_v6  ;;  %2708 = vmatpush.msrb.mxu2 %v5802_v12 }
 0x56e   : > { %5498 = vmatmul.msk.f32.vlgmr.msrb.gmra.mxu1 %vm573_vm1, %v2345_v59 }
 0x56f   : > { %2830 = vmatpush.msra.mxu2 %v2766_v24 }
 0x570   : > { %3290 = vrot.lane.b32.xlu0 %v8341_v31, %s6278_s29 }
 0x572   : > { %v2899_v40 = vpop.permute.xlu1 %2898 }
 0x576   : > { %v2372_v51 = vpop.f32.mrf.mxu1 }
 0x578   : > { %3316 = vrot.lane.b32.xlu0 %v8340_v21, %s6277_s20 }
 0x57a   : > { %v2927_v43 = vpop.permute.xlu1 %2926 }
 0x57f   : > { %v2316_v10 = vpop.xlane.xlu0 %2315 }
 0x580   : > { %3010 = vrot.lane.b32.xlu0 %v6526_v46, %s6278_s29 }
 0x582   : > { %v2925_v18 = vpop.permute.xlu1 %2924 }
 0x586   : > { %v2450_v49 = vpop.f32.mrf.mxu1 }
 0x587   : > { %v2304_v7 = vpop.xlane.xlu0 %2303 }
 0x588   : > { %6000 = vrcp.f32 %v2304_v7  ;;  %3094 = vrot.lane.b32.xlu0 %v6547_v53, %s6278_s29 }
 0x58a   : > { %v2983_v30 = vpop.permute.xlu1 %2982 }
 0x58e   : > { %v6001_v24 = vpop.eup %6000  ;;  %v2528_v3 = vpop.f32.mrf.mxu1 }
 0x58f   : > { %v2344_v54 = vmul.f32 %v6001_v24, %v7321_v17  ;;  %v2310_v20 = vpop.xlane.xlu0 %2309  ;;  %5508 = vmatmul.msk.f32.vlgmr.msra.gmra.mxu3 %vm573_vm1, %v2528_v3  ;;  %v2398_v17 = vpop.f32.mrf.mxu2 }
 0x590   : > { %6002 = vrcp.f32 %v2310_v20  ;;  %3178 = vrot.lane.b32.xlu0 %v6518_v42, %s6278_s29  ;;  %v2424_v3 = vpop.f32.mrf.mxu0 }
 0x591   : > { %5497 = vmatmul.msk.f32.vlgmr.msra.gmra.mxu0 %vm573_vm1, %v2344_v54  ;;  %6004 = vrcp.f32 %v2316_v10 }
 0x592   : > { %v2981_v4 = vpop.permute.xlu1 %2980 }
 0x596   : > { %v6003_v57 = vpop.eup %6002 }
 0x597   : > { %v2346_v37 = vmul.f32 %v6003_v57, %v7332_v38  ;;  %v2313_v14 = vpop.xlane.xlu0 %2312  ;;  %v2476_v5 = vpop.f32.mrf.mxu2  ;;  %v5808_v38 = vpack.i.bf16 %v6490_v26, %v8337_v16 }
 0x598   : > { %3176 = vrot.lane.b32.xlu0 %v6518_v42, %s6277_s20  ;;  %6006 = vrcp.f32 %v2313_v14  ;;  %v6005_v41 = vpop.eup %6004  ;;  %s5269_s20 = sshll.u32 %s5266_s27, 4  ;;  %s5270_s20 = int_to_ptr.hbm [resolvable:$true] %s5269_s20 }
 0x599   : > { %5499 = vmatmul.msk.f32.vlgmr.msrb.gmra.mxu2 %vm573_vm1, %v2346_v37 }
 0x59a   : > { %v3037_v19 = vpop.permute.xlu1 %3036 }
 0x59e   : > { %v6007_v12 = vpop.eup %6006 }
 0x59f   : > { %v2347_v10 = vmul.f32 %v6007_v12, %v7340_v58 }
 0x5a0   : > { %3262 = vrot.lane.b32.xlu0 %v6536_v48, %s6278_s29  ;;  %s6210_s29 = sshra.s32 %s5270_s20, 4  ;;  %s6211_s29 = int_to_ptr.hbm [resolvable:$true] %s6210_s29 }
 0x5a1   : > { %5502 = vmatmul.msk.f32.vlgmr.msra.gmra.mxu2 %vm573_vm1, %v2372_v51  ;;  %v2348_v51 = vmul.f32 %v6005_v41, %v7312_v60  ;;  %p6217_p9 = scmp.lt.s32.totalorder %s6211_s29, %s8283_s6 }
 0x5a2   : > { %v3151_v47 = vpop.permute.xlu1 %3150 }
 0x5a3   : > { %5536 = vmatpush.xpose.msk.msra.mxu3 %vm573_vm1, %v3151_v47 }
 0x5a8   : > { %5809 = vrot.lane.b32.xlu0 %v5808_v38, %s6279_s30 }
 0x5a9   : > { %5503 = vmatmul.msk.f32.gmra.mxu2 %vm573_vm1, %v2398_v17 }
 0x5aa   : > { %v5805_v6 = vpop.permute.xlu0 %5804 }
 0x5ab   : > { %v5807_v59 = vunpack.i.h.bf16 %v5805_v6  ;;  %v5806_v7 = vunpack.i.l.bf16 %v5805_v6 }
 0x5ad   : > { %2734 = vmatpush.msrb.mxu0 %v5806_v7  ;;  %2760 = vmatpush.msra.mxu1 %v5807_v59  ;;  %v7460_v59 = vpop.f32.mrf.mxu3 }
 0x5ae   : > { %v2554_v24 = vpop.f32.mrf.mxu2  ;;  %5500 = vmatmul.msk.f32.vlgmr.msrb.gmra.mxu0 %vm573_vm1, %v2347_v10  ;;  %5501 = vmatmul.msk.f32.vlgmr.msra.gmra.mxu1 %vm573_vm1, %v2348_v51 }
 0x5af   : > { %5518 = vmatpush.xpose.msk.msra.mxu0 %vm573_vm1, %v2899_v40  ;;  %5520 = vmatpush.xpose.msk.msrb.mxu1 %vm573_vm1, %v2927_v43  ;;  %v3123_v43 = vpop.permute.xlu2 %3122 }
 0x5b0   : > { %5509 = vmatmul.msk.f32.gmra.mxu3 %vm573_vm1, %v2554_v24 }
 0x5b1   : > { %5504 = vmatmul.msk.f32.gmra.mxu2 %vm573_vm1, %v2424_v3 }
 0x5b2   : > { %v2955_v60 = vpop.permute.xlu0 %2954 }
 0x5b3   : > { %5524 = vmatpush.xpose.msk.msra.mxu1 %vm573_vm1, %v2983_v30  ;;  %5522 = vmatpush.xpose.msk.msrb.mxu0 %vm573_vm1, %v2955_v60  ;;  %v3207_v30 = vpop.permute.xlu1 %3206 }
 0x5b5   : > { %v7464_v10 = vpop.f32.mrf.mxu3 }
 0x5b6   : > { %5519 = vmatmul.msk.f32.vlgmr.msra.gmra.mxu0 %vm573_vm1, %v7381_v61  ;;  %5521 = vmatmul.msk.f32.vlgmr.msrb.gmra.mxu1 %vm573_vm1, %v2925_v18  ;;  %v2502_v61 = vpop.f32.mrf.mxu0  ;;  %v2632_v17 = vpop.f32.mrf.mxu2 }
 0x5b7   : > { %v7444_v54 = vpop.permute.xlu2 %3148 }
 0x5b9   : > { %5505 = vmatmul.msk.f32.gmra.mxu2 %vm573_vm1, %v2450_v49 }
 0x5ba   : > { %v2953_v58 = vpop.permute.xlu0 %2952 }
 0x5bd   : > { %v7468_v60 = vpop.f32.mrf.mxu3 }
 0x5be   : > { %5523 = vmatmul.msk.f32.vlgmr.msrb.gmra.mxu0 %vm573_vm1, %v2953_v58  ;;  %5525 = vmatmul.msk.f32.vlgmr.msra.gmra.mxu1 %vm573_vm1, %v2981_v4 }
 0x5bf   : > { %v3205_v57 = vpop.permute.xlu2 %3204 }
 0x5c1   : > { %5506 = vmatmul.msk.f32.gmra.mxu2 %vm573_vm1, %v2476_v5 }
 0x5c2   : > { %v3039_v40 = vpop.permute.xlu0 %3038 }
 0x5c3   : > { %5528 = vmatpush.xpose.msk.msrb.mxu1 %vm573_vm1, %v3039_v40 }
 0x5c6   : > { %5529 = vmatmul.msk.f32.vlgmr.msrb.gmra.mxu1 %vm573_vm1, %v3037_v19  ;;  %v7449_v19 = vpop.permute.xlu1 %3232 }
 0x5c7   : > { %5534 = vmatpush.xpose.msk.msra.mxu1 %vm573_vm1, %v3123_v43  ;;  %v3319_v38 = vpop.permute.xlu2 %3318 }
 0x5c9   : > { %5507 = vmatmul.msk.f32.gmra.mxu2 %vm573_vm1, %v2502_v61 }
 0x5ca   : > { %v7442_v18 = vpop.permute.xlu0 %3064 }
 0x5cb   : > { %5540 = vmatpush.xpose.msk.msrb.mxu1 %vm573_vm1, %v3207_v30  ;;  %v7473_v30 = vpop.f32.mrf.mxu3 }
 0x5cc   : > { %8342 = vst [vmem:[#allocation21_spill] sm:$0xff] %v7473_v30 }
 0x5ce   : > { %v3289_v47 = vpop.permute.xlu1 %3288 }
 0x5cf   : > { %v2580_v49 = vpop.f32.mrf.mxu0  ;;  %v3009_v12 = vpop.permute.xlu2 %3008 }
 0x5d0   : > { %5510 = vmatmul.msk.f32.gmra.mxu3 %vm573_vm1, %v2580_v49 }
 0x5d2   : > { %v3121_v20 = vpop.permute.xlu0 %3120 }
 0x5d3   : > { %5535 = vmatmul.msk.f32.vlgmr.msra.gmra.mxu1 %vm573_vm1, %v3121_v20 }
 0x5d6   : > { %v3093_v7 = vpop.permute.xlu1 %3092 }
 0x5d7   : > { %v3261_v40 = vpop.permute.xlu2 %3260 }
 0x5d9   : > { %v2606_v4 = vpop.f32.mrf.mxu1 }
 0x5da   : > { %v3235_v37 = vpop.permute.xlu0 %3234  ;;  %5511 = vmatmul.msk.f32.gmra.mxu3 %vm573_vm1, %v2606_v4 }
 0x5db   : > { %5541 = vmatmul.msk.f32.vlgmr.msrb.gmra.mxu1 %vm573_vm1, %v3205_v57 }
 0x5de   : > { %v5815_v61 = vpop.permute.xlu1 %5814 }
 0x5df   : > { %v5816_v4 = vunpack.i.l.bf16 %v5815_v61 }
 0x5e2   : > { %v3291_v14 = vpop.permute.xlu0 %3290  ;;  %5512 = vmatmul.msk.f32.gmra.mxu3 %vm573_vm1, %v2632_v17  ;;  %v7476_v17 = vpop.f32.mrf.mxu3 }
 0x5e3   : > { %5546 = vmatpush.xpose.msk.msra.mxu1 %vm573_vm1, %v3291_v14  ;;  %8343 = vst [vmem:[#allocation14_spill] sm:$0xff] %v7476_v17 }
 0x5e6   : > { %5547 = vmatmul.msk.f32.vlgmr.msra.gmra.mxu1 %vm573_vm1, %v3289_v47 }
 0x5ea   : > { %v7455_v5 = vpop.permute.xlu0 %3316 }
 0x5eb   : > { %v2684_v43 = vpop.f32.mrf.mxu1 }
 0x5f2   : > { %v3011_v41 = vpop.permute.xlu0 %3010 }
 0x5f3   : > { %5526 = vmatpush.xpose.msk.msra.mxu0 %vm573_vm1, %v3011_v41  ;;  %v7478_v41 = vpop.f32.mrf.mxu3 }
 0x5f4   : > { %8344 = vst [vmem:[#allocation15_spill] sm:$0xff] %v7478_v41 }
 0x5f6   : > { %5527 = vmatmul.msk.f32.vlgmr.msra.gmra.mxu0 %vm573_vm1, %v3009_v12 }
 0x5fa   : > { %v3095_v6 = vpop.permute.xlu0 %3094 }
 0x5fb   : > { %5532 = vmatpush.xpose.msk.msrb.mxu0 %vm573_vm1, %v3095_v6  ;;  %v7481_v6 = vpop.f32.mrf.mxu3 }
 0x5fc   : > { %8345 = vst [vmem:[#allocation16_spill] sm:$0xff] %v7481_v6 }
 0x5fe   : > { %5533 = vmatmul.msk.f32.vlgmr.msrb.gmra.mxu0 %vm573_vm1, %v3093_v7 }
 0x602   : > { %v3179_v51 = vpop.permute.xlu0 %3178 }
 0x603   : > { %5538 = vmatpush.xpose.msk.msra.mxu0 %vm573_vm1, %v3179_v51 }
 0x60a   : > { %v3177_v24 = vpop.permute.xlu0 %3176 }
 0x60b   : > { %5539 = vmatmul.msk.f32.vlgmr.msra.gmra.mxu0 %vm573_vm1, %v3177_v24 }
 0x60e   : > { %v2658_v3 = vpop.f32.mrf.mxu0 }
 0x60f   : > { %5513 = vmatmul.msk.f32.gmra.mxu3 %vm573_vm1, %v2658_v3 }
 0x612   : > { %v3263_v58 = vpop.permute.xlu0 %3262 }
 0x613   : > { %5544 = vmatpush.xpose.msk.msrb.mxu0 %vm573_vm1, %v3263_v58 }
 0x616   : > { %5545 = vmatmul.msk.f32.vlgmr.msrb.gmra.mxu0 %vm573_vm1, %v3261_v40 }
 0x617   : > { %5514 = vmatmul.msk.f32.gmra.mxu3 %vm573_vm1, %v2684_v43 }
 0x61a   : > { %v5810_v49 = vpop.permute.xlu0 %5809 }
 0x61b   : > { %v5811_v20 = vunpack.i.l.bf16 %v5810_v49 }
 0x61c   : > { %v2710_v57 = vpop.f32.mrf.mxu2 }
 0x61d   : > { %3541 = vmatpush.msra.mxu0 %v5811_v20  ;;  %v7493_v20 = vpop.f32.mrf.mxu3 }
 0x61e   : > { %8346 = vst [vmem:[#allocation13_spill] sm:$0xff] %v7493_v20 }
 0x61f   : > { %3619 = vmatpush.msrb.mxu0 %v5816_v4  ;;  %5515 = vmatmul.msk.f32.gmra.mxu3 %vm573_vm1, %v2710_v57 }
 0x62b   : > { %v2736_v14 = vpop.f32.mrf.mxu0  ;;  %v2762_v47 = vpop.f32.mrf.mxu1 }
 0x62c   : > { %5516 = vmatmul.msk.f32.gmra.mxu3 %vm573_vm1, %v2736_v14 }
 0x633   : > { %v2921_v12 = vpop.f32.mrf.mxu0  ;;  %v7484_v51 = vpop.f32.mrf.mxu1 }
 0x634   : > { %v2922_v7 = vadd.f32 %v2921_v12, %v6640_v32  ;;  %5517 = vmatmul.msk.f32.gmra.mxu3 %vm573_vm1, %v2762_v47  ;;  %v7502_v12 = vpop.f32.mrf.mxu3 }
 0x635   : > { %8347 = vst [vmem:[#allocation11_spill] sm:$0xff] %v7502_v12 }
 0x636   : > { %v3344_v24 = vsel %vm573_vm1, %v2922_v7, -inf }
 0x637   : > { %3345 = vmax.xlane.f32.xlu2 %v3344_v24 }
 0x63b   : > { %v2977_v3 = vpop.f32.mrf.mxu0  ;;  %v3005_v40 = vpop.f32.mrf.mxu1 }
 0x63c   : > { %v2978_v58 = vadd.f32 %v2977_v3, %v6667_v2  ;;  %5531 = vmatmul.msk.f32.vlgmr.msrb.gmra.mxu3 %vm573_vm1, %v7442_v18  ;;  %v3006_v43 = vadd.f32 %v3005_v40, %v6675_v11  ;;  %v7507_v40 = vpop.f32.mrf.mxu3 }
 0x63d   : > { %5542 = vmatpush.xpose.msk.msrb.mxu3 %vm573_vm1, %v3235_v37  ;;  %v5812_v37 = vunpack.i.h.bf16 %v5810_v49  ;;  %8348 = vst [vmem:[#allocation17_spill] sm:$0xff] %v7507_v40 }
 0x63e   : > { %v3350_v4 = vsel %vm573_vm1, %v2978_v58, -inf  ;;  %v3353_v57 = vsel %vm573_vm1, %v3006_v43, -inf }
 0x63f   : > { %3351 = vmax.xlane.f32.xlu1 %v3350_v4  ;;  %3354 = vmax.xlane.f32.xlu0 %v3353_v57 }
 0x643   : > { %v3061_v14 = vpop.f32.mrf.mxu1 }
 0x644   : > { %5537 = vmatmul.msk.f32.vlgmr.msra.gmra.mxu3 %vm573_vm1, %v7444_v54  ;;  %v3062_v47 = vadd.f32 %v3061_v14, %v6683_v15  ;;  %v5817_v54 = vunpack.i.h.bf16 %v5815_v61 }
 0x645   : > { %5548 = vmatpush.xpose.msk.msra.mxu3 %vm573_vm1, %v3319_v38 }
 0x646   : > { %v3359_v18 = vsel %vm573_vm1, %v3062_v47, -inf }
 0x647   : > { %3360 = vmax.xlane.f32.xlu2 %v3359_v18 }
 0x64c   : > { %5543 = vmatmul.msk.f32.vlgmr.msrb.gmra.mxu3 %vm573_vm1, %v7449_v19  ;;  %v7514_v19 = vpop.f32.mrf.mxu3 }
 0x64d   : > { %3593 = vmatpush.msrb.mxu3 %v5812_v37  ;;  %8349 = vst [vmem:[#allocation12_spill] sm:$0xff] %v7514_v19 }
 0x650   : > { %v3145_v24 = vpop.f32.mrf.mxu1 }
 0x651   : > { %v3146_v3 = vadd.f32 %v3145_v24, %v6705_v62 }
 0x653   : > { %v3368_v4 = vsel %vm573_vm1, %v3146_v3, -inf }
 0x654   : > { %3369 = vmax.xlane.f32.xlu0 %v3368_v4  ;;  %5549 = vmatmul.msk.f32.vlgmr.msra.gmra.mxu3 %vm573_vm1, %v7455_v5  ;;  %v7519_v61 = vpop.f32.mrf.mxu3 }
 0x655   : > { %3671 = vmatpush.msra.mxu3 %v5817_v54  ;;  %8350 = vst [vmem:[#allocation20_spill] sm:$0xff] %v7519_v61 }
 0x658   : > { %v3229_v38 = vpop.f32.mrf.mxu1 }
 0x659   : > { %v3230_v49 = vadd.f32 %v3229_v38, %v6723_v13 }
 0x65b   : > { %v3377_v57 = vsel %vm573_vm1, %v3230_v49, -inf }
 0x65c   : > { %3378 = vmax.xlane.f32.xlu1 %v3377_v57  ;;  %v7523_v5 = vpop.f32.mrf.mxu3 }
 0x663   : > { %v3313_v14 = vpop.f32.mrf.mxu1 }
 0x664   : > { %v7517_v18 = vadd.f32 %v3313_v14, %v8332_v8  ;;  %v7525_v24 = vpop.f32.mrf.mxu3 }
 0x665   : > { %8351 = vst [vmem:[#allocation19_spill] sm:$0xff] %v7525_v24 }
 0x666   : > { %v3386_v37 = vsel %vm573_vm1, %v7517_v18, -inf }
 0x667   : > { %3387 = vmax.xlane.f32.xlu1 %v3386_v37 }
 0x66c   : > { %v7527_v54 = vpop.f32.mrf.mxu3 }
 0x66d   : > { %8352 = vst [vmem:[#allocation27_spill] sm:$0xff] %v7527_v54 }
 0x674   : > { %v7529_v4 = vpop.f32.mrf.mxu3 }
 0x675   : > { %8353 = vst [vmem:[#allocation28_spill] sm:$0xff] %v7529_v4 }
 0x67c   : > { %v7531_v38 = vpop.f32.mrf.mxu3 }
 0x67d   : > { %8354 = vst [vmem:[#allocation29_spill] sm:$0xff] %v7531_v38 }
 0x692   : > { %v7533_v57 = vpop.f32.mrf.mxu3 }
 0x693   : > { %8355 = vst [vmem:[#allocation30_spill] sm:$0xff] %v7533_v57 }
 0x69a   : > { %v7535_v14 = vpop.f32.mrf.mxu3 }
 0x69b   : > { %8356 = vst [vmem:[#allocation31_spill] sm:$0xff] %v7535_v14 }
 0x6a2   : > { %v7537_v40 = vpop.f32.mrf.mxu3 }
 0x6a3   : > { %8357 = vst [vmem:[#allocation32_spill] sm:$0xff] %v7537_v40 }
 0x6aa   : > { %v3346_v19 = vpop.xlane.xlu2 %3345 }
 0x6ab   : > { %v3392_v61 = vsub.f32 %v2922_v7, %v3346_v19 }
 0x6ad   : > { %v3408_v12 = vmul.f32 1.442695, %v3392_v61 }
 0x6af   : > { %6008 = vpow2.f32 %v3408_v12  ;;  %v7539_v41 = vpop.f32.mrf.mxu3 }
 0x6b0   : > { %8358 = vst [vmem:[#allocation33_spill] sm:$0xff] %v7539_v41 }
 0x6b2   : > { %v3352_v37 = vpop.xlane.xlu1 %3351  ;;  %v3355_v20 = vpop.xlane.xlu0 %3354 }
 0x6b3   : > { %v3394_v6 = vsub.f32 %v2978_v58, %v3352_v37  ;;  %v3395_v54 = vsub.f32 %v3006_v43, %v3355_v20 }
 0x6b5   : > { %v7541_v17 = vpop.eup %6008  ;;  %v3412_v4 = vmul.f32 1.442695, %v3394_v6  ;;  %v3414_v38 = vmul.f32 1.442695, %v3395_v54 }
 0x6b6   : > { %v3440_v57 = vsel %vm573_vm1, %v7541_v17, 0.0 }
 0x6b7   : > { %6010 = vpow2.f32 %v3412_v4  ;;  %3441 = vadd.xlane.f32.xlu1 %v3440_v57  ;;  %v7549_v58 = vpop.f32.mrf.mxu3 }
 0x6b8   : > { %6012 = vpow2.f32 %v3414_v38  ;;  %8359 = vst [vmem:[#allocation34_spill] sm:$0xff] %v7549_v58 }
 0x6ba   : > { %v3361_v7 = vpop.xlane.xlu2 %3360 }
 0x6bb   : > { %v3397_v19 = vsub.f32 %v3062_v47, %v3361_v7 }
 0x6bd   : > { %v7545_v61 = vpop.eup %6010  ;;  %v3418_v37 = vmul.f32 1.442695, %v3397_v19 }
 0x6be   : > { %v7547_v12 = vpop.eup %6012  ;;  %v3446_v43 = vsel %vm573_vm1, %v7545_v61, 0.0 }
 0x6bf   : > { %3447 = vadd.xlane.f32.xlu0 %v3446_v43  ;;  %v3449_v6 = vsel %vm573_vm1, %v7547_v12, 0.0  ;;  %6014 = vpow2.f32 %v3418_v37  ;;  %v3089_v4 = vpop.f32.mrf.mxu3  ;;  %v5828_v43 = vpack.i.bf16 %v8341_v31, %v8338_v50 }
 0x6c0   : > { %3450 = vadd.xlane.f32.xlu1 %v3449_v6 }
 0x6c5   : > { %v7555_v20 = vpop.eup %6014 }
 0x6c6   : > { %v3455_v47 = vsel %vm573_vm1, %v7555_v20, 0.0 }
 0x6c7   : > { %v3370_v54 = vpop.xlane.xlu0 %3369  ;;  %3456 = vadd.xlane.f32.xlu2 %v3455_v47  ;;  %v3173_v37 = vpop.f32.mrf.mxu3 }
 0x6c8   : > { %v3400_v38 = vsub.f32 %v3146_v3, %v3370_v54  ;;  %v7567_v3 = vadd.f32 %v3089_v4, %v6696_v35 }
 0x6ca   : > { %v3424_v57 = vmul.f32 1.442695, %v3400_v38  ;;  %v3362_v47 = vsel %vm573_vm1, %v7567_v3, -inf }
 0x6cc   : > { %6016 = vpow2.f32 %v3424_v57 }
 0x6cf   : > { %v3379_v7 = vpop.xlane.xlu1 %3378  ;;  %v3257_v38 = vpop.f32.mrf.mxu3 }
 0x6d0   : > { %v3403_v19 = vsub.f32 %v3230_v49, %v3379_v7  ;;  %v7581_v4 = vadd.f32 %v3257_v38, %v6736_v34 }
 0x6d2   : > { %v7561_v58 = vpop.eup %6016  ;;  %v3430_v6 = vmul.f32 1.442695, %v3403_v19  ;;  %v3380_v7 = vsel %vm573_vm1, %v7581_v4, -inf  ;;  %v5823_v19 = vpack.i.bf16 %v8335_v22, %v8334_v36 }
 0x6d3   : > { %5829 = vrot.lane.b32.xlu0 %v5828_v43, %s6279_s30  ;;  %v3464_v41 = vsel %vm573_vm1, %v7561_v58, 0.0  ;;  %v5818_v43 = vpack.i.bf16 %v8333_v39, %v6502_v33 }
 0x6d4   : > { %6018 = vpow2.f32 %v3430_v6  ;;  %3465 = vadd.xlane.f32.xlu1 %v3464_v41  ;;  %v7578_v41 = vadd.f32 %v3173_v37, %v6708_v0  ;;  %v5833_v37 = vpack.i.bf16 %v8339_v63, %v8340_v21 }
 0x6d6   : > { %v3371_v57 = vsel %vm573_vm1, %v7578_v41, -inf }
 0x6da   : > { %v7569_v54 = vpop.eup %6018  ;;  %v3388_v6 = vpop.xlane.xlu1 %3387 }
 0x6db   : > { %4067 = vrot.lane.b32.xlu0 %v8337_v16, %s6280_s18  ;;  %v3473_v49 = vsel %vm573_vm1, %v7569_v54, 0.0 }
 0x6dc   : > { %3474 = vadd.xlane.f32.xlu2 %v3473_v49  ;;  %3363 = vmax.xlane.f32.xlu1 %v3362_v47  ;;  %v3406_v49 = vsub.f32 %v7517_v18, %v3388_v6 }
 0x6de   : > { %v3436_v47 = vmul.f32 1.442695, %v3406_v49 }
 0x6e0   : > { %6020 = vpow2.f32 %v3436_v47 }
 0x6e3   : > { %4095 = vrot.lane.b32.xlu0 %v8339_v63, %s6280_s18 }
 0x6e4   : > { %3372 = vmax.xlane.f32.xlu2 %v3371_v57  ;;  %3381 = vmax.xlane.f32.xlu1 %v3380_v7 }
 0x6eb   : > { %4181 = vrot.lane.b32.xlu0 %v6526_v46, %s6281_s9 }
 0x6f3   : > { %4153 = vrot.lane.b32.xlu0 %v6494_v28, %s6281_s9 }
 0x6fb   : > { %4207 = vrot.lane.b32.xlu0 %v8336_v44, %s6280_s18 }
 0x6fc   : > { %5824 = vrot.lane.b32.xlu2 %v5823_v19, %s6279_s30 }
 0x6fd   : > { %5819 = vrot.lane.b32.xlu1 %v5818_v43, %s6279_s30  ;;  %v3341_v43 = vpop.f32.mrf.mxu3 }
 0x703   : > { %4265 = vrot.lane.b32.xlu0 %v6547_v53, %s6281_s9 }
 0x704   : > { %4069 = vrot.lane.b32.xlu2 %v8337_v16, %s6281_s9  ;;  %v7617_v16 = vpop.eup %6020 }
 0x705   : > { %v3482_v38 = vsel %vm573_vm1, %v7617_v16, 0.0 }
 0x70b   : > { %4291 = vrot.lane.b32.xlu0 %v8333_v39, %s6280_s18 }
 0x70c   : > { %5834 = vrot.lane.b32.xlu2 %v5833_v37, %s6279_s30  ;;  %v7626_v37 = vadd.f32 %v3341_v43, %v6761_v27 }
 0x713   : > { %4349 = vrot.lane.b32.xlu0 %v6518_v42, %s6281_s9 }
 0x714   : > { %4097 = vrot.lane.b32.xlu2 %v8339_v63, %s6281_s9 }
 0x71b   : > { %4375 = vrot.lane.b32.xlu0 %v8335_v22, %s6280_s18 }
 0x723   : > { %4433 = vrot.lane.b32.xlu0 %v6536_v48, %s6281_s9 }
 0x727   : > { %3483 = vadd.xlane.f32.xlu1 %v3482_v38 }
 0x72a   : > { %v3442_v57 = vpop.xlane.xlu1 %3441 }
 0x72b   : > { %6022 = vrcp.f32 %v3442_v57 }
 0x731   : > { %v6023_v7 = vpop.eup %6022 }
 0x732   : > { %v3504_v63 = vmul.f32 %v6023_v7, %v7541_v17  ;;  %v3448_v18 = vpop.xlane.xlu0 %3447  ;;  %v3389_v17 = vsel %vm573_vm1, %v7626_v37, -inf }
 0x733   : > { %6024 = vrcp.f32 %v3448_v18  ;;  %v3451_v19 = vpop.xlane.xlu1 %3450 }
 0x734   : > { %6026 = vrcp.f32 %v3451_v19  ;;  %5550 = vmatmul.msk.f32.vlgmr.msra.gmra.mxu0 %vm573_vm1, %v3504_v63 }
 0x739   : > { %v6025_v6 = vpop.eup %6024 }
 0x73a   : > { %v6027_v49 = vpop.eup %6026  ;;  %v3506_v47 = vmul.f32 %v6025_v6, %v7545_v61  ;;  %v3457_v57 = vpop.xlane.xlu2 %3456 }
 0x73b   : > { %v3507_v38 = vmul.f32 %v6027_v49, %v7547_v12  ;;  %6028 = vrcp.f32 %v3457_v57 }
 0x73c   : > { %5552 = vmatmul.msk.f32.vlgmr.msrb.gmra.mxu3 %vm573_vm1, %v3506_v47 }
 0x73d   : > { %5553 = vmatmul.msk.f32.vlgmr.msrb.gmra.mxu0 %vm573_vm1, %v3507_v38  ;;  %3390 = vmax.xlane.f32.xlu2 %v3389_v17 }
 0x741   : > { %v6029_v7 = vpop.eup %6028 }
 0x742   : > { %v3509_v63 = vmul.f32 %v6029_v7, %v7555_v20 }
 0x744   : > { %5555 = vmatmul.msk.f32.vlgmr.msra.gmra.mxu3 %vm573_vm1, %v3509_v63 }
 0x745   : > { %v7652_v63 = vpop.permute.xlu0 %5829 }
 0x747   : > { %v3466_v18 = vpop.xlane.xlu1 %3465 }
 0x74d   : > { %v4068_v40 = vpop.permute.xlu0 %4067 }
 0x74f   : > { %v3475_v19 = vpop.xlane.xlu2 %3474  ;;  %v3364_v61 = vpop.xlane.xlu1 %3363 }
 0x750   : > { %v3398_v12 = vsub.f32 %v7567_v3, %v3364_v61 }
 0x752   : > { %v3420_v43 = vmul.f32 1.442695, %v3398_v12 }
 0x754   : > { %6030 = vpow2.f32 %v3420_v43 }
 0x755   : > { %4123 = vrot.lane.b32.xlu2 %v6490_v26, %s6280_s18 }
 0x757   : > { %v3373_v6 = vpop.xlane.xlu2 %3372 }
 0x758   : > { %v3401_v49 = vsub.f32 %v7578_v41, %v3373_v6  ;;  %v3382_v41 = vpop.xlane.xlu1 %3381 }
 0x75a   : > { %v7640_v47 = vpop.eup %6030  ;;  %v3426_v38 = vmul.f32 1.442695, %v3401_v49 }
 0x75b   : > { %v3458_v20 = vsel %vm573_vm1, %v7640_v47, 0.0 }
 0x75c   : > { %6032 = vpow2.f32 %v3426_v38  ;;  %3459 = vadd.xlane.f32.xlu1 %v3458_v20 }
 0x75d   : > { %4179 = vrot.lane.b32.xlu2 %v6526_v46, %s6280_s18  ;;  %6034 = vrcp.f32 %v3466_v18 }
 0x75e   : > { %6036 = vrcp.f32 %v3475_v19 }
 0x75f   : > { %v5825_v3 = vpop.permute.xlu2 %5824 }
 0x760   : > { %v5826_v20 = vunpack.i.l.bf16 %v5825_v3  ;;  %v5827_v18 = vunpack.i.h.bf16 %v5825_v3  ;;  %v7673_v3 = vpop.permute.xlu0 %4095 }
 0x762   : > { %v7646_v57 = vpop.eup %6032 }
 0x763   : > { %v3467_v17 = vsel %vm573_vm1, %v7646_v57, 0.0  ;;  %v6035_v61 = vpop.eup %6034 }
 0x764   : > { %3468 = vadd.xlane.f32.xlu0 %v3467_v17  ;;  %v5832_v17 = vunpack.i.h.bf16 %v7652_v63  ;;  %v6037_v19 = vpop.eup %6036 }
 0x765   : > { %4151 = vrot.lane.b32.xlu2 %v6494_v28, %s6280_s18  ;;  %v3512_v28 = vmul.f32 %v6035_v61, %v7561_v58  ;;  %v3515_v58 = vmul.f32 %v6037_v19, %v7569_v54 }
 0x767   : > { %v4070_v7 = vpop.permute.xlu2 %4069 }
 0x76d   : > { %4237 = vrot.lane.b32.xlu2 %v6502_v33, %s6281_s9 }
 0x76f   : > { %v7656_v12 = vpop.permute.xlu2 %5834  ;;  %v5820_v43 = vpop.permute.xlu1 %5819 }
 0x770   : > { %v5837_v6 = vunpack.i.h.bf16 %v7656_v12  ;;  %v5822_v49 = vunpack.i.h.bf16 %v5820_v43  ;;  %v5821_v38 = vunpack.i.l.bf16 %v5820_v43 }
 0x772   : > { %3567 = vmatpush.msrb.mxu1 %v5837_v6  ;;  %3697 = vmatpush.msra.mxu0 %v5821_v38 }
 0x773   : > { %3749 = vmatpush.msrb.mxu3 %v5822_v49 }
 0x774   : > { %3775 = vmatpush.msrb.mxu0 %v5826_v20  ;;  %5558 = vmatmul.msk.f32.vlgmr.msrb.gmra.mxu3 %vm573_vm1, %v3512_v28 }
 0x775   : > { %3827 = vmatpush.msra.mxu3 %v5827_v18  ;;  %4293 = vrot.lane.b32.xlu2 %v8333_v39, %s6281_s9 }
 0x776   : > { %4125 = vrot.lane.b32.xlu1 %v6490_v26, %s6281_s9  ;;  %v7679_v26 = vpop.permute.xlu0 %4181 }
 0x777   : > { %3905 = vmatpush.msrb.mxu3 %v5832_v17  ;;  %v7701_v6 = vpop.permute.xlu2 %4097 }
 0x77c   : > { %5561 = vmatmul.msk.f32.vlgmr.msra.gmra.mxu3 %vm573_vm1, %v3515_v58 }
 0x77d   : > { %5582 = vmatpush.xpose.msk.msra.mxu3 %vm573_vm1, %v4070_v7  ;;  %4321 = vrot.lane.b32.xlu2 %v8334_v36, %s6281_s9 }
 0x77e   : > { %4209 = vrot.lane.b32.xlu1 %v8336_v44, %s6281_s9  ;;  %v7685_v39 = vpop.permute.xlu0 %4153 }
 0x785   : > { %4377 = vrot.lane.b32.xlu2 %v8335_v22, %s6281_s9 }
 0x786   : > { %4235 = vrot.lane.b32.xlu1 %v6502_v33, %s6280_s18  ;;  %v7691_v54 = vpop.permute.xlu0 %4207 }
 0x78d   : > { %4405 = vrot.lane.b32.xlu2 %v8338_v50, %s6281_s9 }
 0x78e   : > { %4263 = vrot.lane.b32.xlu1 %v6547_v53, %s6280_s18  ;;  %v7699_v43 = vpop.permute.xlu0 %4265 }
 0x795   : > { %4461 = vrot.lane.b32.xlu2 %v8341_v31, %s6281_s9 }
 0x796   : > { %4319 = vrot.lane.b32.xlu1 %v8334_v36, %s6280_s18  ;;  %v3404_v36 = vsub.f32 %v7581_v4, %v3382_v41  ;;  %v4292_v20 = vpop.permute.xlu0 %4291 }
 0x798   : > { %v3432_v49 = vmul.f32 1.442695, %v3404_v36 }
 0x79a   : > { %v3484_v22 = vpop.xlane.xlu1 %3483 }
 0x79b   : > { %6038 = vrcp.f32 %v3484_v22 }
 0x79c   : > { %6040 = vpow2.f32 %v3432_v49 }
 0x79e   : > { %4347 = vrot.lane.b32.xlu1 %v6518_v42, %s6280_s18 }
 0x7a1   : > { %v6039_v7 = vpop.eup %6038 }
 0x7a2   : > { %v3518_v61 = vmul.f32 %v6039_v7, %v7617_v16  ;;  %v7710_v18 = vpop.eup %6040 }
 0x7a4   : > { %5564 = vmatmul.msk.f32.vlgmr.msrb.gmra.mxu3 %vm573_vm1, %v3518_v61 }
 0x7a6   : > { %4403 = vrot.lane.b32.xlu1 %v8338_v50, %s6280_s18 }
 0x7ac   : > { %5583 = vmatmul.msk.f32.vlgmr.msra.gmra.mxu3 %vm573_vm1, %v4068_v40  ;;  %v7714_v40 = vpop.permute.xlu0 %4349 }
 0x7ae   : > { %4431 = vrot.lane.b32.xlu1 %v6536_v48, %s6280_s18 }
 0x7b0   : > { %v3391_v38 = vpop.xlane.xlu2 %3390 }
 0x7b1   : > { %v3407_v16 = vsub.f32 %v7626_v37, %v3391_v38  ;;  %v3476_v37 = vsel %vm573_vm1, %v7710_v18, 0.0  ;;  %v5831_v38 = vunpack.i.l.bf16 %v7652_v63 }
 0x7b3   : > { %v3438_v28 = vmul.f32 1.442695, %v3407_v16 }
 0x7b4   : > { %v4376_v19 = vpop.permute.xlu0 %4375 }
 0x7b5   : > { %6042 = vpow2.f32 %v3438_v28 }
 0x7b6   : > { %4487 = vrot.lane.b32.xlu1 %v8340_v21, %s6280_s18 }
 0x7b8   : > { %v4124_v50 = vpop.permute.xlu2 %4123 }
 0x7bb   : > { %v7712_v4 = vpop.eup %6042 }
 0x7bc   : > { %v3485_v41 = vsel %vm573_vm1, %v7712_v4, 0.0  ;;  %v7724_v22 = vpop.permute.xlu0 %4433 }
 0x7bd   : > { %3486 = vadd.xlane.f32.xlu0 %v3485_v41 }
 0x7be   : > { %5839 = vrot.lane.b32.xlu1 %v6555_v55, %s6282_s13  ;;  %3477 = vadd.xlane.f32.xlu2 %v3476_v37  ;;  %v5836_v37 = vunpack.i.l.bf16 %v7656_v12 }
 0x7c0   : > { %v4180_v17 = vpop.permute.xlu2 %4179 }
 0x7c8   : > { %v7722_v58 = vpop.permute.xlu2 %4151 }
 0x7cf   : > { %v3460_v7 = vpop.xlane.xlu1 %3459 }
 0x7d0   : > { %6044 = vrcp.f32 %v3460_v7  ;;  %v4238_v61 = vpop.permute.xlu2 %4237 }
 0x7d1   : > { %4459 = vrot.lane.b32.xlu0 %v8341_v31, %s6280_s18 }
 0x7d6   : > { %v6045_v36 = vpop.eup %6044  ;;  %4489 = vrot.lane.b32.xlu2 %v8340_v21, %s6281_s9 }
 0x7d7   : > { %v3510_v49 = vmul.f32 %v6045_v36, %v7640_v47  ;;  %v3469_v55 = vpop.xlane.xlu0 %3468  ;;  %v7749_v36 = vadd.f32 %v7484_v51, %v6654_v56 }
 0x7d8   : > { %6046 = vrcp.f32 %v3469_v55  ;;  %v4294_v16 = vpop.permute.xlu2 %4293 }
 0x7d9   : > { %5556 = vmatmul.msk.f32.vlgmr.msra.gmra.mxu0 %vm573_vm1, %v3510_v49  ;;  %5598 = vmatpush.xpose.msk.msrb.mxu2 %vm573_vm1, %v4294_v16 }
 0x7da   : > { %3853 = vmatpush.msra.mxu0 %v5831_v38 }
 0x7dc   : > { %5599 = vmatmul.msk.f32.vlgmr.msrb.gmra.mxu2 %vm573_vm1, %v4292_v20  ;;  %v3033_v20 = vpop.f32.mrf.mxu0 }
 0x7de   : > { %v6047_v28 = vpop.eup %6046 }
 0x7df   : > { %v3513_v41 = vmul.f32 %v6047_v28, %v7646_v57 }
 0x7e0   : > { %v4322_v7 = vpop.permute.xlu2 %4321 }
 0x7e1   : > { %5559 = vmatmul.msk.f32.vlgmr.msrb.gmra.mxu0 %vm573_vm1, %v3513_v41 }
 0x7e2   : > { %3931 = vmatpush.msrb.mxu0 %v5836_v37 }
 0x7e4   : > { %v3117_v51 = vpop.f32.mrf.mxu0 }
 0x7e8   : > { %v4126_v47 = vpop.permute.xlu1 %4125  ;;  %v4378_v63 = vpop.permute.xlu2 %4377 }
 0x7e9   : > { %5586 = vmatpush.xpose.msk.msrb.mxu3 %vm573_vm1, %v4126_v47  ;;  %5604 = vmatpush.xpose.msk.msra.mxu2 %vm573_vm1, %v4378_v63 }
 0x7ec   : > { %5587 = vmatmul.msk.f32.vlgmr.msrb.gmra.mxu3 %vm573_vm1, %v4124_v50  ;;  %5605 = vmatmul.msk.f32.vlgmr.msra.gmra.mxu2 %vm573_vm1, %v4376_v19  ;;  %v3347_v50 = vsel %vm573_vm1, %v7749_v36, -inf }
 0x7ed   : > { %5590 = vmatpush.xpose.msk.msra.mxu3 %vm573_vm1, %v7679_v26  ;;  %v7753_v26 = vadd.f32 %v3033_v20, %v6896_v1 }
 0x7f0   : > { %v4210_v57 = vpop.permute.xlu1 %4209  ;;  %v4406_v12 = vpop.permute.xlu2 %4405 }
 0x7f1   : > { %5594 = vmatpush.xpose.msk.msrb.mxu3 %vm573_vm1, %v4238_v61  ;;  %v7762_v61 = vadd.f32 %v3117_v51, %v6958_v45 }
 0x7f3   : > { %v3365_v38 = vsel %vm573_vm1, %v7762_v61, -inf }
 0x7f4   : > { %5591 = vmatmul.msk.f32.vlgmr.msra.gmra.mxu3 %vm573_vm1, %v4180_v17  ;;  %v3356_v17 = vsel %vm573_vm1, %v7753_v26, -inf }
 0x7f5   : > { %5600 = vmatpush.xpose.msk.msra.mxu3 %vm573_vm1, %v4322_v7  ;;  %v7768_v7 = vpop.f32.mrf.mxu2 }
 0x7f8   : > { %v4236_v49 = vpop.permute.xlu1 %4235  ;;  %v4462_v55 = vpop.permute.xlu2 %4461 }
 0x7f9   : > { %5610 = vmatpush.xpose.msk.msrb.mxu2 %vm573_vm1, %v4462_v55 }
 0x7fb   : > { %3348 = vmax.xlane.f32.xlu0 %v3347_v50 }
 0x7fc   : > { %5595 = vmatmul.msk.f32.vlgmr.msrb.gmra.mxu3 %vm573_vm1, %v4236_v49 }
 0x7fd   : > { %5606 = vmatpush.xpose.msk.msrb.mxu3 %vm573_vm1, %v4406_v12  ;;  %v7770_v63 = vpop.f32.mrf.mxu2 }
 0x7ff   : > { %3357 = vmax.xlane.f32.xlu2 %v3356_v17 }
 0x800   : > { %v4264_v19 = vpop.permute.xlu1 %4263 }
 0x805   : > { %v7772_v17 = vpop.f32.mrf.mxu2 }
 0x807   : > { %3366 = vmax.xlane.f32.xlu2 %v3365_v38 }
 0x808   : > { %v4320_v16 = vpop.permute.xlu1 %4319 }
 0x809   : > { %5601 = vmatmul.msk.f32.vlgmr.msra.gmra.mxu3 %vm573_vm1, %v4320_v16 }
 0x810   : > { %v4348_v28 = vpop.permute.xlu1 %4347 }
 0x818   : > { %v4404_v41 = vpop.permute.xlu1 %4403 }
 0x819   : > { %5607 = vmatmul.msk.f32.vlgmr.msrb.gmra.mxu3 %vm573_vm1, %v4404_v41 }
 0x820   : > { %v4432_v37 = vpop.permute.xlu1 %4431 }
 0x828   : > { %v4488_v47 = vpop.permute.xlu1 %4487 }
 0x830   : > { %v5840_v12 = vpop.permute.xlu1 %5839  ;;  %v3487_v55 = vpop.xlane.xlu0 %3486 }
 0x831   : > { %v5842_v20 = vunpack.i.h.bf16 %v5840_v12  ;;  %v3478_v49 = vpop.xlane.xlu2 %3477 }
 0x832   : > { %6048 = vrcp.f32 %v3478_v49 }
 0x833   : > { %4738 = vmatpush.msra.mxu2 %v5842_v20  ;;  %6050 = vrcp.f32 %v3487_v55  ;;  %v7781_v20 = vpop.f32.mrf.mxu2 }
 0x838   : > { %v6049_v50 = vpop.eup %6048 }
 0x839   : > { %v3516_v51 = vmul.f32 %v6049_v50, %v7710_v18  ;;  %v4490_v38 = vpop.permute.xlu2 %4489  ;;  %v6051_v16 = vpop.eup %6050 }
 0x83a   : > { %5612 = vmatpush.xpose.msk.msra.mxu3 %vm573_vm1, %v4490_v38  ;;  %v3519_v41 = vmul.f32 %v6051_v16, %v7712_v4  ;;  %v7787_v18 = vpop.f32.mrf.mxu3 }
 0x83b   : > { %5562 = vmatmul.msk.f32.vlgmr.msra.gmra.mxu0 %vm573_vm1, %v3516_v51 }
 0x83c   : > { %5584 = vmatpush.xpose.msk.msra.mxu0 %vm573_vm1, %v7701_v6  ;;  %v7792_v6 = vpop.f32.mrf.mxu2 }
 0x83d   : > { %5613 = vmatmul.msk.f32.vlgmr.msra.gmra.mxu3 %vm573_vm1, %v4488_v47 }
 0x842   : > { %v7794_v4 = vpop.f32.mrf.mxu3 }
 0x843   : > { %v4460_v49 = vpop.permute.xlu0 %4459  ;;  %5565 = vmatmul.msk.f32.vlgmr.msrb.gmra.mxu0 %vm573_vm1, %v3519_v41  ;;  %v3201_v41 = vpop.f32.mrf.mxu0 }
 0x844   : > { %5588 = vmatpush.xpose.msk.msrb.mxu0 %vm573_vm1, %v7685_v39  ;;  %5611 = vmatmul.msk.f32.vlgmr.msrb.gmra.mxu2 %vm573_vm1, %v4460_v49  ;;  %v7800_v39 = vpop.f32.mrf.mxu2 }
 0x84a   : > { %v7802_v47 = vpop.f32.mrf.mxu3 }
 0x84b   : > { %5585 = vmatmul.msk.f32.vlgmr.msra.gmra.mxu0 %vm573_vm1, %v7673_v3 }
 0x84c   : > { %5592 = vmatpush.xpose.msk.msra.mxu0 %vm573_vm1, %v4210_v57 }
 0x853   : > { %5589 = vmatmul.msk.f32.vlgmr.msrb.gmra.mxu0 %vm573_vm1, %v7722_v58  ;;  %v5841_v58 = vunpack.i.l.bf16 %v5840_v12  ;;  %v8360_v12 = vld [vmem:[#allocation18_spill] sm:$0xff] }
 0x854   : > { %5596 = vmatpush.xpose.msk.msrb.mxu0 %vm573_vm1, %v7699_v43  ;;  %v7813_v43 = vpop.f32.mrf.mxu3 }
 0x85b   : > { %5593 = vmatmul.msk.f32.vlgmr.msra.gmra.mxu0 %vm573_vm1, %v7691_v54 }
 0x85c   : > { %5602 = vmatpush.xpose.msk.msra.mxu0 %vm573_vm1, %v7714_v40  ;;  %v7816_v54 = vpop.f32.mrf.mxu3 }
 0x85f   : > { %v4316_v3 = vpop.f32.mrf.mxu2 }
 0x860   : > { %v4317_v57 = vadd.f32 %v4316_v3, %v6705_v62 }
 0x862   : > { %v4539_v55 = vsel %vm573_vm1, %v4317_v57, -inf }
 0x863   : > { %4540 = vmax.xlane.f32.xlu0 %v4539_v55  ;;  %5597 = vmatmul.msk.f32.vlgmr.msrb.gmra.mxu0 %vm573_vm1, %v4264_v19 }
 0x864   : > { %5608 = vmatpush.xpose.msk.msrb.mxu0 %vm573_vm1, %v7724_v22  ;;  %v4092_v22 = vpop.f32.mrf.mxu3 }
 0x86b   : > { %5603 = vmatmul.msk.f32.vlgmr.msra.gmra.mxu0 %vm573_vm1, %v4348_v28 }
 0x86c   : > { %4712 = vmatpush.msra.mxu0 %v5841_v58 }
 0x86e   : > { %v3349_v40 = vpop.xlane.xlu0 %3348 }
 0x86f   : > { %v3393_v50 = vsub.f32 %v7749_v36, %v3349_v40  ;;  %v7827_v36 = vadd.f32 %v3201_v41, %v6916_v23  ;;  %v4400_v40 = vpop.f32.mrf.mxu2 }
 0x871   : > { %v3410_v62 = vmul.f32 1.442695, %v3393_v50  ;;  %v3374_v55 = vsel %vm573_vm1, %v7827_v36, -inf  ;;  %v5848_v50 = vpack.i.bf16 %v8336_v44, %v6526_v46 }
 0x872   : > { %v3358_v51 = vpop.xlane.xlu2 %3357 }
 0x873   : > { %6052 = vpow2.f32 %v3410_v62  ;;  %v3396_v38 = vsub.f32 %v7753_v26, %v3358_v51  ;;  %5609 = vmatmul.msk.f32.vlgmr.msrb.gmra.mxu0 %vm573_vm1, %v4432_v37  ;;  %v4148_v37 = vpop.f32.mrf.mxu3  ;;  %v7842_v62 = vadd.f32 %v4400_v40, %v6723_v13  ;;  %v7849_v51 = vadd.f32 %v4092_v22, %v6640_v32  ;;  %v8361_v22 = vld [vmem:[#allocation22_spill] sm:$0xff] }
 0x874   : > { %v7832_v3 = vadd.f32 %v4148_v37, %v6667_v2  ;;  %v5858_v40 = vpack.i.bf16 %v6547_v53, %v6502_v33 }
 0x875   : > { %v3416_v19 = vmul.f32 1.442695, %v3396_v38  ;;  %v4548_v2 = vsel %vm573_vm1, %v7842_v62, -inf  ;;  %v4515_v38 = vsel %vm573_vm1, %v7849_v51, -inf }
 0x876   : > { %v4521_v58 = vsel %vm573_vm1, %v7832_v3, -inf }
 0x877   : > { %6054 = vpow2.f32 %v3416_v19  ;;  %5844 = vrot.lane.b32.xlu0 %v8360_v12, %s6282_s13  ;;  %v3285_v12 = vpop.f32.mrf.mxu0 }
 0x879   : > { %v6053_v28 = vpop.eup %6052 }
 0x87a   : > { %v3443_v16 = vsel %vm573_vm1, %v6053_v28, 0.0 }
 0x87b   : > { %3444 = vadd.xlane.f32.xlu2 %v3443_v16  ;;  %v4204_v46 = vpop.f32.mrf.mxu3  ;;  %v7864_v16 = vadd.f32 %v3285_v12, %v8361_v22 }
 0x87c   : > { %v7854_v44 = vadd.f32 %v4204_v46, %v6896_v1 }
 0x87d   : > { %v7824_v49 = vpop.eup %6054  ;;  %v3383_v1 = vsel %vm573_vm1, %v7864_v16, -inf }
 0x87e   : > { %v3452_v26 = vsel %vm573_vm1, %v7824_v49, 0.0 }
 0x87f   : > { %3453 = vadd.xlane.f32.xlu1 %v3452_v26  ;;  %v7883_v53 = vpop.f32.mrf.mxu0 }
 0x883   : > { %3375 = vmax.xlane.f32.xlu2 %v3374_v55  ;;  %v4260_v41 = vpop.f32.mrf.mxu3 }
 0x887   : > { %4522 = vmax.xlane.f32.xlu1 %v4521_v58 }
 0x89b   : > { %5849 = vrot.lane.b32.xlu2 %v5848_v50, %s6282_s13 }
 0x8a0   : > { %5854 = vrot.lane.b32.xlu1 %v7036_v29, %s6279_s30  ;;  %v4527_v29 = vsel %vm573_vm1, %v7854_v44, -inf }
 0x8a1   : > { %4549 = vmax.xlane.f32.xlu0 %v4548_v2 }
 0x8a9   : > { %4516 = vmax.xlane.f32.xlu0 %v4515_v38 }
 0x8c7   : > { %v4484_v13 = vpop.f32.mrf.mxu2 }
 0x8c8   : > { %v7857_v19 = vadd.f32 %v4484_v13, %v8332_v8  ;;  %v7869_v8 = vadd.f32 %v4260_v41, %v6696_v35  ;;  %v3367_v35 = vpop.xlane.xlu2 %3366 }
 0x8c9   : > { %v3399_v33 = vsub.f32 %v7762_v61, %v3367_v35 }
 0x8ca   : > { %4528 = vmax.xlane.f32.xlu1 %v4527_v29  ;;  %v4557_v32 = vsel %vm573_vm1, %v7857_v19, -inf  ;;  %v4533_v58 = vsel %vm573_vm1, %v7869_v8, -inf }
 0x8cb   : > { %4558 = vmax.xlane.f32.xlu0 %v4557_v32  ;;  %v3422_v41 = vmul.f32 1.442695, %v3399_v33 }
 0x8d2   : > { %3384 = vmax.xlane.f32.xlu1 %v3383_v1 }
 0x8d6   : > { %v4541_v26 = vpop.xlane.xlu0 %4540 }
 0x8d7   : > { %v4571_v37 = vsub.f32 %v4317_v57, %v4541_v26 }
 0x8d9   : > { %v4595_v55 = vmul.f32 1.442695, %v4571_v37 }
 0x8da   : > { %4534 = vmax.xlane.f32.xlu1 %v4533_v58  ;;  %v4344_v58 = vpop.f32.mrf.mxu3 }
 0x8db   : > { %6056 = vpow2.f32 %v4595_v55 }
 0x8df   : > { %5859 = vrot.lane.b32.xlu0 %v5858_v40, %s6282_s13 }
 0x8e1   : > { %v7876_v50 = vpop.eup %6056 }
 0x8e2   : > { %v4635_v2 = vsel %vm573_vm1, %v7876_v50, 0.0 }
 0x8e3   : > { %4636 = vadd.xlane.f32.xlu2 %v4635_v2 }
 0x8e9   : > { %v5845_v38 = vpop.permute.xlu0 %5844 }
 0x8ea   : > { %v5847_v57 = vunpack.i.h.bf16 %v5845_v38  ;;  %v5846_v46 = vunpack.i.l.bf16 %v5845_v38  ;;  %v4428_v38 = vpop.f32.mrf.mxu3 }
 0x8ec   : > { %4764 = vmatpush.msrb.mxu3 %v5846_v46  ;;  %4790 = vmatpush.msrb.mxu0 %v5847_v57  ;;  %v7898_v46 = vadd.f32 %v4428_v38, %v6736_v34 }
 0x8ee   : > { %v3445_v13 = vpop.xlane.xlu2 %3444 }
 0x8ef   : > { %6058 = vrcp.f32 %v3445_v13  ;;  %v4551_v13 = vsel %vm573_vm1, %v7898_v46, -inf }
 0x8f0   : > { %6060 = vpow2.f32 %v3422_v41 }
 0x8f2   : > { %v3454_v1 = vpop.xlane.xlu1 %3453 }
 0x8f3   : > { %6062 = vrcp.f32 %v3454_v1 }
 0x8f5   : > { %v6059_v29 = vpop.eup %6058 }
 0x8f6   : > { %v3505_v12 = vmul.f32 %v6059_v29, %v6053_v28  ;;  %v7880_v32 = vpop.xlane.xlu2 %3375  ;;  %v7888_v28 = vpop.f32.mrf.mxu0 }
 0x8f7   : > { %v7890_v61 = vpop.eup %6060 }
 0x8f8   : > { %5551 = vmatmul.msk.f32.vlgmr.msrb.gmra.mxu1 %vm573_vm1, %v3505_v12  ;;  %v3461_v35 = vsel %vm573_vm1, %v7890_v61, 0.0 }
 0x8f9   : > { %v6063_v29 = vpop.eup %6062 }
 0x8fa   : > { %v4523_v40 = vpop.xlane.xlu1 %4522 }
 0x8fb   : > { %5864 = vrot.lane.b32.xlu2 %v7240_v25, %s6282_s13  ;;  %v4565_v2 = vsub.f32 %v7832_v3, %v4523_v40 }
 0x8fd   : > { %v4583_v57 = vmul.f32 1.442695, %v4565_v2 }
 0x8fe   : > { %v5850_v26 = vpop.permute.xlu2 %5849  ;;  %v7895_v25 = vpop.f32.mrf.mxu0 }
 0x8ff   : > { %v5852_v37 = vunpack.i.h.bf16 %v5850_v26  ;;  %v5851_v55 = vunpack.i.l.bf16 %v5850_v26  ;;  %6064 = vpow2.f32 %v4583_v57  ;;  %v3508_v26 = vmul.f32 %v6063_v29, %v7824_v49 }
 0x901   : > { %4816 = vmatpush.msrb.mxu2 %v5851_v55  ;;  %4842 = vmatpush.msra.mxu3 %v5852_v37 }
 0x905   : > { %v7907_v1 = vpop.eup %6064 }
 0x906   : > { %v7902_v41 = vpop.f32.mrf.mxu0  ;;  %v4617_v34 = vsel %vm573_vm1, %v7907_v1, 0.0 }
 0x909   : > { %3462 = vadd.xlane.f32.xlu0 %v3461_v35  ;;  %v7916_v35 = vadd.f32 %v4344_v58, %v6708_v0 }
 0x90b   : > { %v4542_v38 = vsel %vm573_vm1, %v7916_v35, -inf }
 0x90e   : > { %v7912_v55 = vpop.f32.mrf.mxu0 }
 0x911   : > { %4552 = vmax.xlane.f32.xlu0 %v4551_v13 }
 0x912   : > { %v5855_v12 = vpop.permute.xlu1 %5854 }
 0x913   : > { %v5857_v3 = vunpack.i.h.bf16 %v5855_v12  ;;  %v5856_v33 = vunpack.i.l.bf16 %v5855_v12 }
 0x914   : > { %v7905_v37 = vpop.xlane.xlu0 %4549 }
 0x915   : > { %3645 = vmatpush.msra.mxu1 %v5856_v33 }
 0x916   : > { %5554 = vmatmul.msk.f32.vlgmr.msra.gmra.mxu1 %vm573_vm1, %v3508_v26  ;;  %v7920_v57 = vpop.f32.mrf.mxu0 }
 0x917   : > { %3723 = vmatpush.msrb.mxu1 %v5857_v3 }
 0x919   : > { %4618 = vadd.xlane.f32.xlu0 %v4617_v34 }
 0x91c   : > { %v4517_v40 = vpop.xlane.xlu0 %4516 }
 0x91d   : > { %v4563_v2 = vsub.f32 %v7849_v51, %v4517_v40 }
 0x91e   : > { %v4120_v12 = vpop.f32.mrf.mxu0 }
 0x91f   : > { %v4579_v49 = vmul.f32 1.442695, %v4563_v2  ;;  %v7934_v2 = vadd.f32 %v4120_v12, %v6654_v56 }
 0x921   : > { %6066 = vpow2.f32 %v4579_v49 }
 0x924   : > { %4543 = vmax.xlane.f32.xlu2 %v4542_v38 }
 0x926   : > { %v4176_v3 = vpop.f32.mrf.mxu0 }
 0x927   : > { %v7922_v13 = vpop.eup %6066 }
 0x928   : > { %v4611_v29 = vsel %vm573_vm1, %v7922_v13, 0.0 }
 0x92c   : > { %4612 = vadd.xlane.f32.xlu2 %v4611_v29 }
 0x92e   : > { %v4232_v33 = vpop.f32.mrf.mxu0 }
 0x936   : > { %v4288_v38 = vpop.f32.mrf.mxu0 }
 0x93d   : > { %v4529_v51 = vpop.xlane.xlu1 %4528 }
 0x93e   : > { %v4567_v0 = vsub.f32 %v7854_v44, %v4529_v51  ;;  %v4518_v44 = vsel %vm573_vm1, %v7934_v2, -inf  ;;  %v7940_v51 = vadd.f32 %v4176_v3, %v6675_v11  ;;  %v3402_v11 = vsub.f32 %v7827_v36, %v7880_v32  ;;  %v4559_v32 = vpop.xlane.xlu0 %4558 }
 0x940   : > { %v4587_v58 = vmul.f32 1.442695, %v4567_v0  ;;  %v4524_v12 = vsel %vm573_vm1, %v7940_v51, -inf }
 0x942   : > { %6068 = vpow2.f32 %v4587_v58  ;;  %v4372_v58 = vpop.f32.mrf.mxu0 }
 0x945   : > { %v7927_v26 = vpop.xlane.xlu1 %3384 }
 0x948   : > { %v7929_v34 = vpop.eup %6068 }
 0x949   : > { %v4623_v40 = vsel %vm573_vm1, %v7929_v34, 0.0 }
 0x94a   : > { %4624 = vadd.xlane.f32.xlu2 %v4623_v40 }
 0x94d   : > { %v4535_v49 = vpop.xlane.xlu1 %4534 }
 0x94e   : > { %v4569_v29 = vsub.f32 %v7869_v8, %v4535_v49  ;;  %v7949_v8 = vadd.f32 %v4232_v33, %v6683_v15  ;;  %v4456_v49 = vpop.f32.mrf.mxu0 }
 0x94f   : > { %v7964_v15 = vadd.f32 %v4456_v49, %v8361_v22 }
 0x950   : > { %v4591_v14 = vmul.f32 1.442695, %v4569_v29  ;;  %v4530_v3 = vsel %vm573_vm1, %v7949_v8, -inf  ;;  %v3428_v29 = vmul.f32 1.442695, %v3402_v11 }
 0x951   : > { %v4554_v36 = vsel %vm573_vm1, %v7964_v15, -inf }
 0x952   : > { %6070 = vpow2.f32 %v4591_v14  ;;  %4519 = vmax.xlane.f32.xlu2 %v4518_v44  ;;  %v7952_v14 = vadd.f32 %v4372_v58, %v6916_v23  ;;  %v7961_v44 = vadd.f32 %v4288_v38, %v6958_v45  ;;  %v7974_v45 = vpop.permute.xlu0 %5859 }
 0x953   : > { %6072 = vpow2.f32 %v3428_v29 }
 0x954   : > { %v4545_v40 = vsel %vm573_vm1, %v7952_v14, -inf  ;;  %v4536_v23 = vsel %vm573_vm1, %v7961_v44, -inf }
 0x956   : > { %v7979_v11 = vpop.xlane.xlu2 %4636 }
 0x958   : > { %v7942_v0 = vpop.eup %6070 }
 0x959   : > { %v4629_v56 = vsel %vm573_vm1, %v7942_v0, 0.0  ;;  %v7970_v33 = vpop.eup %6072 }
 0x95a   : > { %4630 = vadd.xlane.f32.xlu0 %v4629_v56  ;;  %4525 = vmax.xlane.f32.xlu2 %v4524_v12  ;;  %v3470_v58 = vsel %vm573_vm1, %v7970_v33, 0.0 }
 0x962   : > { %4531 = vmax.xlane.f32.xlu0 %v4530_v3  ;;  %4546 = vmax.xlane.f32.xlu2 %v4545_v40  ;;  %v7984_v40 = vpop.permute.xlu2 %5864 }
 0x96a   : > { %4537 = vmax.xlane.f32.xlu0 %v4536_v23  ;;  %4555 = vmax.xlane.f32.xlu2 %v4554_v36  ;;  %v5866_v23 = vunpack.i.l.bf16 %v7984_v40 }
 0x972   : > { %3471 = vadd.xlane.f32.xlu0 %v3470_v58 }
 0x97c   : > { %v3463_v22 = vpop.xlane.xlu0 %3462 }
 0x97d   : > { %6074 = vrcp.f32 %v3463_v22 }
 0x983   : > { %v6075_v38 = vpop.eup %6074 }
 0x984   : > { %v3511_v56 = vmul.f32 %v6075_v38, %v7890_v61  ;;  %v7977_v12 = vpop.xlane.xlu0 %4552 }
 0x986   : > { %5557 = vmatmul.msk.f32.vlgmr.msrb.gmra.mxu1 %vm573_vm1, %v3511_v56  ;;  %3780 = vrot.lane.b32.xlu0 %v6518_v42, %s6279_s30  ;;  %v5861_v42 = vunpack.i.l.bf16 %v7974_v45 }
 0x98c   : > { %v4619_v3 = vpop.xlane.xlu0 %4618 }
 0x98d   : > { %6076 = vrcp.f32 %v4619_v3 }
 0x993   : > { %v6077_v49 = vpop.eup %6076 }
 0x994   : > { %v4677_v29 = vmul.f32 %v6077_v49, %v7907_v1 }
 0x996   : > { %5616 = vmatmul.msk.f32.vlgmr.msrb.gmra.mxu3 %vm573_vm1, %v4677_v29 }
 0x997   : > { %4920 = vmatpush.msrb.mxu3 %v5866_v23  ;;  %v4544_v61 = vpop.xlane.xlu2 %4543 }
 0x998   : > { %v4572_v23 = vsub.f32 %v7916_v35, %v4544_v61 }
 0x99f   : > { %v4613_v36 = vpop.xlane.xlu2 %4612 }
 0x9a0   : > { %6078 = vrcp.f32 %v4613_v36  ;;  %v4512_v36 = vpop.f32.mrf.mxu3 }
 0x9a6   : > { %v6079_v58 = vpop.eup %6078 }
 0x9a7   : > { %v4675_v22 = vmul.f32 %v6079_v58, %v7922_v13  ;;  %v4597_v58 = vmul.f32 1.442695, %v4572_v23 }
 0x9a9   : > { %5614 = vmatmul.msk.f32.vlgmr.msra.gmra.mxu0 %vm573_vm1, %v4675_v22  ;;  %v8003_v22 = vadd.f32 %v4512_v36, %v6761_v27 }
 0x9aa   : > { %4868 = vmatpush.msra.mxu0 %v5861_v42 }
 0x9ab   : > { %v4560_v35 = vsel %vm573_vm1, %v8003_v22, -inf }
 0x9bd   : > { %v7992_v38 = vpop.xlane.xlu2 %4624 }
 0x9c5   : > { %v4520_v56 = vpop.xlane.xlu2 %4519 }
 0x9c6   : > { %v4564_v1 = vsub.f32 %v7934_v2, %v4520_v56  ;;  %v4577_v56 = vsub.f32 %v7857_v19, %v4559_v32 }
 0x9c8   : > { %v4581_v3 = vmul.f32 1.442695, %v4564_v1  ;;  %v4607_v61 = vmul.f32 1.442695, %v4577_v56 }
 0x9ca   : > { %6080 = vpow2.f32 %v4581_v3 }
 0x9cb   : > { %6082 = vpow2.f32 %v4597_v58 }
 0x9cd   : > { %v7995_v49 = vpop.xlane.xlu0 %4630  ;;  %v4526_v24 = vpop.xlane.xlu2 %4525 }
 0x9ce   : > { %v4566_v3 = vsub.f32 %v7940_v51, %v4526_v24 }
 0x9d0   : > { %v7997_v29 = vpop.eup %6080  ;;  %v4585_v23 = vmul.f32 1.442695, %v4566_v3 }
 0x9d1   : > { %v4614_v13 = vsel %vm573_vm1, %v7997_v29, 0.0  ;;  %v8010_v27 = vpop.eup %6082 }
 0x9d2   : > { %4615 = vadd.xlane.f32.xlu1 %v4614_v13  ;;  %v4638_v51 = vsel %vm573_vm1, %v8010_v27, 0.0 }
 0x9d5   : > { %v4532_v42 = vpop.xlane.xlu0 %4531 }
 0x9d6   : > { %v4568_v2 = vsub.f32 %v7949_v8, %v4532_v42  ;;  %v4574_v8 = vsub.f32 %v7842_v62, %v7905_v37 }
 0x9d8   : > { %v4589_v1 = vmul.f32 1.442695, %v4568_v2  ;;  %v4601_v32 = vmul.f32 1.442695, %v4574_v8 }
 0x9da   : > { %6084 = vpow2.f32 %v4589_v1  ;;  %4561 = vmax.xlane.f32.xlu1 %v4560_v35 }
 0x9db   : > { %6086 = vpow2.f32 %v4607_v61 }
 0x9dc   : > { %6088 = vpow2.f32 %v4585_v23 }
 0x9dd   : > { %v4538_v13 = vpop.xlane.xlu0 %4537 }
 0x9de   : > { %v4570_v36 = vsub.f32 %v7961_v44, %v4538_v13  ;;  %v3405_v13 = vsub.f32 %v7864_v16, %v7927_v26 }
 0x9e0   : > { %v8013_v30 = vpop.eup %6084  ;;  %v4593_v19 = vmul.f32 1.442695, %v4570_v36  ;;  %v4547_v36 = vpop.xlane.xlu2 %4546 }
 0x9e1   : > { %v4626_v24 = vsel %vm573_vm1, %v8013_v30, 0.0  ;;  %v8021_v58 = vpop.eup %6086 }
 0x9e2   : > { %6090 = vpow2.f32 %v4593_v19  ;;  %4627 = vadd.xlane.f32.xlu2 %v4626_v24  ;;  %4639 = vadd.xlane.f32.xlu1 %v4638_v51  ;;  %v8023_v44 = vpop.eup %6088  ;;  %v4653_v37 = vsel %vm573_vm1, %v8021_v58, 0.0  ;;  %v4573_v19 = vsub.f32 %v7952_v14, %v4547_v36 }
 0x9e3   : > { %6092 = vpow2.f32 %v4601_v32  ;;  %v4620_v2 = vsel %vm573_vm1, %v8023_v44, 0.0 }
 0x9e4   : > { %v4599_v8 = vmul.f32 1.442695, %v4573_v19 }
 0x9e5   : > { %v3472_v56 = vpop.xlane.xlu0 %3471 }
 0x9e6   : > { %6094 = vrcp.f32 %v3472_v56 }
 0x9e8   : > { %v8025_v42 = vpop.eup %6090  ;;  %v4556_v32 = vpop.xlane.xlu2 %4555 }
 0x9e9   : > { %v4632_v62 = vsel %vm573_vm1, %v8025_v42, 0.0  ;;  %v8033_v1 = vpop.eup %6092 }
 0x9ea   : > { %4633 = vadd.xlane.f32.xlu0 %v4632_v62  ;;  %4654 = vadd.xlane.f32.xlu2 %v4653_v37  ;;  %v4644_v3 = vsel %vm573_vm1, %v8033_v1, 0.0 }
 0x9eb   : > { %4621 = vadd.xlane.f32.xlu1 %v4620_v2  ;;  %v5862_v2 = vunpack.i.h.bf16 %v7974_v45 }
 0x9ec   : > { %v6095_v35 = vpop.eup %6094 }
 0x9ed   : > { %v3514_v61 = vmul.f32 %v6095_v35, %v7970_v33  ;;  %v3434_v33 = vmul.f32 1.442695, %v3405_v13 }
 0x9ef   : > { %6096 = vpow2.f32 %v3434_v33 }
 0x9f0   : > { %6098 = vpow2.f32 %v4599_v8 }
 0x9f3   : > { %4645 = vadd.xlane.f32.xlu1 %v4644_v3 }
 0x9f5   : > { %v8048_v24 = vpop.eup %6096 }
 0x9f6   : > { %v8052_v51 = vpop.eup %6098 }
 0x9f7   : > { %v4641_v16 = vsel %vm573_vm1, %v8052_v51, 0.0 }
 0x9f8   : > { %v3781_v23 = vpop.permute.xlu0 %3780 }
 0x9f9   : > { %3801 = vmatpush.msra.mxu1 %v3781_v23 }
 0x9fa   : > { %5560 = vmatmul.msk.f32.vlgmr.msra.gmra.mxu1 %vm573_vm1, %v3514_v61 }
 0x9fe   : > { %5874 = vrot.lane.b32.xlu0 %v7289_v9, %s6282_s13  ;;  %v4575_v9 = vsub.f32 %v7898_v46, %v7977_v12 }
 0xa02   : > { %5055 = vrot.lane.b32.xlu2 %v8341_v31, %s6282_s13  ;;  %v4603_v31 = vmul.f32 1.442695, %v4575_v9 }
 0xa04   : > { %6100 = vpow2.f32 %v4603_v31  ;;  %v5867_v31 = vunpack.i.h.bf16 %v7984_v40 }
 0xa0a   : > { %v8058_v26 = vpop.eup %6100 }
 0xa0b   : > { %v4647_v14 = vsel %vm573_vm1, %v8058_v26, 0.0 }
 0xa0c   : > { %5869 = vrot.lane.b32.xlu1 %v7248_v52, %s6282_s13  ;;  %v3479_v52 = vsel %vm573_vm1, %v8048_v24, 0.0 }
 0xa28   : > { %3480 = vadd.xlane.f32.xlu0 %v3479_v52 }
 0xa2b   : > { %4642 = vadd.xlane.f32.xlu2 %v4641_v16 }
 0xa36   : > { %4648 = vadd.xlane.f32.xlu1 %v4647_v14 }
 0xa43   : > { %3858 = vrot.lane.b32.xlu2 %v6536_v48, %s6279_s30  ;;  %s6212_s30 = scalar_lea.hbm %s6211_s29, 128 }
 0xa44   : > { %p6213_p4 = scmp.ne.s32.totalorder %s6211_s29, %s6212_s30 }
 0xa45   : > { %v4616_v46 = vpop.xlane.xlu1 %4615 }
 0xa46   : > { %6102 = vrcp.f32 %v4616_v46  ;;  %p6214_p8 = pnand %p6213_p4, %p6389_p3 }
 0xa47   : > { %6104 = vrcp.f32 %v7992_v38 }
 0xa48   : > { %p6215_p11 = pneg %p6214_p8 }
 0xa4c   : > { %v6103_v12 = vpop.eup %6102 }
 0xa4d   : > { %v4676_v62 = vmul.f32 %v6103_v12, %v7997_v29  ;;  %v4562_v37 = vpop.xlane.xlu1 %4561  ;;  %v6105_v35 = vpop.eup %6104  ;;  %v4576_v29 = vsub.f32 %v7964_v15, %v4556_v32 }
 0xa4e   : > { %v4578_v56 = vsub.f32 %v8003_v22, %v4562_v37  ;;  %v4679_v48 = vmul.f32 %v6105_v35, %v7929_v34 }
 0xa4f   : > { %5615 = vmatmul.msk.f32.vlgmr.msra.gmra.mxu2 %vm573_vm1, %v4676_v62  ;;  %v4605_v36 = vmul.f32 1.442695, %v4576_v29 }
 0xa50   : > { %v4609_v3 = vmul.f32 1.442695, %v4578_v56  ;;  %4894 = vmatpush.msra.mxu2 %v5862_v2 }
 0xa52   : > { %6106 = vpow2.f32 %v4609_v3 }
 0xa55   : > { %v4640_v61 = vpop.xlane.xlu1 %4639  ;;  %v4628_v23 = vpop.xlane.xlu2 %4627 }
 0xa56   : > { %6108 = vrcp.f32 %v4628_v23 }
 0xa57   : > { %5618 = vmatmul.msk.f32.vlgmr.msrb.gmra.mxu2 %vm573_vm1, %v4679_v48  ;;  %6110 = vrcp.f32 %v7979_v11 }
 0xa58   : > { %v8071_v38 = vpop.eup %6106 }
 0xa59   : > { %v4656_v45 = vsel %vm573_vm1, %v8071_v38, 0.0 }
 0xa5a   : > { %4657 = vadd.xlane.f32.xlu1 %v4656_v45 }
 0xa5c   : > { %v6109_v22 = vpop.eup %6108 }
 0xa5d   : > { %v4634_v13 = vpop.xlane.xlu0 %4633  ;;  %v4680_v34 = vmul.f32 %v6109_v22, %v8013_v30  ;;  %v6111_v33 = vpop.eup %6110 }
 0xa5e   : > { %6112 = vrcp.f32 %v4634_v13  ;;  %v4622_v19 = vpop.xlane.xlu1 %4621  ;;  %v4683_v52 = vmul.f32 %v6111_v33, %v7876_v50  ;;  %v4655_v12 = vpop.xlane.xlu2 %4654  ;;  %v3937_v13 = vld [vmem:[#allocation5 + $0x10] sm:$0xff] }
 0xa5f   : > { %6114 = vrcp.f32 %v4622_v19  ;;  %5619 = vmatmul.msk.f32.vlgmr.msra.gmra.mxu3 %vm573_vm1, %v4680_v34  ;;  %v5108_v34 = vld [vmem:[#allocation5 + $0x18] sm:$0xff] }
 0xa60   : > { %6116 = vpow2.f32 %v4605_v36 }
 0xa61   : > { %6118 = vrcp.f32 %v7995_v49 }
 0xa62   : > { %6120 = vrcp.f32 %v4640_v61 }
 0xa64   : > { %v6113_v8 = vpop.eup %6112 }
 0xa65   : > { %v6115_v9 = vpop.eup %6114  ;;  %v4682_v15 = vmul.f32 %v6113_v8, %v8025_v42 }
 0xa66   : > { %v4678_v11 = vmul.f32 %v6115_v9, %v8023_v44  ;;  %v8085_v30 = vpop.eup %6116  ;;  %v4646_v14 = vpop.xlane.xlu1 %4645 }
 0xa67   : > { %5621 = vmatmul.msk.f32.vlgmr.msra.gmra.mxu2 %vm573_vm1, %v4682_v15  ;;  %5622 = vmatmul.msk.f32.vlgmr.msrb.gmra.mxu3 %vm573_vm1, %v4683_v52  ;;  %v6119_v16 = vpop.eup %6118  ;;  %v4650_v49 = vsel %vm573_vm1, %v8085_v30, 0.0  ;;  %6122 = vrcp.f32 %v4646_v14  ;;  %v5056_v3 = vpop.permute.xlu2 %5055  ;;  %v8362_v14 = vld [vmem:[#allocation23_spill] sm:$0xff] }
 0xa68   : > { %5617 = vmatmul.msk.f32.vlgmr.msrb.gmra.mxu0 %vm573_vm1, %v4678_v11  ;;  %v4681_v50 = vmul.f32 %v6119_v16, %v7942_v0  ;;  %v6121_v42 = vpop.eup %6120  ;;  %6124 = vrcp.f32 %v4655_v12  ;;  %v4766_v15 = vpop.f32.mrf.mxu3 }
 0xa69   : > { %4946 = vmatpush.msrb.mxu0 %v5867_v31  ;;  %v4684_v46 = vmul.f32 %v6121_v42, %v8010_v27 }
 0xa6c   : > { %4651 = vadd.xlane.f32.xlu2 %v4650_v49 }
 0xa6d   : > { %v6123_v32 = vpop.eup %6122 }
 0xa6e   : > { %v4686_v0 = vmul.f32 %v6123_v32, %v8033_v1  ;;  %v6125_v27 = vpop.eup %6124 }
 0xa6f   : > { %v4689_v35 = vmul.f32 %v6125_v27, %v8021_v58 }
 0xa70   : > { %5620 = vmatmul.msk.f32.vlgmr.msra.gmra.mxu0 %vm573_vm1, %v4681_v50  ;;  %v5875_v40 = vpop.permute.xlu0 %5874 }
 0xa71   : > { %v5876_v44 = vunpack.i.l.bf16 %v5875_v40  ;;  %v5877_v56 = vunpack.i.h.bf16 %v5875_v40 }
 0xa73   : > { %5024 = vmatpush.msra.mxu0 %v5876_v44  ;;  %v8154_v44 = vld [vmem:[%s8282_s5] ss:$0 sm:$0xff] }
 0xa78   : > { %5623 = vmatmul.msk.f32.vlgmr.msrb.gmra.mxu0 %vm573_vm1, %v4684_v46  ;;  %v1709_v46 = vadd.f32 %v8154_v44, %v8362_v14 }
 0xa7a   : > { %v2880_v12 = vadd.f32 %v7768_v7, %v1709_v46  ;;  %v8371_v46 = vld [vmem:[#allocation28_spill] sm:$0xff] }
 0xa7e   : > { %v5870_v62 = vpop.permute.xlu1 %5869 }
 0xa7f   : > { %v5872_v37 = vunpack.i.h.bf16 %v5870_v62  ;;  %v5871_v2 = vunpack.i.l.bf16 %v5870_v62 }
 0xa81   : > { %4972 = vmatpush.msrb.mxu2 %v5871_v2  ;;  %4998 = vmatpush.msra.mxu3 %v5872_v37 }
 0xa82   : > { %5625 = vmatmul.msk.f32.vlgmr.msra.gmra.mxu3 %vm573_vm1, %v4686_v0 }
 0xa83   : > { %5050 = vmatpush.msra.mxu2 %v5877_v56  ;;  %5076 = vmatpush.msrb.mxu3 %v5056_v3  ;;  %v8363_v56 = vld [vmem:[#allocation24_spill] sm:$0xff] }
 0xa84   : > { %5081 = vrot.lane.b32.xlu2 %v8340_v21, %s6282_s13  ;;  %v1710_v3 = vadd.f32 %v8154_v44, %v8363_v56  ;;  %s6216_s13 = scalar_lea.hbm %s8283_s6, 256 }
 0xa85   : > { %p6218_p2 = scmp.lt.s32.totalorder %s6216_s13, %s6212_s30 }
 0xa86   : > { %v2881_v7 = vadd.f32 %v7770_v63, %v1710_v3  ;;  %v8373_v3 = vld [vmem:[#allocation29_spill] sm:$0xff] }
 0xa87   : > { %p6219_p10 = por %p6218_p2, %p6217_p9 }
 0xa89   : > { %p6220_p12 = pnand %p6219_p10, %p6215_p11 }
 0xa8a   : > { %5628 = vmatmul.msk.f32.vlgmr.msrb.gmra.mxu3 %vm573_vm1, %v4689_v35 }
 0xa9b   : > { %v3481_v48 = vpop.xlane.xlu0 %3480 }
 0xa9c   : > { %6126 = vrcp.f32 %v3481_v48 }
 0xa9e   : > { %v4643_v61 = vpop.xlane.xlu2 %4642 }
 0xa9f   : > { %6128 = vrcp.f32 %v4643_v61 }
 0xaa2   : > { %v6127_v1 = vpop.eup %6126 }
 0xaa3   : > { %v3517_v45 = vmul.f32 %v6127_v1, %v8048_v24  ;;  %v3569_v24 = vpop.f32.mrf.mxu1  ;;  %v8364_v1 = vld [vmem:[#allocation25_spill] sm:$0xff] }
 0xaa5   : > { %v6129_v23 = vpop.eup %6128 }
 0xaa6   : > { %v4685_v29 = vmul.f32 %v6129_v23, %v8052_v51  ;;  %v3859_v22 = vpop.permute.xlu2 %3858  ;;  %v1711_v23 = vadd.f32 %v8154_v44, %v8364_v1  ;;  %v8374_v1 = vld [vmem:[#allocation13_spill] sm:$0xff] }
 0xaa7   : > { %3879 = vmatpush.msrb.mxu1 %v3859_v22 }
 0xaa8   : > { %5563 = vmatmul.msk.f32.vlgmr.msrb.gmra.mxu1 %vm573_vm1, %v3517_v45  ;;  %5624 = vmatmul.msk.f32.vlgmr.msrb.gmra.mxu2 %vm573_vm1, %v4685_v29  ;;  %v2882_v29 = vadd.f32 %v7772_v17, %v1711_v23  ;;  %v1720_v23 = vadd.f32 %v8154_v44, %v8374_v1 }
 0xaa9   : > { %v4649_v21 = vpop.xlane.xlu1 %4648  ;;  %4001 = vmatpush.msra.mxu1 %v3937_v13  ;;  %5172 = vmatpush.msrb.mxu2 %v5108_v34 }
 0xaaa   : > { %6130 = vrcp.f32 %v4649_v21 }
 0xaab   : > { %v3647_v51 = vpop.f32.mrf.mxu1 }
 0xab0   : > { %v6131_v58 = vpop.eup %6130  ;;  %5566 = vmatmul.msk.f32.vlgmr.msra.gmra.mxu1 %vm573_vm1, %v7883_v53 }
 0xab1   : > { %v4687_v36 = vmul.f32 %v6131_v58, %v8058_v26  ;;  %v8365_v58 = vld [vmem:[#allocation26_spill] sm:$0xff] }
 0xab2   : > { %v1712_v63 = vadd.f32 %v8154_v44, %v8365_v58  ;;  %v8376_v58 = vld [vmem:[#allocation11_spill] sm:$0xff] }
 0xab3   : > { %5626 = vmatmul.msk.f32.vlgmr.msra.gmra.mxu0 %vm573_vm1, %v4687_v36  ;;  %v3725_v33 = vpop.f32.mrf.mxu1 }
 0xab4   : > { %v2883_v36 = vadd.f32 %v7781_v20, %v1712_v63  ;;  %v1714_v20 = vadd.f32 %v8154_v44, %v7464_v10  ;;  %v8366_v10 = vld [vmem:[#allocation21_spill] sm:$0xff]  ;;  %v1721_v63 = vadd.f32 %v8154_v44, %v8376_v58 }
 0xab8   : > { %5567 = vmatmul.msk.f32.gmra.mxu1 %vm573_vm1, %v3569_v24 }
 0xac0   : > { %5568 = vmatmul.msk.f32.gmra.mxu1 %vm573_vm1, %v7787_v18 }
 0xac8   : > { %5569 = vmatmul.msk.f32.gmra.mxu1 %vm573_vm1, %v7888_v28 }
 0xacd   : > { %v4658_v53 = vpop.xlane.xlu1 %4657 }
 0xace   : > { %6132 = vrcp.f32 %v4658_v53 }
 0xad0   : > { %5570 = vmatmul.msk.f32.gmra.mxu1 %vm573_vm1, %v3647_v51 }
 0xad4   : > { %v6133_v19 = vpop.eup %6132 }
 0xad5   : > { %v4690_v28 = vmul.f32 %v6133_v19, %v8071_v38  ;;  %v3803_v38 = vpop.f32.mrf.mxu1 }
 0xad8   : > { %5571 = vmatmul.msk.f32.gmra.mxu1 %vm573_vm1, %v7794_v4  ;;  %v4714_v4 = vpop.f32.mrf.mxu0 }
 0xadf   : > { %v4652_v26 = vpop.xlane.xlu2 %4651 }
 0xae0   : > { %6134 = vrcp.f32 %v4652_v26  ;;  %5572 = vmatmul.msk.f32.gmra.mxu1 %vm573_vm1, %v7895_v25  ;;  %v4740_v25 = vpop.f32.mrf.mxu2  ;;  %v1713_v26 = vadd.f32 %v8154_v44, %v7460_v59 }
 0xae2   : > { %v2884_v17 = vadd.f32 %v7792_v6, %v1713_v26  ;;  %v1715_v6 = vadd.f32 %v8154_v44, %v7468_v60  ;;  %v8368_v60 = vld [vmem:[#allocation14_spill] sm:$0xff] }
 0xae5   : > { %v4792_v52 = vpop.f32.mrf.mxu0 }
 0xae6   : > { %v6135_v18 = vpop.eup %6134 }
 0xae7   : > { %v4688_v8 = vmul.f32 %v6135_v18, %v8085_v30  ;;  %v5082_v9 = vpop.permute.xlu2 %5081 }
 0xae8   : > { %5573 = vmatmul.msk.f32.gmra.mxu1 %vm573_vm1, %v3725_v33  ;;  %5102 = vmatpush.msrb.mxu0 %v5082_v9 }
 0xae9   : > { %5627 = vmatmul.msk.f32.vlgmr.msra.gmra.mxu2 %vm573_vm1, %v4688_v8  ;;  %5629 = vmatmul.msk.f32.vlgmr.msrb.gmra.mxu0 %vm573_vm1, %v4690_v28  ;;  %v2885_v8 = vadd.f32 %v7800_v39, %v1714_v20 }
 0xaed   : > { %v4870_v11 = vpop.f32.mrf.mxu0 }
 0xaf0   : > { %5574 = vmatmul.msk.f32.gmra.mxu1 %vm573_vm1, %v7802_v47  ;;  %v4818_v47 = vpop.f32.mrf.mxu2 }
 0xaf1   : > { %5630 = vmatmul.msk.f32.vlgmr.msrb.gmra.mxu2 %vm573_vm1, %v4714_v4 }
 0xaf8   : > { %5575 = vmatmul.msk.f32.gmra.mxu1 %vm573_vm1, %v7902_v41  ;;  %v4844_v41 = vpop.f32.mrf.mxu3  ;;  %v4896_v30 = vpop.f32.mrf.mxu2 }
 0xaf9   : > { %5631 = vmatmul.msk.f32.gmra.mxu2 %vm573_vm1, %v4740_v25 }
 0xb00   : > { %5576 = vmatmul.msk.f32.gmra.mxu1 %vm573_vm1, %v3803_v38  ;;  %v2886_v38 = vadd.f32 %v7523_v5, %v1715_v6  ;;  %v8369_v5 = vld [vmem:[#allocation27_spill] sm:$0xff]  ;;  %v8381_v6 = vld [vmem:[#allocation33_spill] sm:$0xff] }
 0xb01   : > { %5632 = vmatmul.msk.f32.gmra.mxu2 %vm573_vm1, %v4766_v15 }
 0xb08   : > { %5577 = vmatmul.msk.f32.gmra.mxu1 %vm573_vm1, %v7813_v43  ;;  %v4922_v43 = vpop.f32.mrf.mxu3 }
 0xb09   : > { %5633 = vmatmul.msk.f32.gmra.mxu2 %vm573_vm1, %v4792_v52 }
 0xb10   : > { %5578 = vmatmul.msk.f32.gmra.mxu1 %vm573_vm1, %v7912_v55  ;;  %v4948_v55 = vpop.f32.mrf.mxu0  ;;  %v5000_v49 = vpop.f32.mrf.mxu3 }
 0xb11   : > { %5634 = vmatmul.msk.f32.gmra.mxu2 %vm573_vm1, %v4818_v47 }
 0xb18   : > { %v5078_v62 = vpop.f32.mrf.mxu3 }
 0xb19   : > { %5635 = vmatmul.msk.f32.gmra.mxu2 %vm573_vm1, %v4844_v41  ;;  %v1716_v41 = vadd.f32 %v8154_v44, %v8366_v10  ;;  %v8382_v10 = vld [vmem:[#allocation20_spill] sm:$0xff] }
 0xb21   : > { %5636 = vmatmul.msk.f32.gmra.mxu2 %vm573_vm1, %v4870_v11  ;;  %v8367_v11 = vld [vmem:[#allocation19_spill] sm:$0xff] }
 0xb25   : > { %v3881_v31 = vpop.f32.mrf.mxu1 }
 0xb26   : > { %5579 = vmatmul.msk.f32.gmra.mxu1 %vm573_vm1, %v3881_v31  ;;  %v2887_v31 = vadd.f32 %v8367_v11, %v1716_v41  ;;  %v1724_v41 = vadd.f32 %v8154_v44, %v8382_v10  ;;  %v8383_v11 = vld [vmem:[#allocation34_spill] sm:$0xff] }
 0xb29   : > { %5637 = vmatmul.msk.f32.gmra.mxu2 %vm573_vm1, %v4896_v30 }
 0xb2b   : > { %v4974_v16 = vpop.f32.mrf.mxu2 }
 0xb2e   : > { %5580 = vmatmul.msk.f32.gmra.mxu1 %vm573_vm1, %v7816_v54  ;;  %v4003_v54 = vpop.f32.mrf.mxu1 }
 0xb2f   : > { %v4051_v32 = vadd.f32 %v4003_v54, %v2880_v12 }
 0xb30   : > { %v5026_v50 = vpop.f32.mrf.mxu0 }
 0xb31   : > { %5638 = vmatmul.msk.f32.gmra.mxu2 %vm573_vm1, %v4922_v43 }
 0xb36   : > { %5581 = vmatmul.msk.f32.gmra.mxu1 %vm573_vm1, %v7920_v57  ;;  %v4006_v40 = vpop.f32.mrf.mxu1 }
 0xb37   : > { %v4052_v27 = vadd.f32 %v4006_v40, %v2881_v7 }
 0xb39   : > { %5639 = vmatmul.msk.f32.gmra.mxu2 %vm573_vm1, %v4948_v55 }
 0xb3e   : > { %v4009_v57 = vpop.f32.mrf.mxu1 }
 0xb3f   : > { %v4053_v22 = vadd.f32 %v4009_v57, %v2882_v29 }
 0xb41   : > { %5640 = vmatmul.msk.f32.gmra.mxu2 %vm573_vm1, %v4974_v16  ;;  %v1717_v16 = vadd.f32 %v8154_v44, %v8368_v60 }
 0xb46   : > { %v4012_v0 = vpop.f32.mrf.mxu1 }
 0xb47   : > { %v4054_v51 = vadd.f32 %v4012_v0, %v2883_v36  ;;  %v8372_v0 = vld [vmem:[#allocation16_spill] sm:$0xff] }
 0xb48   : > { %v1719_v56 = vadd.f32 %v8154_v44, %v8372_v0 }
 0xb49   : > { %5641 = vmatmul.msk.f32.gmra.mxu2 %vm573_vm1, %v5000_v49  ;;  %v2888_v49 = vadd.f32 %v8369_v5, %v1717_v16 }
 0xb4a   : > { %v2890_v7 = vadd.f32 %v8373_v3, %v1719_v56 }
 0xb4e   : > { %v4015_v45 = vpop.f32.mrf.mxu1 }
 0xb4f   : > { %v4055_v19 = vadd.f32 %v4015_v45, %v2884_v17  ;;  %v8375_v45 = vld [vmem:[#allocation30_spill] sm:$0xff] }
 0xb50   : > { %v2891_v29 = vadd.f32 %v8375_v45, %v1720_v23 }
 0xb51   : > { %5642 = vmatmul.msk.f32.gmra.mxu2 %vm573_vm1, %v5026_v50 }
 0xb56   : > { %v4018_v24 = vpop.f32.mrf.mxu1 }
 0xb57   : > { %v4056_v9 = vadd.f32 %v4018_v24, %v2885_v8  ;;  %v8377_v24 = vld [vmem:[#allocation31_spill] sm:$0xff] }
 0xb5e   : > { %v4021_v18 = vpop.f32.mrf.mxu1 }
 0xb5f   : > { %v4057_v15 = vadd.f32 %v4021_v18, %v2886_v38 }
 0xb66   : > { %v5104_v35 = vpop.f32.mrf.mxu0  ;;  %v4024_v59 = vpop.f32.mrf.mxu1 }
 0xb67   : > { %v4058_v30 = vadd.f32 %v4024_v59, %v2887_v31  ;;  %v2895_v31 = vadd.f32 %v8383_v11, %v1724_v41 }
 0xb6c   : > { %v5052_v42 = vpop.f32.mrf.mxu2 }
 0xb6d   : > { %5643 = vmatmul.msk.f32.gmra.mxu2 %vm573_vm1, %v5052_v42  ;;  %v8370_v42 = vld [vmem:[#allocation15_spill] sm:$0xff] }
 0xb6e   : > { %v4027_v39 = vpop.f32.mrf.mxu1  ;;  %v1718_v14 = vadd.f32 %v8154_v44, %v8370_v42 }
 0xb6f   : > { %v4059_v54 = vadd.f32 %v4027_v39, %v2888_v49 }
 0xb70   : > { %v2889_v12 = vadd.f32 %v8371_v46, %v1718_v14 }
 0xb74   : > { %v5174_v37 = vpop.f32.mrf.mxu2 }
 0xb75   : > { %v5222_v2 = vadd.f32 %v5174_v37, %v4051_v32  ;;  %5644 = vmatmul.msk.f32.gmra.mxu2 %vm573_vm1, %v5078_v62 }
 0xb76   : > { %v4030_v50 = vpop.f32.mrf.mxu1 }
 0xb77   : > { %5238 = vst.msk [vmem:[%s8165_s7] sm:$0xff] %vm334_vm0, %v5222_v2  ;;  %v4060_v32 = vadd.f32 %v4030_v50, %v2889_v12 }
 0xb7c   : > { %v5177_v48 = vpop.f32.mrf.mxu2 }
 0xb7d   : > { %v5223_v61 = vadd.f32 %v5177_v48, %v4052_v27  ;;  %5645 = vmatmul.msk.f32.gmra.mxu2 %vm573_vm1, %v5104_v35 }
 0xb7e   : > { %v4033_v62 = vpop.f32.mrf.mxu1 }
 0xb7f   : > { %5239 = vst.msk [vmem:[%s8165_s7 + $0x8] sm:$0xff] %vm334_vm0, %v5223_v61  ;;  %v4061_v27 = vadd.f32 %v4033_v62, %v2890_v7 }
 0xb84   : > { %v5180_v13 = vpop.f32.mrf.mxu2 }
 0xb85   : > { %v5224_v21 = vadd.f32 %v5180_v13, %v4053_v22 }
 0xb86   : > { %v4036_v61 = vpop.f32.mrf.mxu1 }
 0xb87   : > { %5240 = vst.msk [vmem:[%s8165_s7 + $0x10] sm:$0xff] %vm334_vm0, %v5224_v21  ;;  %v4062_v22 = vadd.f32 %v4036_v61, %v2891_v29 }
 0xb8c   : > { %v5183_v34 = vpop.f32.mrf.mxu2 }
 0xb8d   : > { %v5225_v53 = vadd.f32 %v5183_v34, %v4054_v51  ;;  %v2892_v51 = vadd.f32 %v8377_v24, %v1721_v63 }
 0xb8e   : > { %v4039_v36 = vpop.f32.mrf.mxu1 }
 0xb8f   : > { %5241 = vst.msk [vmem:[%s8165_s7 + $0x18] sm:$0xff] %vm334_vm0, %v5225_v53  ;;  %v4063_v34 = vadd.f32 %v4039_v36, %v2892_v51 }
 0xb94   : > { %v5186_v33 = vpop.f32.mrf.mxu2 }
 0xb95   : > { %v5226_v28 = vadd.f32 %v5186_v33, %v4055_v19  ;;  %v8378_v19 = vld [vmem:[#allocation17_spill] sm:$0xff]  ;;  %v8379_v33 = vld [vmem:[#allocation32_spill] sm:$0xff] }
 0xb96   : > { %v1722_v18 = vadd.f32 %v8154_v44, %v8378_v19 }
 0xb97   : > { %5242 = vst.msk [vmem:[%s8165_s7 + $0x20] sm:$0xff] %vm334_vm0, %v5226_v28 }
 0xb98   : > { %v2893_v28 = vadd.f32 %v8379_v33, %v1722_v18 }
 0xb9c   : > { %v5189_v4 = vpop.f32.mrf.mxu2 }
 0xb9d   : > { %v5227_v25 = vadd.f32 %v5189_v4, %v4056_v9 }
 0xb9f   : > { %5243 = vst.msk [vmem:[%s8165_s7 + $0x28] sm:$0xff] %vm334_vm0, %v5227_v25  ;;  %v8380_v25 = vld [vmem:[#allocation12_spill] sm:$0xff] }
 0xba0   : > { %v1723_v59 = vadd.f32 %v8154_v44, %v8380_v25 }
 0xba2   : > { %v2894_v38 = vadd.f32 %v8381_v6, %v1723_v59 }
 0xba3   : > { %v4042_v17 = vpop.f32.mrf.mxu1 }
 0xba4   : > { %v5192_v52 = vpop.f32.mrf.mxu2  ;;  %v4064_v20 = vadd.f32 %v4042_v17, %v2893_v28 }
 0xba5   : > { %v5228_v47 = vadd.f32 %v5192_v52, %v4057_v15 }
 0xba7   : > { %5244 = vst.msk [vmem:[%s8165_s7 + $0x30] sm:$0xff] %vm334_vm0, %v5228_v47 }
 0xbab   : > { %v4045_v4 = vpop.f32.mrf.mxu1 }
 0xbac   : > { %v5195_v43 = vpop.f32.mrf.mxu2  ;;  %v4065_v15 = vadd.f32 %v4045_v4, %v2894_v38 }
 0xbad   : > { %v5229_v55 = vadd.f32 %v5195_v43, %v4058_v30 }
 0xbaf   : > { %5245 = vst.msk [vmem:[%s8165_s7 + $0x38] sm:$0xff] %vm334_vm0, %v5229_v55 }
 0xbb3   : > { %v4048_v39 = vpop.f32.mrf.mxu1 }
 0xbb4   : > { %v5198_v40 = vpop.f32.mrf.mxu2  ;;  %v4066_v30 = vadd.f32 %v4048_v39, %v2895_v31 }
 0xbb5   : > { %v5230_v57 = vadd.f32 %v5198_v40, %v4059_v54 }
 0xbb7   : > { %5246 = vst.msk [vmem:[%s8165_s7 + $0x40] sm:$0xff] %vm334_vm0, %v5230_v57 }
 0xbbc   : > { %v5201_v37 = vpop.f32.mrf.mxu2 }
 0xbbd   : > { %v5231_v2 = vadd.f32 %v5201_v37, %v4060_v32 }
 0xbbf   : > { %5247 = vst.msk [vmem:[%s8165_s7 + $0x48] sm:$0xff] %vm334_vm0, %v5231_v2 }
 0xbc4   : > { %v5204_v35 = vpop.f32.mrf.mxu2 }
 0xbc5   : > { %v5232_v48 = vadd.f32 %v5204_v35, %v4061_v27 }
 0xbc7   : > { %5248 = vst.msk [vmem:[%s8165_s7 + $0x50] sm:$0xff] %vm334_vm0, %v5232_v48 }
 0xbcc   : > { %v5207_v13 = vpop.f32.mrf.mxu2 }
 0xbcd   : > { %v5233_v21 = vadd.f32 %v5207_v13, %v4062_v22 }
 0xbcf   : > { %5249 = vst.msk [vmem:[%s8165_s7 + $0x58] sm:$0xff] %vm334_vm0, %v5233_v21 }
 0xbd4   : > { %v5210_v53 = vpop.f32.mrf.mxu2 }
 0xbd5   : > { %v5234_v26 = vadd.f32 %v5210_v53, %v4063_v34 }
 0xbd7   : > { %5250 = vst.msk [vmem:[%s8165_s7 + $0x60] sm:$0xff] %vm334_vm0, %v5234_v26 }
 0xbf0   : > { %v5213_v8 = vpop.f32.mrf.mxu2 }
 0xbf1   : > { %v5235_v9 = vadd.f32 %v5213_v8, %v4064_v20 }
 0xbf3   : > { %5251 = vst.msk [vmem:[%s8165_s7 + $0x68] sm:$0xff] %vm334_vm0, %v5235_v9 }
 0xbf8   : > { %v5216_v52 = vpop.f32.mrf.mxu2 }
 0xbf9   : > { %v5236_v47 = vadd.f32 %v5216_v52, %v4065_v15 }
 0xbfb   : > { %5252 = vst.msk [vmem:[%s8165_s7 + $0x70] sm:$0xff] %vm334_vm0, %v5236_v47 }
 0xc00   : > { %v5219_v43 = vpop.f32.mrf.mxu2 }
 0xc01   : > { %v5237_v55 = vadd.f32 %v5219_v43, %v4066_v30 }
 0xc03   : > { %5253 = vst.msk [vmem:[%s8165_s7 + $0x78] sm:$0xff] %vm334_vm0, %v5237_v55 }
 0xc04   : > { %6223 = shalt.err (!%p6220_p12)
}
 0xc05   : > { %s6283_s19 = smov 128   ;;  %s6284_s7 = smov 8  }
 0xc06   : > { %5661 = dma.vmem_to_hbm [thread:$0]  (%p6389_p3), %s5268_s15, 2048, %s5270_s20, %s5255_s25, %s6283_s19, %s6283_s19, %s6284_s7  }
 0xc07 PF: > { %s5284_s12 = sand.u32 1, %s6254_s21   ;;  %p8384_p13 = scmp.ge.s32.totalorder %s6266_s24, 2 }
 0xc08   : > { %s5285_s10 = scalar_lea.sflag [#allocation4], %s5284_s12 }
 0xc09   : > { %p5672_p0 = pnand %p8384_p13, %p6355_p6 }
 0xc0b   : > { %p5673_p5 = pneg %p5672_p0 }
 0xc0d   : > { %6249 = dma.done.wait (%p5673_p5), %s5285_s10, 2048  }
 0xc0e   : > { %6251 = vsyncadd (%p5673_p5), %s5285_s10, 4294965248  ;;  %p20_p7 = scmp.ge.s32.totalorder %s6373_s11, 4   ;;  %s8385_s21 = smov %s6258_s22 }
 0xc0f   : > { %s8386_s22 = smov %s6262_s23  ;;  %s8387_s23 = smov %s6385_s16 }
 0xc10   : > { %s8388_s24 = smov %s6373_s11  ;;  %22 = sbr.rel (!%p20_p7) target bundleno = 6 (0x6), region = 99 }
 0xc15   :  { %5291 = vsyncpa [#allocation3], 1 }
 0xc16   :  { %5293 = vsyncpa [#allocation3 + $0x1], 1 }
 0xc17   :  { %5294 = vsyncpa [#allocation6], 1 }
 0xc18   :  { %5295 = vsyncpa [#allocation4], 1 }
 0xc19   :  { %5297 = vsyncpa [#allocation4 + $0x1], 1 }

</bundles_post_ra>
